<compile_context>
chip_gen: v6e
topology: v6e:2x2x1
jax: 0.10.0
libtpu: 0.0.40
codegen_flags: <defaults>
</compile_context>

<pallas_src>
import functools

import jax
import jax.numpy as jnp
from jax.experimental import pallas as pl
from jax.experimental.pallas import tpu as pltpu

HDP = 8     # per-head dim padded to 8 lanes (hd=7 -> 8, hd=4 -> 8) via zero-padded weights
SLAB = 64   # lane width of each q/k/v section in the fused QKV weight


# ---------------------------------------------------------------------------
# Pallas kernel: SelfAttention + residual + LayerNorm(last dim) + softmax(dim=-2)
# One grid step == one batch element.
# ---------------------------------------------------------------------------
def _sasm_stage_kernel(x_ref, wqkv_ref, bqkv_ref, wp_ref, lnp_ref, o_ref, oh_ref,
                       *, num_heads, head_dim, eps=1e-12):
    """x_ref/o_ref: (1, S, D) block (one batch element per grid step).

    wqkv: (D, 3*SLAB) bf16 fused QKV weight, head-major, zero-padded (8 lanes/head,
          64 lanes/section).
    bqkv: (1, 3*SLAB) f32 fused QKV bias (same padding, padded lanes exactly zero).
    wp:   (num_heads*HDP, D) bf16 head-major output-projection (zero-padded rows).
    lnp:  (3, D) f32 = [proj_bias; gamma; beta].
    oh_ref: (S, num_heads*HDP) bf16 VMEM scratch holding per-head attention outputs.
    """
    x = x_ref[0]                                            # (S, D) f32 residual
    scale = float(head_dim) ** -0.5

    xb = x.astype(jnp.bfloat16)

    # Fused Q/K/V projection: one MXU pass over all S rows.
    qkv = jnp.dot(xb, wqkv_ref[...],
                  preferred_element_type=jnp.float32) + bqkv_ref[...]   # (S, 3*SLAB) f32

    q = qkv[:, 0:SLAB].astype(jnp.bfloat16)                 # (S, SLAB) bf16
    k = qkv[:, SLAB:2 * SLAB].astype(jnp.bfloat16)
    v = qkv[:, 2 * SLAB:3 * SLAB].astype(jnp.bfloat16)

    for h in range(num_heads):                              # static unroll over heads
        c0 = h * HDP
        qh = q[:, c0:c0 + HDP]                              # (S, HDP) bf16
        kh = k[:, c0:c0 + HDP]
        vh = v[:, c0:c0 + HDP]

        # attention scores + softmax over keys (padded lanes are exact zeros)
        s = jax.lax.dot_general(qh, kh, (((1,), (1,)), ((), ())),
                                preferred_element_type=jnp.float32) * scale
        s = s - jnp.max(s, axis=-1, keepdims=True)
        p = jnp.exp(s)
        p = p * pl.reciprocal(jnp.sum(p, axis=-1, keepdims=True), approx=True)

        oh = jnp.dot(p.astype(jnp.bfloat16), vh,
                     preferred_element_type=jnp.float32)    # (S, HDP) f32
        oh_ref[:, c0:c0 + HDP] = oh.astype(jnp.bfloat16)    # head's disjoint lane slab

    # Single fused output projection over all heads (replaces per-head acc).
    proj = jnp.dot(oh_ref[...], wp_ref[...],
                   preferred_element_type=jnp.float32)      # (S, D) f32

    bp = lnp_ref[0:1, :]
    gamma = lnp_ref[1:2, :]
    beta = lnp_ref[2:3, :]

    # residual add (float32 path)
    xr = proj + bp + x

    # LayerNorm over the last dim (biased variance, eps inside sqrt)
    u = jnp.mean(xr, axis=-1, keepdims=True)
    var = jnp.mean((xr - u) ** 2, axis=-1, keepdims=True)
    xn = (xr - u) * jax.lax.rsqrt(var + eps)
    xn = gamma * xn + beta

    # softmax over dim=-2 (the sequence axis); exact reciprocal for the final output
    m = jnp.max(xn, axis=0, keepdims=True)
    e = jnp.exp(xn - m)
    sm = e * pl.reciprocal(jnp.sum(e, axis=0, keepdims=True), approx=False)

    o_ref[0] = sm.astype(o_ref.dtype)


def sasm_stage(x, params, *, num_heads):
    """x: (B, S, D) f32 -> (B, S, D) f32."""
    B, S, D = x.shape
    head_dim = D // num_heads
    w = params
    kernel = functools.partial(_sasm_stage_kernel, num_heads=num_heads,
                               head_dim=head_dim)

    def _rep(arr):  # full-array block, replicated across the batch grid
        n = arr.ndim
        return pl.BlockSpec(arr.shape, lambda b, _n=n: (0,) * _n)

    out = pl.pallas_call(
        kernel,
        out_shape=jax.ShapeDtypeStruct((B, S, D), jnp.float32),
        grid_spec=pltpu.PrefetchScalarGridSpec(
            num_scalar_prefetch=0,
            grid=(B,),
            in_specs=[
                pl.BlockSpec((1, S, D), lambda b: (b, 0, 0)),
                _rep(w["wqkv"]), _rep(w["bqkv"]), _rep(w["wp"]), _rep(w["lnp"]),
            ],
            out_specs=pl.BlockSpec((1, S, D), lambda b: (b, 0, 0)),
            scratch_shapes=[pltpu.VMEM((S, num_heads * HDP), jnp.bfloat16)],
        ),
        compiler_params=pltpu.CompilerParams(
            dimension_semantics=("parallel",)),
    )(x, w["wqkv"], w["bqkv"], w["wp"], w["lnp"])
    return out


# ---------------------------------------------------------------------------
# Parameter construction (PyTorch Linear layout) + repacking for the kernel
# ---------------------------------------------------------------------------
def init_attention_params(key, dim):
    k1, k2, k3, k4 = jax.random.split(key, 4)
    qkv_w = jax.random.normal(k1, (3 * dim, dim), jnp.float32) * 0.02
    qkv_b = jax.random.normal(k2, (3 * dim,), jnp.float32) * 0.02
    proj_w = jax.random.normal(k3, (dim, dim), jnp.float32) * 0.02
    proj_b = jax.random.normal(k4, (dim,), jnp.float32) * 0.02
    gamma = jnp.ones((dim,), jnp.float32)    # LayerNorm init
    beta = jnp.zeros((dim,), jnp.float32)
    return dict(qkv_w=qkv_w, qkv_b=qkv_b, proj_w=proj_w, proj_b=proj_b,
                gamma=gamma, beta=beta)


def prepare_kernel_params(p, num_heads):
    """Repack PyTorch-layout weights into the kernel layout:
      - fused (D, 3*SLAB) bf16 QKV weight / (1, 3*SLAB) f32 bias, head-major,
        8 lanes per head and 64 lanes per q/k/v section (padding exactly zero);
      - (num_heads*HDP, D) bf16 head-major output-projection slab;
      - (3, D) f32 [proj_bias; gamma; beta]."""
    D = p["proj_w"].shape[0]
    hd = D // num_heads
    HP = num_heads * HDP
    assert HP <= SLAB
    qkv_w, qkv_b = p["qkv_w"], p["qkv_b"]

    def section(idx):
        base = idx * D
        w = jnp.zeros((D, SLAB), jnp.float32)
        b = jnp.zeros((SLAB,), jnp.float32)
        for h in range(num_heads):
            wblk = qkv_w[base + h * hd: base + (h + 1) * hd, :].T    # (D, hd)
            bblk = qkv_b[base + h * hd: base + (h + 1) * hd]
            w = w.at[:, h * HDP: h * HDP + hd].set(wblk)
            b = b.at[h * HDP: h * HDP + hd].set(bblk)
        return w, b

    ws, bs = zip(*(section(i) for i in range(3)))
    wqkv = jnp.concatenate(ws, axis=1).astype(jnp.bfloat16)          # (D, 3*SLAB)
    bqkv = jnp.concatenate(bs)[None, :].astype(jnp.float32)          # (1, 3*SLAB)

    wp = jnp.zeros((HP, D), jnp.float32)
    for h in range(num_heads):
        blk = p["proj_w"][:, h * hd:(h + 1) * hd].T                  # (hd, D)
        wp = wp.at[h * HDP: h * HDP + hd, :].set(blk)
    wp = wp.astype(jnp.bfloat16)                                     # (HP, D)

    lnp = jnp.stack([p["proj_b"], p["gamma"], p["beta"]],
                    axis=0).astype(jnp.float32)                      # (3, D)

    return dict(wqkv=wqkv, bqkv=bqkv, wp=wp, lnp=lnp)


# ---------------------------------------------------------------------------
# Full CNN_SASM forward (post-backbone part)
# ---------------------------------------------------------------------------
def cnn_sasm_forward(feat, ch_kernel_params, sp_kernel_params):
    """feat: (B, C, H, W) backbone feature map, H*W == 49."""
    B, C, H, W = feat.shape
    N = H * W
    x = feat.reshape(B, C, N)                               # (B, C, 49)
    # channel self-attention + residual + LayerNorm(49) + softmax over dim=-2
    xc = sasm_stage(x, ch_kernel_params, num_heads=7)
    # NOTE: PyTorch does a raw row-major reshape here (NOT a transpose); it is a
    # free metadata op at the XLA level.
    xs_in = xc.reshape(B, N, C)                             # (B, 49, C)
    # spatial self-attention + residual + LayerNorm(C) + softmax over dim=-2
    xs = sasm_stage(xs_in, sp_kernel_params, num_heads=8)
    # permute(0,2,1) then reshape back to the feature-map layout
    return jnp.transpose(xs, (0, 2, 1)).reshape(B, C, H, W)


# ---------------------------------------------------------------------------
# Pure-JAX reference (mirrors the PyTorch module exactly) for verification
# ---------------------------------------------------------------------------
def _ref_self_attention(x, p, num_heads):
    B, N, C = x.shape
    qkv = x @ p["qkv_w"].T + p["qkv_b"]
    qkv = qkv.reshape(B, N, 3, num_heads, C // num_heads).transpose(2, 0, 3, 1, 4)
    q, k, v = qkv[0], qkv[1], qkv[2]
    scale = (C // num_heads) ** -0.5
    attn = jnp.einsum("bhnd,bhmd->bhnm", q, k, precision="highest") * scale
    attn = jax.nn.softmax(attn, axis=-1)
    o = jnp.einsum("bhnm,bhmd->bhnd", attn, v, precision="highest")
    o = o.transpose(0, 2, 1, 3).reshape(B, N, C)
    return o @ p["proj_w"].T + p["proj_b"]


def _ref_layernorm(x, gamma, beta, eps=1e-12):
    u = x.mean(-1, keepdims=True)
    s = ((x - u) ** 2).mean(-1, keepdims=True)
    return gamma * (x - u) / jnp.sqrt(s + eps) + beta


def ref_forward(feat, ch_params, sp_params):
    B, C, H, W = feat.shape
    N = H * W
    x = feat.reshape(B, C, N)
    xc = _ref_self_attention(x, ch_params, 7) + x
    xc = jax.nn.softmax(_ref_layernorm(xc, ch_params["gamma"], ch_params["beta"]),
                        axis=-2)
    rs = xc.reshape(B, N, C)
    xs = _ref_self_attention(rs, sp_params, 8) + rs
    xs = jax.nn.softmax(_ref_layernorm(xs, sp_params["gamma"], sp_params["beta"]),
                        axis=-2)
    return jnp.transpose(xs, (0, 2, 1)).reshape(B, C, H, W)


# ---------------------------------------------------------------------------
if __name__ == "__main__":
    key = jax.random.PRNGKey(0)
    k_feat, k_ch, k_sp = jax.random.split(key, 3)

    # Small, module-consistent shapes: backbone feature map (B, C, 7, 7),
    # H*W = 49 (hard-coded channel-attention dim), C divisible by 8 (spatial heads).
    B, C, H, W = 2, 32, 7, 7
    x = jax.random.normal(k_feat, (B, C, H, W), jnp.float32)

    ch_params = init_attention_params(k_ch, dim=H * W)   # channel attn, dim=49, 7 heads
    sp_params = init_attention_params(k_sp, dim=C)       # spatial attn, dim=C, 8 heads

    ch_kp = prepare_kernel_params(ch_params, num_heads=7)
    sp_kp = prepare_kernel_params(sp_params, num_heads=8)

    fwd = jax.jit(cnn_sasm_forward)
    out = jax.block_until_ready(fwd(x, ch_kp, sp_kp))

    ref = jax.block_until_ready(ref_forward(x, ch_params, sp_params))
    assert out.shape == (B, C, H, W)
    err = jnp.max(jnp.abs(out - ref))
    assert jnp.allclose(out, ref, atol=3e-3, rtol=0.0), f"max abs err = {err}"

    print("KERNEL_OK")
</pallas_src>

<mosaic_0001>
module attributes {stable_mosaic.version = 11 : i64} {
  func.func @_sasm_stage_kernel(%arg0: i32, %arg1: memref<1x32x49xf32, #tpu.memory_space<vmem>>, %arg2: memref<49x192xbf16, #tpu.memory_space<vmem>>, %arg3: memref<1x192xf32, #tpu.memory_space<vmem>>, %arg4: memref<56x49xbf16, #tpu.memory_space<vmem>>, %arg5: memref<3x49xf32, #tpu.memory_space<vmem>>, %arg6: memref<1x32x49xf32, #tpu.memory_space<vmem>>, %arg7: memref<32x56xbf16, #tpu.memory_space<vmem>>) attributes {dimension_semantics = [#tpu.dimension_semantics<parallel>], iteration_bounds = array<i64: 2>, scalar_prefetch = 0 : i64, scratch_operands = 1 : i64, tpu.core_type = #tpu.core_type<tc>, window_params = [{transform_indices = @transform_0, window_bounds = array<i64: 1, 32, 49>}, {pipeline_mode = #tpu.pipeline_mode<synchronous>, transform_indices = @transform_1, window_bounds = array<i64: 49, 192>}, {pipeline_mode = #tpu.pipeline_mode<synchronous>, transform_indices = @transform_2, window_bounds = array<i64: 1, 192>}, {pipeline_mode = #tpu.pipeline_mode<synchronous>, transform_indices = @transform_3, window_bounds = array<i64: 56, 49>}, {pipeline_mode = #tpu.pipeline_mode<synchronous>, transform_indices = @transform_4, window_bounds = array<i64: 3, 49>}, {transform_indices = @transform_5, window_bounds = array<i64: 1, 32, 49>}]} {
    %c0 = arith.constant 0 : index
    %c0_0 = arith.constant 0 : index
    %c0_1 = arith.constant 0 : index
    %0 = vector.load %arg1[%c0, %c0_0, %c0_1] : memref<1x32x49xf32, #tpu.memory_space<vmem>>, vector<1x32x49xf32>
    %1 = vector.shape_cast %0 : vector<1x32x49xf32> to vector<32x49xf32>
    %2 = arith.truncf %1 : vector<32x49xf32> to vector<32x49xbf16>
    %c0_2 = arith.constant 0 : index
    %c0_3 = arith.constant 0 : index
    %3 = vector.load %arg2[%c0_2, %c0_3] : memref<49x192xbf16, #tpu.memory_space<vmem>>, vector<49x192xbf16>
    %cst = arith.constant dense<0.000000e+00> : vector<32x192xf32>
    %4 = tpu.matmul %2, %3, %cst {dimension_numbers = #tpu.dot_dimension_numbers<[1], [0], [0], [1], [0, 0, 1, 1], [], []>} : vector<32x49xbf16>, vector<49x192xbf16>, vector<32x192xf32> -> vector<32x192xf32>
    %c0_4 = arith.constant 0 : index
    %c0_5 = arith.constant 0 : index
    %5 = vector.load %arg3[%c0_4, %c0_5] : memref<1x192xf32, #tpu.memory_space<vmem>>, vector<1x192xf32>
    %6 = vector.broadcast %5 : vector<1x192xf32> to vector<32x192xf32>
    %7 = arith.addf %4, %6 : vector<32x192xf32>
    %8 = vector.extract_strided_slice %7 {offsets = [0, 0], sizes = [32, 64], strides = [1, 1]} : vector<32x192xf32> to vector<32x64xf32>
    %9 = arith.truncf %8 : vector<32x64xf32> to vector<32x64xbf16>
    %10 = vector.extract_strided_slice %7 {offsets = [0, 64], sizes = [32, 64], strides = [1, 1]} : vector<32x192xf32> to vector<32x64xf32>
    %11 = arith.truncf %10 : vector<32x64xf32> to vector<32x64xbf16>
    %12 = vector.extract_strided_slice %7 {offsets = [0, 128], sizes = [32, 64], strides = [1, 1]} : vector<32x192xf32> to vector<32x64xf32>
    %13 = arith.truncf %12 : vector<32x64xf32> to vector<32x64xbf16>
    %14 = vector.extract_strided_slice %9 {offsets = [0, 0], sizes = [32, 8], strides = [1, 1]} : vector<32x64xbf16> to vector<32x8xbf16>
    %15 = vector.extract_strided_slice %11 {offsets = [0, 0], sizes = [32, 8], strides = [1, 1]} : vector<32x64xbf16> to vector<32x8xbf16>
    %16 = vector.extract_strided_slice %13 {offsets = [0, 0], sizes = [32, 8], strides = [1, 1]} : vector<32x64xbf16> to vector<32x8xbf16>
    %cst_6 = arith.constant dense<0.000000e+00> : vector<32x32xf32>
    %17 = tpu.matmul %14, %15, %cst_6 {dimension_numbers = #tpu.dot_dimension_numbers<[1], [1], [0], [0], [0, 0, 1, 0], [], []>} : vector<32x8xbf16>, vector<32x8xbf16>, vector<32x32xf32> -> vector<32x32xf32>
    %cst_7 = arith.constant 0.377964467 : f32
    %18 = vector.broadcast %cst_7 : f32 to vector<32x32xf32>
    %19 = arith.mulf %17, %18 : vector<32x32xf32>
    %cst_8 = arith.constant dense<0xFF800000> : vector<32xf32>
    %20 = vector.multi_reduction <maximumf>, %19, %cst_8 [1] : vector<32x32xf32> to vector<32xf32>
    %21 = vector.shape_cast %20 : vector<32xf32> to vector<32x1xf32>
    %22 = vector.broadcast %21 : vector<32x1xf32> to vector<32x32xf32>
    %23 = arith.subf %19, %22 : vector<32x32xf32>
    %24 = math.exp %23 : vector<32x32xf32>
    %cst_9 = arith.constant dense<0.000000e+00> : vector<32xf32>
    %25 = vector.multi_reduction <add>, %24, %cst_9 [1] : vector<32x32xf32> to vector<32xf32>
    %26 = vector.shape_cast %25 : vector<32xf32> to vector<32x1xf32>
    %27 = tpu.reciprocal %26 {approx = true} : vector<32x1xf32> -> vector<32x1xf32>
    %28 = vector.broadcast %27 : vector<32x1xf32> to vector<32x32xf32>
    %29 = arith.mulf %24, %28 : vector<32x32xf32>
    %30 = arith.truncf %29 : vector<32x32xf32> to vector<32x32xbf16>
    %cst_10 = arith.constant dense<0.000000e+00> : vector<32x8xf32>
    %31 = tpu.matmul %30, %16, %cst_10 {dimension_numbers = #tpu.dot_dimension_numbers<[1], [0], [0], [1], [0, 0, 1, 1], [], []>} : vector<32x32xbf16>, vector<32x8xbf16>, vector<32x8xf32> -> vector<32x8xf32>
    %32 = arith.truncf %31 : vector<32x8xf32> to vector<32x8xbf16>
    %c0_11 = arith.constant 0 : index
    %c0_12 = arith.constant 0 : index
    %33 = vector.load %arg7[%c0_11, %c0_12] : memref<32x56xbf16, #tpu.memory_space<vmem>>, vector<32x8xbf16>
    tpu.vector_store %arg7[%c0_11, %c0_12], %32 {strides = array<i32>} : memref<32x56xbf16, #tpu.memory_space<vmem>>, vector<32x8xbf16>,
    %34 = vector.extract_strided_slice %9 {offsets = [0, 8], sizes = [32, 8], strides = [1, 1]} : vector<32x64xbf16> to vector<32x8xbf16>
    %35 = vector.extract_strided_slice %11 {offsets = [0, 8], sizes = [32, 8], strides = [1, 1]} : vector<32x64xbf16> to vector<32x8xbf16>
    %36 = vector.extract_strided_slice %13 {offsets = [0, 8], sizes = [32, 8], strides = [1, 1]} : vector<32x64xbf16> to vector<32x8xbf16>
    %cst_13 = arith.constant dense<0.000000e+00> : vector<32x32xf32>
    %37 = tpu.matmul %34, %35, %cst_13 {dimension_numbers = #tpu.dot_dimension_numbers<[1], [1], [0], [0], [0, 0, 1, 0], [], []>} : vector<32x8xbf16>, vector<32x8xbf16>, vector<32x32xf32> -> vector<32x32xf32>
    %cst_14 = arith.constant 0.377964467 : f32
    %38 = vector.broadcast %cst_14 : f32 to vector<32x32xf32>
    %39 = arith.mulf %37, %38 : vector<32x32xf32>
    %cst_15 = arith.constant dense<0xFF800000> : vector<32xf32>
    %40 = vector.multi_reduction <maximumf>, %39, %cst_15 [1] : vector<32x32xf32> to vector<32xf32>
    %41 = vector.shape_cast %40 : vector<32xf32> to vector<32x1xf32>
    %42 = vector.broadcast %41 : vector<32x1xf32> to vector<32x32xf32>
    %43 = arith.subf %39, %42 : vector<32x32xf32>
    %44 = math.exp %43 : vector<32x32xf32>
    %cst_16 = arith.constant dense<0.000000e+00> : vector<32xf32>
    %45 = vector.multi_reduction <add>, %44, %cst_16 [1] : vector<32x32xf32> to vector<32xf32>
    %46 = vector.shape_cast %45 : vector<32xf32> to vector<32x1xf32>
    %47 = tpu.reciprocal %46 {approx = true} : vector<32x1xf32> -> vector<32x1xf32>
    %48 = vector.broadcast %47 : vector<32x1xf32> to vector<32x32xf32>
    %49 = arith.mulf %44, %48 : vector<32x32xf32>
    %50 = arith.truncf %49 : vector<32x32xf32> to vector<32x32xbf16>
    %cst_17 = arith.constant dense<0.000000e+00> : vector<32x8xf32>
    %51 = tpu.matmul %50, %36, %cst_17 {dimension_numbers = #tpu.dot_dimension_numbers<[1], [0], [0], [1], [0, 0, 1, 1], [], []>} : vector<32x32xbf16>, vector<32x8xbf16>, vector<32x8xf32> -> vector<32x8xf32>
    %52 = arith.truncf %51 : vector<32x8xf32> to vector<32x8xbf16>
    %c0_18 = arith.constant 0 : index
    %c8 = arith.constant 8 : index
    %53 = vector.load %arg7[%c0_18, %c8] : memref<32x56xbf16, #tpu.memory_space<vmem>>, vector<32x8xbf16>
    tpu.vector_store %arg7[%c0_18, %c8], %52 {strides = array<i32>} : memref<32x56xbf16, #tpu.memory_space<vmem>>, vector<32x8xbf16>,
    %54 = vector.extract_strided_slice %9 {offsets = [0, 16], sizes = [32, 8], strides = [1, 1]} : vector<32x64xbf16> to vector<32x8xbf16>
    %55 = vector.extract_strided_slice %11 {offsets = [0, 16], sizes = [32, 8], strides = [1, 1]} : vector<32x64xbf16> to vector<32x8xbf16>
    %56 = vector.extract_strided_slice %13 {offsets = [0, 16], sizes = [32, 8], strides = [1, 1]} : vector<32x64xbf16> to vector<32x8xbf16>
    %cst_19 = arith.constant dense<0.000000e+00> : vector<32x32xf32>
    %57 = tpu.matmul %54, %55, %cst_19 {dimension_numbers = #tpu.dot_dimension_numbers<[1], [1], [0], [0], [0, 0, 1, 0], [], []>} : vector<32x8xbf16>, vector<32x8xbf16>, vector<32x32xf32> -> vector<32x32xf32>
    %cst_20 = arith.constant 0.377964467 : f32
    %58 = vector.broadcast %cst_20 : f32 to vector<32x32xf32>
    %59 = arith.mulf %57, %58 : vector<32x32xf32>
    %cst_21 = arith.constant dense<0xFF800000> : vector<32xf32>
    %60 = vector.multi_reduction <maximumf>, %59, %cst_21 [1] : vector<32x32xf32> to vector<32xf32>
    %61 = vector.shape_cast %60 : vector<32xf32> to vector<32x1xf32>
    %62 = vector.broadcast %61 : vector<32x1xf32> to vector<32x32xf32>
    %63 = arith.subf %59, %62 : vector<32x32xf32>
    %64 = math.exp %63 : vector<32x32xf32>
    %cst_22 = arith.constant dense<0.000000e+00> : vector<32xf32>
    %65 = vector.multi_reduction <add>, %64, %cst_22 [1] : vector<32x32xf32> to vector<32xf32>
    %66 = vector.shape_cast %65 : vector<32xf32> to vector<32x1xf32>
    %67 = tpu.reciprocal %66 {approx = true} : vector<32x1xf32> -> vector<32x1xf32>
    %68 = vector.broadcast %67 : vector<32x1xf32> to vector<32x32xf32>
    %69 = arith.mulf %64, %68 : vector<32x32xf32>
    %70 = arith.truncf %69 : vector<32x32xf32> to vector<32x32xbf16>
    %cst_23 = arith.constant dense<0.000000e+00> : vector<32x8xf32>
    %71 = tpu.matmul %70, %56, %cst_23 {dimension_numbers = #tpu.dot_dimension_numbers<[1], [0], [0], [1], [0, 0, 1, 1], [], []>} : vector<32x32xbf16>, vector<32x8xbf16>, vector<32x8xf32> -> vector<32x8xf32>
    %72 = arith.truncf %71 : vector<32x8xf32> to vector<32x8xbf16>
    %c0_24 = arith.constant 0 : index
    %c16 = arith.constant 16 : index
    %73 = vector.load %arg7[%c0_24, %c16] : memref<32x56xbf16, #tpu.memory_space<vmem>>, vector<32x8xbf16>
    tpu.vector_store %arg7[%c0_24, %c16], %72 {strides = array<i32>} : memref<32x56xbf16, #tpu.memory_space<vmem>>, vector<32x8xbf16>,
    %74 = vector.extract_strided_slice %9 {offsets = [0, 24], sizes = [32, 8], strides = [1, 1]} : vector<32x64xbf16> to vector<32x8xbf16>
    %75 = vector.extract_strided_slice %11 {offsets = [0, 24], sizes = [32, 8], strides = [1, 1]} : vector<32x64xbf16> to vector<32x8xbf16>
    %76 = vector.extract_strided_slice %13 {offsets = [0, 24], sizes = [32, 8], strides = [1, 1]} : vector<32x64xbf16> to vector<32x8xbf16>
    %cst_25 = arith.constant dense<0.000000e+00> : vector<32x32xf32>
    %77 = tpu.matmul %74, %75, %cst_25 {dimension_numbers = #tpu.dot_dimension_numbers<[1], [1], [0], [0], [0, 0, 1, 0], [], []>} : vector<32x8xbf16>, vector<32x8xbf16>, vector<32x32xf32> -> vector<32x32xf32>
    %cst_26 = arith.constant 0.377964467 : f32
    %78 = vector.broadcast %cst_26 : f32 to vector<32x32xf32>
    %79 = arith.mulf %77, %78 : vector<32x32xf32>
    %cst_27 = arith.constant dense<0xFF800000> : vector<32xf32>
    %80 = vector.multi_reduction <maximumf>, %79, %cst_27 [1] : vector<32x32xf32> to vector<32xf32>
    %81 = vector.shape_cast %80 : vector<32xf32> to vector<32x1xf32>
    %82 = vector.broadcast %81 : vector<32x1xf32> to vector<32x32xf32>
    %83 = arith.subf %79, %82 : vector<32x32xf32>
    %84 = math.exp %83 : vector<32x32xf32>
    %cst_28 = arith.constant dense<0.000000e+00> : vector<32xf32>
    %85 = vector.multi_reduction <add>, %84, %cst_28 [1] : vector<32x32xf32> to vector<32xf32>
    %86 = vector.shape_cast %85 : vector<32xf32> to vector<32x1xf32>
    %87 = tpu.reciprocal %86 {approx = true} : vector<32x1xf32> -> vector<32x1xf32>
    %88 = vector.broadcast %87 : vector<32x1xf32> to vector<32x32xf32>
    %89 = arith.mulf %84, %88 : vector<32x32xf32>
    %90 = arith.truncf %89 : vector<32x32xf32> to vector<32x32xbf16>
    %cst_29 = arith.constant dense<0.000000e+00> : vector<32x8xf32>
    %91 = tpu.matmul %90, %76, %cst_29 {dimension_numbers = #tpu.dot_dimension_numbers<[1], [0], [0], [1], [0, 0, 1, 1], [], []>} : vector<32x32xbf16>, vector<32x8xbf16>, vector<32x8xf32> -> vector<32x8xf32>
    %92 = arith.truncf %91 : vector<32x8xf32> to vector<32x8xbf16>
    %c0_30 = arith.constant 0 : index
    %c24 = arith.constant 24 : index
    %93 = vector.load %arg7[%c0_30, %c24] : memref<32x56xbf16, #tpu.memory_space<vmem>>, vector<32x8xbf16>
    tpu.vector_store %arg7[%c0_30, %c24], %92 {strides = array<i32>} : memref<32x56xbf16, #tpu.memory_space<vmem>>, vector<32x8xbf16>,
    %94 = vector.extract_strided_slice %9 {offsets = [0, 32], sizes = [32, 8], strides = [1, 1]} : vector<32x64xbf16> to vector<32x8xbf16>
    %95 = vector.extract_strided_slice %11 {offsets = [0, 32], sizes = [32, 8], strides = [1, 1]} : vector<32x64xbf16> to vector<32x8xbf16>
    %96 = vector.extract_strided_slice %13 {offsets = [0, 32], sizes = [32, 8], strides = [1, 1]} : vector<32x64xbf16> to vector<32x8xbf16>
    %cst_31 = arith.constant dense<0.000000e+00> : vector<32x32xf32>
    %97 = tpu.matmul %94, %95, %cst_31 {dimension_numbers = #tpu.dot_dimension_numbers<[1], [1], [0], [0], [0, 0, 1, 0], [], []>} : vector<32x8xbf16>, vector<32x8xbf16>, vector<32x32xf32> -> vector<32x32xf32>
    %cst_32 = arith.constant 0.377964467 : f32
    %98 = vector.broadcast %cst_32 : f32 to vector<32x32xf32>
    %99 = arith.mulf %97, %98 : vector<32x32xf32>
    %cst_33 = arith.constant dense<0xFF800000> : vector<32xf32>
    %100 = vector.multi_reduction <maximumf>, %99, %cst_33 [1] : vector<32x32xf32> to vector<32xf32>
    %101 = vector.shape_cast %100 : vector<32xf32> to vector<32x1xf32>
    %102 = vector.broadcast %101 : vector<32x1xf32> to vector<32x32xf32>
    %103 = arith.subf %99, %102 : vector<32x32xf32>
    %104 = math.exp %103 : vector<32x32xf32>
    %cst_34 = arith.constant dense<0.000000e+00> : vector<32xf32>
    %105 = vector.multi_reduction <add>, %104, %cst_34 [1] : vector<32x32xf32> to vector<32xf32>
    %106 = vector.shape_cast %105 : vector<32xf32> to vector<32x1xf32>
    %107 = tpu.reciprocal %106 {approx = true} : vector<32x1xf32> -> vector<32x1xf32>
    %108 = vector.broadcast %107 : vector<32x1xf32> to vector<32x32xf32>
    %109 = arith.mulf %104, %108 : vector<32x32xf32>
    %110 = arith.truncf %109 : vector<32x32xf32> to vector<32x32xbf16>
    %cst_35 = arith.constant dense<0.000000e+00> : vector<32x8xf32>
    %111 = tpu.matmul %110, %96, %cst_35 {dimension_numbers = #tpu.dot_dimension_numbers<[1], [0], [0], [1], [0, 0, 1, 1], [], []>} : vector<32x32xbf16>, vector<32x8xbf16>, vector<32x8xf32> -> vector<32x8xf32>
    %112 = arith.truncf %111 : vector<32x8xf32> to vector<32x8xbf16>
    %c0_36 = arith.constant 0 : index
    %c32 = arith.constant 32 : index
    %113 = vector.load %arg7[%c0_36, %c32] : memref<32x56xbf16, #tpu.memory_space<vmem>>, vector<32x8xbf16>
    tpu.vector_store %arg7[%c0_36, %c32], %112 {strides = array<i32>} : memref<32x56xbf16, #tpu.memory_space<vmem>>, vector<32x8xbf16>,
    %114 = vector.extract_strided_slice %9 {offsets = [0, 40], sizes = [32, 8], strides = [1, 1]} : vector<32x64xbf16> to vector<32x8xbf16>
    %115 = vector.extract_strided_slice %11 {offsets = [0, 40], sizes = [32, 8], strides = [1, 1]} : vector<32x64xbf16> to vector<32x8xbf16>
    %116 = vector.extract_strided_slice %13 {offsets = [0, 40], sizes = [32, 8], strides = [1, 1]} : vector<32x64xbf16> to vector<32x8xbf16>
    %cst_37 = arith.constant dense<0.000000e+00> : vector<32x32xf32>
    %117 = tpu.matmul %114, %115, %cst_37 {dimension_numbers = #tpu.dot_dimension_numbers<[1], [1], [0], [0], [0, 0, 1, 0], [], []>} : vector<32x8xbf16>, vector<32x8xbf16>, vector<32x32xf32> -> vector<32x32xf32>
    %cst_38 = arith.constant 0.377964467 : f32
    %118 = vector.broadcast %cst_38 : f32 to vector<32x32xf32>
    %119 = arith.mulf %117, %118 : vector<32x32xf32>
    %cst_39 = arith.constant dense<0xFF800000> : vector<32xf32>
    %120 = vector.multi_reduction <maximumf>, %119, %cst_39 [1] : vector<32x32xf32> to vector<32xf32>
    %121 = vector.shape_cast %120 : vector<32xf32> to vector<32x1xf32>
    %122 = vector.broadcast %121 : vector<32x1xf32> to vector<32x32xf32>
    %123 = arith.subf %119, %122 : vector<32x32xf32>
    %124 = math.exp %123 : vector<32x32xf32>
    %cst_40 = arith.constant dense<0.000000e+00> : vector<32xf32>
    %125 = vector.multi_reduction <add>, %124, %cst_40 [1] : vector<32x32xf32> to vector<32xf32>
    %126 = vector.shape_cast %125 : vector<32xf32> to vector<32x1xf32>
    %127 = tpu.reciprocal %126 {approx = true} : vector<32x1xf32> -> vector<32x1xf32>
    %128 = vector.broadcast %127 : vector<32x1xf32> to vector<32x32xf32>
    %129 = arith.mulf %124, %128 : vector<32x32xf32>
    %130 = arith.truncf %129 : vector<32x32xf32> to vector<32x32xbf16>
    %cst_41 = arith.constant dense<0.000000e+00> : vector<32x8xf32>
    %131 = tpu.matmul %130, %116, %cst_41 {dimension_numbers = #tpu.dot_dimension_numbers<[1], [0], [0], [1], [0, 0, 1, 1], [], []>} : vector<32x32xbf16>, vector<32x8xbf16>, vector<32x8xf32> -> vector<32x8xf32>
    %132 = arith.truncf %131 : vector<32x8xf32> to vector<32x8xbf16>
    %c0_42 = arith.constant 0 : index
    %c40 = arith.constant 40 : index
    %133 = vector.load %arg7[%c0_42, %c40] : memref<32x56xbf16, #tpu.memory_space<vmem>>, vector<32x8xbf16>
    tpu.vector_store %arg7[%c0_42, %c40], %132 {strides = array<i32>} : memref<32x56xbf16, #tpu.memory_space<vmem>>, vector<32x8xbf16>,
    %134 = vector.extract_strided_slice %9 {offsets = [0, 48], sizes = [32, 8], strides = [1, 1]} : vector<32x64xbf16> to vector<32x8xbf16>
    %135 = vector.extract_strided_slice %11 {offsets = [0, 48], sizes = [32, 8], strides = [1, 1]} : vector<32x64xbf16> to vector<32x8xbf16>
    %136 = vector.extract_strided_slice %13 {offsets = [0, 48], sizes = [32, 8], strides = [1, 1]} : vector<32x64xbf16> to vector<32x8xbf16>
    %cst_43 = arith.constant dense<0.000000e+00> : vector<32x32xf32>
    %137 = tpu.matmul %134, %135, %cst_43 {dimension_numbers = #tpu.dot_dimension_numbers<[1], [1], [0], [0], [0, 0, 1, 0], [], []>} : vector<32x8xbf16>, vector<32x8xbf16>, vector<32x32xf32> -> vector<32x32xf32>
    %cst_44 = arith.constant 0.377964467 : f32
    %138 = vector.broadcast %cst_44 : f32 to vector<32x32xf32>
    %139 = arith.mulf %137, %138 : vector<32x32xf32>
    %cst_45 = arith.constant dense<0xFF800000> : vector<32xf32>
    %140 = vector.multi_reduction <maximumf>, %139, %cst_45 [1] : vector<32x32xf32> to vector<32xf32>
    %141 = vector.shape_cast %140 : vector<32xf32> to vector<32x1xf32>
    %142 = vector.broadcast %141 : vector<32x1xf32> to vector<32x32xf32>
    %143 = arith.subf %139, %142 : vector<32x32xf32>
    %144 = math.exp %143 : vector<32x32xf32>
    %cst_46 = arith.constant dense<0.000000e+00> : vector<32xf32>
    %145 = vector.multi_reduction <add>, %144, %cst_46 [1] : vector<32x32xf32> to vector<32xf32>
    %146 = vector.shape_cast %145 : vector<32xf32> to vector<32x1xf32>
    %147 = tpu.reciprocal %146 {approx = true} : vector<32x1xf32> -> vector<32x1xf32>
    %148 = vector.broadcast %147 : vector<32x1xf32> to vector<32x32xf32>
    %149 = arith.mulf %144, %148 : vector<32x32xf32>
    %150 = arith.truncf %149 : vector<32x32xf32> to vector<32x32xbf16>
    %cst_47 = arith.constant dense<0.000000e+00> : vector<32x8xf32>
    %151 = tpu.matmul %150, %136, %cst_47 {dimension_numbers = #tpu.dot_dimension_numbers<[1], [0], [0], [1], [0, 0, 1, 1], [], []>} : vector<32x32xbf16>, vector<32x8xbf16>, vector<32x8xf32> -> vector<32x8xf32>
    %152 = arith.truncf %151 : vector<32x8xf32> to vector<32x8xbf16>
    %c0_48 = arith.constant 0 : index
    %c48 = arith.constant 48 : index
    %153 = vector.load %arg7[%c0_48, %c48] : memref<32x56xbf16, #tpu.memory_space<vmem>>, vector<32x8xbf16>
    tpu.vector_store %arg7[%c0_48, %c48], %152 {strides = array<i32>} : memref<32x56xbf16, #tpu.memory_space<vmem>>, vector<32x8xbf16>,
    %c0_49 = arith.constant 0 : index
    %c0_50 = arith.constant 0 : index
    %154 = vector.load %arg7[%c0_49, %c0_50] : memref<32x56xbf16, #tpu.memory_space<vmem>>, vector<32x56xbf16>
    %c0_51 = arith.constant 0 : index
    %c0_52 = arith.constant 0 : index
    %155 = vector.load %arg4[%c0_51, %c0_52] : memref<56x49xbf16, #tpu.memory_space<vmem>>, vector<56x49xbf16>
    %cst_53 = arith.constant dense<0.000000e+00> : vector<32x49xf32>
    %156 = tpu.matmul %154, %155, %cst_53 {dimension_numbers = #tpu.dot_dimension_numbers<[1], [0], [0], [1], [0, 0, 1, 1], [], []>} : vector<32x56xbf16>, vector<56x49xbf16>, vector<32x49xf32> -> vector<32x49xf32>
    %c0_54 = arith.constant 0 : index
    %c0_55 = arith.constant 0 : index
    %157 = vector.load %arg5[%c0_54, %c0_55] : memref<3x49xf32, #tpu.memory_space<vmem>>, vector<1x49xf32>
    %c1 = arith.constant 1 : index
    %c0_56 = arith.constant 0 : index
    %158 = vector.load %arg5[%c1, %c0_56] : memref<3x49xf32, #tpu.memory_space<vmem>>, vector<1x49xf32>
    %c2 = arith.constant 2 : index
    %c0_57 = arith.constant 0 : index
    %159 = vector.load %arg5[%c2, %c0_57] : memref<3x49xf32, #tpu.memory_space<vmem>>, vector<1x49xf32>
    %160 = vector.broadcast %157 : vector<1x49xf32> to vector<32x49xf32>
    %161 = arith.addf %156, %160 : vector<32x49xf32>
    %162 = arith.addf %161, %1 : vector<32x49xf32>
    %cst_58 = arith.constant dense<0.000000e+00> : vector<32xf32>
    %163 = vector.multi_reduction <add>, %162, %cst_58 [1] : vector<32x49xf32> to vector<32xf32>
    %164 = vector.shape_cast %163 : vector<32xf32> to vector<32x1xf32>
    %cst_59 = arith.constant 4.900000e+01 : f32
    %165 = vector.broadcast %cst_59 : f32 to vector<32x1xf32>
    %166 = arith.divf %164, %165 : vector<32x1xf32>
    %167 = vector.broadcast %166 : vector<32x1xf32> to vector<32x49xf32>
    %168 = arith.subf %162, %167 : vector<32x49xf32>
    %169 = arith.mulf %168, %168 : vector<32x49xf32>
    %cst_60 = arith.constant dense<0.000000e+00> : vector<32xf32>
    %170 = vector.multi_reduction <add>, %169, %cst_60 [1] : vector<32x49xf32> to vector<32xf32>
    %171 = vector.shape_cast %170 : vector<32xf32> to vector<32x1xf32>
    %cst_61 = arith.constant 4.900000e+01 : f32
    %172 = vector.broadcast %cst_61 : f32 to vector<32x1xf32>
    %173 = arith.divf %171, %172 : vector<32x1xf32>
    %174 = vector.broadcast %166 : vector<32x1xf32> to vector<32x49xf32>
    %175 = arith.subf %162, %174 : vector<32x49xf32>
    %cst_62 = arith.constant 9.99999996E-13 : f32
    %176 = vector.broadcast %cst_62 : f32 to vector<32x1xf32>
    %177 = arith.addf %173, %176 : vector<32x1xf32>
    %178 = math.rsqrt %177 : vector<32x1xf32>
    %179 = vector.broadcast %178 : vector<32x1xf32> to vector<32x49xf32>
    %180 = arith.mulf %175, %179 : vector<32x49xf32>
    %181 = vector.broadcast %158 : vector<1x49xf32> to vector<32x49xf32>
    %182 = arith.mulf %181, %180 : vector<32x49xf32>
    %183 = vector.broadcast %159 : vector<1x49xf32> to vector<32x49xf32>
    %184 = arith.addf %182, %183 : vector<32x49xf32>
    %cst_63 = arith.constant dense<0xFF800000> : vector<49xf32>
    %185 = vector.multi_reduction <maximumf>, %184, %cst_63 [0] : vector<32x49xf32> to vector<49xf32>
    %186 = vector.shape_cast %185 : vector<49xf32> to vector<1x49xf32>
    %187 = vector.broadcast %186 : vector<1x49xf32> to vector<32x49xf32>
    %188 = arith.subf %184, %187 : vector<32x49xf32>
    %189 = math.exp %188 : vector<32x49xf32>
    %cst_64 = arith.constant dense<0.000000e+00> : vector<49xf32>
    %190 = vector.multi_reduction <add>, %189, %cst_64 [0] : vector<32x49xf32> to vector<49xf32>
    %191 = vector.shape_cast %190 : vector<49xf32> to vector<1x49xf32>
    %192 = tpu.reciprocal %191 : vector<1x49xf32> -> vector<1x49xf32>
    %193 = vector.broadcast %192 : vector<1x49xf32> to vector<32x49xf32>
    %194 = arith.mulf %189, %193 : vector<32x49xf32>
    %c0_65 = arith.constant 0 : index
    %c0_66 = arith.constant 0 : index
    %c0_67 = arith.constant 0 : index
    %195 = vector.load %arg6[%c0_65, %c0_66, %c0_67] : memref<1x32x49xf32, #tpu.memory_space<vmem>>, vector<1x32x49xf32>
    %196 = vector.shape_cast %195 : vector<1x32x49xf32> to vector<32x49xf32>
    %197 = vector.shape_cast %194 : vector<32x49xf32> to vector<1x32x49xf32>
    tpu.vector_store %arg6[%c0_65, %c0_66, %c0_67], %197 {strides = array<i32>} : memref<1x32x49xf32, #tpu.memory_space<vmem>>, vector<1x32x49xf32>,
    return
  }
  func.func @transform_0(%arg0: i32) -> (i32, i32, i32) {
    %c0_i32 = arith.constant 0 : i32
    %c0_i32_0 = arith.constant 0 : i32
    %c0_i32_1 = arith.constant 0 : i32
    return %arg0, %c0_i32, %c0_i32_0 : i32, i32, i32
  }
  func.func @transform_1(%arg0: i32) -> (i32, i32) {
    %c0_i32 = arith.constant 0 : i32
    %c0_i32_0 = arith.constant 0 : i32
    %c0_i32_1 = arith.constant 0 : i32
    return %c0_i32, %c0_i32_0 : i32, i32
  }
  func.func @transform_2(%arg0: i32) -> (i32, i32) {
    %c0_i32 = arith.constant 0 : i32
    %c0_i32_0 = arith.constant 0 : i32
    %c0_i32_1 = arith.constant 0 : i32
    return %c0_i32, %c0_i32_0 : i32, i32
  }
  func.func @transform_3(%arg0: i32) -> (i32, i32) {
    %c0_i32 = arith.constant 0 : i32
    %c0_i32_0 = arith.constant 0 : i32
    %c0_i32_1 = arith.constant 0 : i32
    return %c0_i32, %c0_i32_0 : i32, i32
  }
  func.func @transform_4(%arg0: i32) -> (i32, i32) {
    %c0_i32 = arith.constant 0 : i32
    %c0_i32_0 = arith.constant 0 : i32
    %c0_i32_1 = arith.constant 0 : i32
    return %c0_i32, %c0_i32_0 : i32, i32
  }
  func.func @transform_5(%arg0: i32) -> (i32, i32, i32) {
    %c0_i32 = arith.constant 0 : i32
    %c0_i32_0 = arith.constant 0 : i32
    %c0_i32_1 = arith.constant 0 : i32
    return %arg0, %c0_i32, %c0_i32_0 : i32, i32, i32
  }
}

module attributes {stable_mosaic.version = 11 : i64} {
  func.func @_sasm_stage_kernel(%arg0: i32, %arg1: memref<1x49x32xf32, #tpu.memory_space<vmem>>, %arg2: memref<32x192xbf16, #tpu.memory_space<vmem>>, %arg3: memref<1x192xf32, #tpu.memory_space<vmem>>, %arg4: memref<64x32xbf16, #tpu.memory_space<vmem>>, %arg5: memref<3x32xf32, #tpu.memory_space<vmem>>, %arg6: memref<1x49x32xf32, #tpu.memory_space<vmem>>, %arg7: memref<49x64xbf16, #tpu.memory_space<vmem>>) attributes {dimension_semantics = [#tpu.dimension_semantics<parallel>], iteration_bounds = array<i64: 2>, scalar_prefetch = 0 : i64, scratch_operands = 1 : i64, tpu.core_type = #tpu.core_type<tc>, window_params = [{transform_indices = @transform_0, window_bounds = array<i64: 1, 49, 32>}, {pipeline_mode = #tpu.pipeline_mode<synchronous>, transform_indices = @transform_1, window_bounds = array<i64: 32, 192>}, {pipeline_mode = #tpu.pipeline_mode<synchronous>, transform_indices = @transform_2, window_bounds = array<i64: 1, 192>}, {pipeline_mode = #tpu.pipeline_mode<synchronous>, transform_indices = @transform_3, window_bounds = array<i64: 64, 32>}, {pipeline_mode = #tpu.pipeline_mode<synchronous>, transform_indices = @transform_4, window_bounds = array<i64: 3, 32>}, {transform_indices = @transform_5, window_bounds = array<i64: 1, 49, 32>}]} {
    %c0 = arith.constant 0 : index
    %c0_0 = arith.constant 0 : index
    %c0_1 = arith.constant 0 : index
    %0 = vector.load %arg1[%c0, %c0_0, %c0_1] : memref<1x49x32xf32, #tpu.memory_space<vmem>>, vector<1x49x32xf32>
    %1 = vector.shape_cast %0 : vector<1x49x32xf32> to vector<49x32xf32>
    %2 = arith.truncf %1 : vector<49x32xf32> to vector<49x32xbf16>
    %c0_2 = arith.constant 0 : index
    %c0_3 = arith.constant 0 : index
    %3 = vector.load %arg2[%c0_2, %c0_3] : memref<32x192xbf16, #tpu.memory_space<vmem>>, vector<32x192xbf16>
    %cst = arith.constant dense<0.000000e+00> : vector<49x192xf32>
    %4 = tpu.matmul %2, %3, %cst {dimension_numbers = #tpu.dot_dimension_numbers<[1], [0], [0], [1], [0, 0, 1, 1], [], []>} : vector<49x32xbf16>, vector<32x192xbf16>, vector<49x192xf32> -> vector<49x192xf32>
    %c0_4 = arith.constant 0 : index
    %c0_5 = arith.constant 0 : index
    %5 = vector.load %arg3[%c0_4, %c0_5] : memref<1x192xf32, #tpu.memory_space<vmem>>, vector<1x192xf32>
    %6 = vector.broadcast %5 : vector<1x192xf32> to vector<49x192xf32>
    %7 = arith.addf %4, %6 : vector<49x192xf32>
    %8 = vector.extract_strided_slice %7 {offsets = [0, 0], sizes = [49, 64], strides = [1, 1]} : vector<49x192xf32> to vector<49x64xf32>
    %9 = arith.truncf %8 : vector<49x64xf32> to vector<49x64xbf16>
    %10 = vector.extract_strided_slice %7 {offsets = [0, 64], sizes = [49, 64], strides = [1, 1]} : vector<49x192xf32> to vector<49x64xf32>
    %11 = arith.truncf %10 : vector<49x64xf32> to vector<49x64xbf16>
    %12 = vector.extract_strided_slice %7 {offsets = [0, 128], sizes = [49, 64], strides = [1, 1]} : vector<49x192xf32> to vector<49x64xf32>
    %13 = arith.truncf %12 : vector<49x64xf32> to vector<49x64xbf16>
    %14 = vector.extract_strided_slice %9 {offsets = [0, 0], sizes = [49, 8], strides = [1, 1]} : vector<49x64xbf16> to vector<49x8xbf16>
    %15 = vector.extract_strided_slice %11 {offsets = [0, 0], sizes = [49, 8], strides = [1, 1]} : vector<49x64xbf16> to vector<49x8xbf16>
    %16 = vector.extract_strided_slice %13 {offsets = [0, 0], sizes = [49, 8], strides = [1, 1]} : vector<49x64xbf16> to vector<49x8xbf16>
    %cst_6 = arith.constant dense<0.000000e+00> : vector<49x49xf32>
    %17 = tpu.matmul %14, %15, %cst_6 {dimension_numbers = #tpu.dot_dimension_numbers<[1], [1], [0], [0], [0, 0, 1, 0], [], []>} : vector<49x8xbf16>, vector<49x8xbf16>, vector<49x49xf32> -> vector<49x49xf32>
    %cst_7 = arith.constant 5.000000e-01 : f32
    %18 = vector.broadcast %cst_7 : f32 to vector<49x49xf32>
    %19 = arith.mulf %17, %18 : vector<49x49xf32>
    %cst_8 = arith.constant dense<0xFF800000> : vector<49xf32>
    %20 = vector.multi_reduction <maximumf>, %19, %cst_8 [1] : vector<49x49xf32> to vector<49xf32>
    %21 = vector.shape_cast %20 : vector<49xf32> to vector<49x1xf32>
    %22 = vector.broadcast %21 : vector<49x1xf32> to vector<49x49xf32>
    %23 = arith.subf %19, %22 : vector<49x49xf32>
    %24 = math.exp %23 : vector<49x49xf32>
    %cst_9 = arith.constant dense<0.000000e+00> : vector<49xf32>
    %25 = vector.multi_reduction <add>, %24, %cst_9 [1] : vector<49x49xf32> to vector<49xf32>
    %26 = vector.shape_cast %25 : vector<49xf32> to vector<49x1xf32>
    %27 = tpu.reciprocal %26 {approx = true} : vector<49x1xf32> -> vector<49x1xf32>
    %28 = vector.broadcast %27 : vector<49x1xf32> to vector<49x49xf32>
    %29 = arith.mulf %24, %28 : vector<49x49xf32>
    %30 = arith.truncf %29 : vector<49x49xf32> to vector<49x49xbf16>
    %cst_10 = arith.constant dense<0.000000e+00> : vector<49x8xf32>
    %31 = tpu.matmul %30, %16, %cst_10 {dimension_numbers = #tpu.dot_dimension_numbers<[1], [0], [0], [1], [0, 0, 1, 1], [], []>} : vector<49x49xbf16>, vector<49x8xbf16>, vector<49x8xf32> -> vector<49x8xf32>
    %32 = arith.truncf %31 : vector<49x8xf32> to vector<49x8xbf16>
    %c0_11 = arith.constant 0 : index
    %c0_12 = arith.constant 0 : index
    %33 = vector.load %arg7[%c0_11, %c0_12] : memref<49x64xbf16, #tpu.memory_space<vmem>>, vector<49x8xbf16>
    tpu.vector_store %arg7[%c0_11, %c0_12], %32 {strides = array<i32>} : memref<49x64xbf16, #tpu.memory_space<vmem>>, vector<49x8xbf16>,
    %34 = vector.extract_strided_slice %9 {offsets = [0, 8], sizes = [49, 8], strides = [1, 1]} : vector<49x64xbf16> to vector<49x8xbf16>
    %35 = vector.extract_strided_slice %11 {offsets = [0, 8], sizes = [49, 8], strides = [1, 1]} : vector<49x64xbf16> to vector<49x8xbf16>
    %36 = vector.extract_strided_slice %13 {offsets = [0, 8], sizes = [49, 8], strides = [1, 1]} : vector<49x64xbf16> to vector<49x8xbf16>
    %cst_13 = arith.constant dense<0.000000e+00> : vector<49x49xf32>
    %37 = tpu.matmul %34, %35, %cst_13 {dimension_numbers = #tpu.dot_dimension_numbers<[1], [1], [0], [0], [0, 0, 1, 0], [], []>} : vector<49x8xbf16>, vector<49x8xbf16>, vector<49x49xf32> -> vector<49x49xf32>
    %cst_14 = arith.constant 5.000000e-01 : f32
    %38 = vector.broadcast %cst_14 : f32 to vector<49x49xf32>
    %39 = arith.mulf %37, %38 : vector<49x49xf32>
    %cst_15 = arith.constant dense<0xFF800000> : vector<49xf32>
    %40 = vector.multi_reduction <maximumf>, %39, %cst_15 [1] : vector<49x49xf32> to vector<49xf32>
    %41 = vector.shape_cast %40 : vector<49xf32> to vector<49x1xf32>
    %42 = vector.broadcast %41 : vector<49x1xf32> to vector<49x49xf32>
    %43 = arith.subf %39, %42 : vector<49x49xf32>
    %44 = math.exp %43 : vector<49x49xf32>
    %cst_16 = arith.constant dense<0.000000e+00> : vector<49xf32>
    %45 = vector.multi_reduction <add>, %44, %cst_16 [1] : vector<49x49xf32> to vector<49xf32>
    %46 = vector.shape_cast %45 : vector<49xf32> to vector<49x1xf32>
    %47 = tpu.reciprocal %46 {approx = true} : vector<49x1xf32> -> vector<49x1xf32>
    %48 = vector.broadcast %47 : vector<49x1xf32> to vector<49x49xf32>
    %49 = arith.mulf %44, %48 : vector<49x49xf32>
    %50 = arith.truncf %49 : vector<49x49xf32> to vector<49x49xbf16>
    %cst_17 = arith.constant dense<0.000000e+00> : vector<49x8xf32>
    %51 = tpu.matmul %50, %36, %cst_17 {dimension_numbers = #tpu.dot_dimension_numbers<[1], [0], [0], [1], [0, 0, 1, 1], [], []>} : vector<49x49xbf16>, vector<49x8xbf16>, vector<49x8xf32> -> vector<49x8xf32>
    %52 = arith.truncf %51 : vector<49x8xf32> to vector<49x8xbf16>
    %c0_18 = arith.constant 0 : index
    %c8 = arith.constant 8 : index
    %53 = vector.load %arg7[%c0_18, %c8] : memref<49x64xbf16, #tpu.memory_space<vmem>>, vector<49x8xbf16>
    tpu.vector_store %arg7[%c0_18, %c8], %52 {strides = array<i32>} : memref<49x64xbf16, #tpu.memory_space<vmem>>, vector<49x8xbf16>,
    %54 = vector.extract_strided_slice %9 {offsets = [0, 16], sizes = [49, 8], strides = [1, 1]} : vector<49x64xbf16> to vector<49x8xbf16>
    %55 = vector.extract_strided_slice %11 {offsets = [0, 16], sizes = [49, 8], strides = [1, 1]} : vector<49x64xbf16> to vector<49x8xbf16>
    %56 = vector.extract_strided_slice %13 {offsets = [0, 16], sizes = [49, 8], strides = [1, 1]} : vector<49x64xbf16> to vector<49x8xbf16>
    %cst_19 = arith.constant dense<0.000000e+00> : vector<49x49xf32>
    %57 = tpu.matmul %54, %55, %cst_19 {dimension_numbers = #tpu.dot_dimension_numbers<[1], [1], [0], [0], [0, 0, 1, 0], [], []>} : vector<49x8xbf16>, vector<49x8xbf16>, vector<49x49xf32> -> vector<49x49xf32>
    %cst_20 = arith.constant 5.000000e-01 : f32
    %58 = vector.broadcast %cst_20 : f32 to vector<49x49xf32>
    %59 = arith.mulf %57, %58 : vector<49x49xf32>
    %cst_21 = arith.constant dense<0xFF800000> : vector<49xf32>
    %60 = vector.multi_reduction <maximumf>, %59, %cst_21 [1] : vector<49x49xf32> to vector<49xf32>
    %61 = vector.shape_cast %60 : vector<49xf32> to vector<49x1xf32>
    %62 = vector.broadcast %61 : vector<49x1xf32> to vector<49x49xf32>
    %63 = arith.subf %59, %62 : vector<49x49xf32>
    %64 = math.exp %63 : vector<49x49xf32>
    %cst_22 = arith.constant dense<0.000000e+00> : vector<49xf32>
    %65 = vector.multi_reduction <add>, %64, %cst_22 [1] : vector<49x49xf32> to vector<49xf32>
    %66 = vector.shape_cast %65 : vector<49xf32> to vector<49x1xf32>
    %67 = tpu.reciprocal %66 {approx = true} : vector<49x1xf32> -> vector<49x1xf32>
    %68 = vector.broadcast %67 : vector<49x1xf32> to vector<49x49xf32>
    %69 = arith.mulf %64, %68 : vector<49x49xf32>
    %70 = arith.truncf %69 : vector<49x49xf32> to vector<49x49xbf16>
    %cst_23 = arith.constant dense<0.000000e+00> : vector<49x8xf32>
    %71 = tpu.matmul %70, %56, %cst_23 {dimension_numbers = #tpu.dot_dimension_numbers<[1], [0], [0], [1], [0, 0, 1, 1], [], []>} : vector<49x49xbf16>, vector<49x8xbf16>, vector<49x8xf32> -> vector<49x8xf32>
    %72 = arith.truncf %71 : vector<49x8xf32> to vector<49x8xbf16>
    %c0_24 = arith.constant 0 : index
    %c16 = arith.constant 16 : index
    %73 = vector.load %arg7[%c0_24, %c16] : memref<49x64xbf16, #tpu.memory_space<vmem>>, vector<49x8xbf16>
    tpu.vector_store %arg7[%c0_24, %c16], %72 {strides = array<i32>} : memref<49x64xbf16, #tpu.memory_space<vmem>>, vector<49x8xbf16>,
    %74 = vector.extract_strided_slice %9 {offsets = [0, 24], sizes = [49, 8], strides = [1, 1]} : vector<49x64xbf16> to vector<49x8xbf16>
    %75 = vector.extract_strided_slice %11 {offsets = [0, 24], sizes = [49, 8], strides = [1, 1]} : vector<49x64xbf16> to vector<49x8xbf16>
    %76 = vector.extract_strided_slice %13 {offsets = [0, 24], sizes = [49, 8], strides = [1, 1]} : vector<49x64xbf16> to vector<49x8xbf16>
    %cst_25 = arith.constant dense<0.000000e+00> : vector<49x49xf32>
    %77 = tpu.matmul %74, %75, %cst_25 {dimension_numbers = #tpu.dot_dimension_numbers<[1], [1], [0], [0], [0, 0, 1, 0], [], []>} : vector<49x8xbf16>, vector<49x8xbf16>, vector<49x49xf32> -> vector<49x49xf32>
    %cst_26 = arith.constant 5.000000e-01 : f32
    %78 = vector.broadcast %cst_26 : f32 to vector<49x49xf32>
    %79 = arith.mulf %77, %78 : vector<49x49xf32>
    %cst_27 = arith.constant dense<0xFF800000> : vector<49xf32>
    %80 = vector.multi_reduction <maximumf>, %79, %cst_27 [1] : vector<49x49xf32> to vector<49xf32>
    %81 = vector.shape_cast %80 : vector<49xf32> to vector<49x1xf32>
    %82 = vector.broadcast %81 : vector<49x1xf32> to vector<49x49xf32>
    %83 = arith.subf %79, %82 : vector<49x49xf32>
    %84 = math.exp %83 : vector<49x49xf32>
    %cst_28 = arith.constant dense<0.000000e+00> : vector<49xf32>
    %85 = vector.multi_reduction <add>, %84, %cst_28 [1] : vector<49x49xf32> to vector<49xf32>
    %86 = vector.shape_cast %85 : vector<49xf32> to vector<49x1xf32>
    %87 = tpu.reciprocal %86 {approx = true} : vector<49x1xf32> -> vector<49x1xf32>
    %88 = vector.broadcast %87 : vector<49x1xf32> to vector<49x49xf32>
    %89 = arith.mulf %84, %88 : vector<49x49xf32>
    %90 = arith.truncf %89 : vector<49x49xf32> to vector<49x49xbf16>
    %cst_29 = arith.constant dense<0.000000e+00> : vector<49x8xf32>
    %91 = tpu.matmul %90, %76, %cst_29 {dimension_numbers = #tpu.dot_dimension_numbers<[1], [0], [0], [1], [0, 0, 1, 1], [], []>} : vector<49x49xbf16>, vector<49x8xbf16>, vector<49x8xf32> -> vector<49x8xf32>
    %92 = arith.truncf %91 : vector<49x8xf32> to vector<49x8xbf16>
    %c0_30 = arith.constant 0 : index
    %c24 = arith.constant 24 : index
    %93 = vector.load %arg7[%c0_30, %c24] : memref<49x64xbf16, #tpu.memory_space<vmem>>, vector<49x8xbf16>
    tpu.vector_store %arg7[%c0_30, %c24], %92 {strides = array<i32>} : memref<49x64xbf16, #tpu.memory_space<vmem>>, vector<49x8xbf16>,
    %94 = vector.extract_strided_slice %9 {offsets = [0, 32], sizes = [49, 8], strides = [1, 1]} : vector<49x64xbf16> to vector<49x8xbf16>
    %95 = vector.extract_strided_slice %11 {offsets = [0, 32], sizes = [49, 8], strides = [1, 1]} : vector<49x64xbf16> to vector<49x8xbf16>
    %96 = vector.extract_strided_slice %13 {offsets = [0, 32], sizes = [49, 8], strides = [1, 1]} : vector<49x64xbf16> to vector<49x8xbf16>
    %cst_31 = arith.constant dense<0.000000e+00> : vector<49x49xf32>
    %97 = tpu.matmul %94, %95, %cst_31 {dimension_numbers = #tpu.dot_dimension_numbers<[1], [1], [0], [0], [0, 0, 1, 0], [], []>} : vector<49x8xbf16>, vector<49x8xbf16>, vector<49x49xf32> -> vector<49x49xf32>
    %cst_32 = arith.constant 5.000000e-01 : f32
    %98 = vector.broadcast %cst_32 : f32 to vector<49x49xf32>
    %99 = arith.mulf %97, %98 : vector<49x49xf32>
    %cst_33 = arith.constant dense<0xFF800000> : vector<49xf32>
    %100 = vector.multi_reduction <maximumf>, %99, %cst_33 [1] : vector<49x49xf32> to vector<49xf32>
    %101 = vector.shape_cast %100 : vector<49xf32> to vector<49x1xf32>
    %102 = vector.broadcast %101 : vector<49x1xf32> to vector<49x49xf32>
    %103 = arith.subf %99, %102 : vector<49x49xf32>
    %104 = math.exp %103 : vector<49x49xf32>
    %cst_34 = arith.constant dense<0.000000e+00> : vector<49xf32>
    %105 = vector.multi_reduction <add>, %104, %cst_34 [1] : vector<49x49xf32> to vector<49xf32>
    %106 = vector.shape_cast %105 : vector<49xf32> to vector<49x1xf32>
    %107 = tpu.reciprocal %106 {approx = true} : vector<49x1xf32> -> vector<49x1xf32>
    %108 = vector.broadcast %107 : vector<49x1xf32> to vector<49x49xf32>
    %109 = arith.mulf %104, %108 : vector<49x49xf32>
    %110 = arith.truncf %109 : vector<49x49xf32> to vector<49x49xbf16>
    %cst_35 = arith.constant dense<0.000000e+00> : vector<49x8xf32>
    %111 = tpu.matmul %110, %96, %cst_35 {dimension_numbers = #tpu.dot_dimension_numbers<[1], [0], [0], [1], [0, 0, 1, 1], [], []>} : vector<49x49xbf16>, vector<49x8xbf16>, vector<49x8xf32> -> vector<49x8xf32>
    %112 = arith.truncf %111 : vector<49x8xf32> to vector<49x8xbf16>
    %c0_36 = arith.constant 0 : index
    %c32 = arith.constant 32 : index
    %113 = vector.load %arg7[%c0_36, %c32] : memref<49x64xbf16, #tpu.memory_space<vmem>>, vector<49x8xbf16>
    tpu.vector_store %arg7[%c0_36, %c32], %112 {strides = array<i32>} : memref<49x64xbf16, #tpu.memory_space<vmem>>, vector<49x8xbf16>,
    %114 = vector.extract_strided_slice %9 {offsets = [0, 40], sizes = [49, 8], strides = [1, 1]} : vector<49x64xbf16> to vector<49x8xbf16>
    %115 = vector.extract_strided_slice %11 {offsets = [0, 40], sizes = [49, 8], strides = [1, 1]} : vector<49x64xbf16> to vector<49x8xbf16>
    %116 = vector.extract_strided_slice %13 {offsets = [0, 40], sizes = [49, 8], strides = [1, 1]} : vector<49x64xbf16> to vector<49x8xbf16>
    %cst_37 = arith.constant dense<0.000000e+00> : vector<49x49xf32>
    %117 = tpu.matmul %114, %115, %cst_37 {dimension_numbers = #tpu.dot_dimension_numbers<[1], [1], [0], [0], [0, 0, 1, 0], [], []>} : vector<49x8xbf16>, vector<49x8xbf16>, vector<49x49xf32> -> vector<49x49xf32>
    %cst_38 = arith.constant 5.000000e-01 : f32
    %118 = vector.broadcast %cst_38 : f32 to vector<49x49xf32>
    %119 = arith.mulf %117, %118 : vector<49x49xf32>
    %cst_39 = arith.constant dense<0xFF800000> : vector<49xf32>
    %120 = vector.multi_reduction <maximumf>, %119, %cst_39 [1] : vector<49x49xf32> to vector<49xf32>
    %121 = vector.shape_cast %120 : vector<49xf32> to vector<49x1xf32>
    %122 = vector.broadcast %121 : vector<49x1xf32> to vector<49x49xf32>
    %123 = arith.subf %119, %122 : vector<49x49xf32>
    %124 = math.exp %123 : vector<49x49xf32>
    %cst_40 = arith.constant dense<0.000000e+00> : vector<49xf32>
    %125 = vector.multi_reduction <add>, %124, %cst_40 [1] : vector<49x49xf32> to vector<49xf32>
    %126 = vector.shape_cast %125 : vector<49xf32> to vector<49x1xf32>
    %127 = tpu.reciprocal %126 {approx = true} : vector<49x1xf32> -> vector<49x1xf32>
    %128 = vector.broadcast %127 : vector<49x1xf32> to vector<49x49xf32>
    %129 = arith.mulf %124, %128 : vector<49x49xf32>
    %130 = arith.truncf %129 : vector<49x49xf32> to vector<49x49xbf16>
    %cst_41 = arith.constant dense<0.000000e+00> : vector<49x8xf32>
    %131 = tpu.matmul %130, %116, %cst_41 {dimension_numbers = #tpu.dot_dimension_numbers<[1], [0], [0], [1], [0, 0, 1, 1], [], []>} : vector<49x49xbf16>, vector<49x8xbf16>, vector<49x8xf32> -> vector<49x8xf32>
    %132 = arith.truncf %131 : vector<49x8xf32> to vector<49x8xbf16>
    %c0_42 = arith.constant 0 : index
    %c40 = arith.constant 40 : index
    %133 = vector.load %arg7[%c0_42, %c40] : memref<49x64xbf16, #tpu.memory_space<vmem>>, vector<49x8xbf16>
    tpu.vector_store %arg7[%c0_42, %c40], %132 {strides = array<i32>} : memref<49x64xbf16, #tpu.memory_space<vmem>>, vector<49x8xbf16>,
    %134 = vector.extract_strided_slice %9 {offsets = [0, 48], sizes = [49, 8], strides = [1, 1]} : vector<49x64xbf16> to vector<49x8xbf16>
    %135 = vector.extract_strided_slice %11 {offsets = [0, 48], sizes = [49, 8], strides = [1, 1]} : vector<49x64xbf16> to vector<49x8xbf16>
    %136 = vector.extract_strided_slice %13 {offsets = [0, 48], sizes = [49, 8], strides = [1, 1]} : vector<49x64xbf16> to vector<49x8xbf16>
    %cst_43 = arith.constant dense<0.000000e+00> : vector<49x49xf32>
    %137 = tpu.matmul %134, %135, %cst_43 {dimension_numbers = #tpu.dot_dimension_numbers<[1], [1], [0], [0], [0, 0, 1, 0], [], []>} : vector<49x8xbf16>, vector<49x8xbf16>, vector<49x49xf32> -> vector<49x49xf32>
    %cst_44 = arith.constant 5.000000e-01 : f32
    %138 = vector.broadcast %cst_44 : f32 to vector<49x49xf32>
    %139 = arith.mulf %137, %138 : vector<49x49xf32>
    %cst_45 = arith.constant dense<0xFF800000> : vector<49xf32>
    %140 = vector.multi_reduction <maximumf>, %139, %cst_45 [1] : vector<49x49xf32> to vector<49xf32>
    %141 = vector.shape_cast %140 : vector<49xf32> to vector<49x1xf32>
    %142 = vector.broadcast %141 : vector<49x1xf32> to vector<49x49xf32>
    %143 = arith.subf %139, %142 : vector<49x49xf32>
    %144 = math.exp %143 : vector<49x49xf32>
    %cst_46 = arith.constant dense<0.000000e+00> : vector<49xf32>
    %145 = vector.multi_reduction <add>, %144, %cst_46 [1] : vector<49x49xf32> to vector<49xf32>
    %146 = vector.shape_cast %145 : vector<49xf32> to vector<49x1xf32>
    %147 = tpu.reciprocal %146 {approx = true} : vector<49x1xf32> -> vector<49x1xf32>
    %148 = vector.broadcast %147 : vector<49x1xf32> to vector<49x49xf32>
    %149 = arith.mulf %144, %148 : vector<49x49xf32>
    %150 = arith.truncf %149 : vector<49x49xf32> to vector<49x49xbf16>
    %cst_47 = arith.constant dense<0.000000e+00> : vector<49x8xf32>
    %151 = tpu.matmul %150, %136, %cst_47 {dimension_numbers = #tpu.dot_dimension_numbers<[1], [0], [0], [1], [0, 0, 1, 1], [], []>} : vector<49x49xbf16>, vector<49x8xbf16>, vector<49x8xf32> -> vector<49x8xf32>
    %152 = arith.truncf %151 : vector<49x8xf32> to vector<49x8xbf16>
    %c0_48 = arith.constant 0 : index
    %c48 = arith.constant 48 : index
    %153 = vector.load %arg7[%c0_48, %c48] : memref<49x64xbf16, #tpu.memory_space<vmem>>, vector<49x8xbf16>
    tpu.vector_store %arg7[%c0_48, %c48], %152 {strides = array<i32>} : memref<49x64xbf16, #tpu.memory_space<vmem>>, vector<49x8xbf16>,
    %154 = vector.extract_strided_slice %9 {offsets = [0, 56], sizes = [49, 8], strides = [1, 1]} : vector<49x64xbf16> to vector<49x8xbf16>
    %155 = vector.extract_strided_slice %11 {offsets = [0, 56], sizes = [49, 8], strides = [1, 1]} : vector<49x64xbf16> to vector<49x8xbf16>
    %156 = vector.extract_strided_slice %13 {offsets = [0, 56], sizes = [49, 8], strides = [1, 1]} : vector<49x64xbf16> to vector<49x8xbf16>
    %cst_49 = arith.constant dense<0.000000e+00> : vector<49x49xf32>
    %157 = tpu.matmul %154, %155, %cst_49 {dimension_numbers = #tpu.dot_dimension_numbers<[1], [1], [0], [0], [0, 0, 1, 0], [], []>} : vector<49x8xbf16>, vector<49x8xbf16>, vector<49x49xf32> -> vector<49x49xf32>
    %cst_50 = arith.constant 5.000000e-01 : f32
    %158 = vector.broadcast %cst_50 : f32 to vector<49x49xf32>
    %159 = arith.mulf %157, %158 : vector<49x49xf32>
    %cst_51 = arith.constant dense<0xFF800000> : vector<49xf32>
    %160 = vector.multi_reduction <maximumf>, %159, %cst_51 [1] : vector<49x49xf32> to vector<49xf32>
    %161 = vector.shape_cast %160 : vector<49xf32> to vector<49x1xf32>
    %162 = vector.broadcast %161 : vector<49x1xf32> to vector<49x49xf32>
    %163 = arith.subf %159, %162 : vector<49x49xf32>
    %164 = math.exp %163 : vector<49x49xf32>
    %cst_52 = arith.constant dense<0.000000e+00> : vector<49xf32>
    %165 = vector.multi_reduction <add>, %164, %cst_52 [1] : vector<49x49xf32> to vector<49xf32>
    %166 = vector.shape_cast %165 : vector<49xf32> to vector<49x1xf32>
    %167 = tpu.reciprocal %166 {approx = true} : vector<49x1xf32> -> vector<49x1xf32>
    %168 = vector.broadcast %167 : vector<49x1xf32> to vector<49x49xf32>
    %169 = arith.mulf %164, %168 : vector<49x49xf32>
    %170 = arith.truncf %169 : vector<49x49xf32> to vector<49x49xbf16>
    %cst_53 = arith.constant dense<0.000000e+00> : vector<49x8xf32>
    %171 = tpu.matmul %170, %156, %cst_53 {dimension_numbers = #tpu.dot_dimension_numbers<[1], [0], [0], [1], [0, 0, 1, 1], [], []>} : vector<49x49xbf16>, vector<49x8xbf16>, vector<49x8xf32> -> vector<49x8xf32>
    %172 = arith.truncf %171 : vector<49x8xf32> to vector<49x8xbf16>
    %c0_54 = arith.constant 0 : index
    %c56 = arith.constant 56 : index
    %173 = vector.load %arg7[%c0_54, %c56] : memref<49x64xbf16, #tpu.memory_space<vmem>>, vector<49x8xbf16>
    tpu.vector_store %arg7[%c0_54, %c56], %172 {strides = array<i32>} : memref<49x64xbf16, #tpu.memory_space<vmem>>, vector<49x8xbf16>,
    %c0_55 = arith.constant 0 : index
    %c0_56 = arith.constant 0 : index
    %174 = vector.load %arg7[%c0_55, %c0_56] : memref<49x64xbf16, #tpu.memory_space<vmem>>, vector<49x64xbf16>
    %c0_57 = arith.constant 0 : index
    %c0_58 = arith.constant 0 : index
    %175 = vector.load %arg4[%c0_57, %c0_58] : memref<64x32xbf16, #tpu.memory_space<vmem>>, vector<64x32xbf16>
    %cst_59 = arith.constant dense<0.000000e+00> : vector<49x32xf32>
    %176 = tpu.matmul %174, %175, %cst_59 {dimension_numbers = #tpu.dot_dimension_numbers<[1], [0], [0], [1], [0, 0, 1, 1], [], []>} : vector<49x64xbf16>, vector<64x32xbf16>, vector<49x32xf32> -> vector<49x32xf32>
    %c0_60 = arith.constant 0 : index
    %c0_61 = arith.constant 0 : index
    %177 = vector.load %arg5[%c0_60, %c0_61] : memref<3x32xf32, #tpu.memory_space<vmem>>, vector<1x32xf32>
    %c1 = arith.constant 1 : index
    %c0_62 = arith.constant 0 : index
    %178 = vector.load %arg5[%c1, %c0_62] : memref<3x32xf32, #tpu.memory_space<vmem>>, vector<1x32xf32>
    %c2 = arith.constant 2 : index
    %c0_63 = arith.constant 0 : index
    %179 = vector.load %arg5[%c2, %c0_63] : memref<3x32xf32, #tpu.memory_space<vmem>>, vector<1x32xf32>
    %180 = vector.broadcast %177 : vector<1x32xf32> to vector<49x32xf32>
    %181 = arith.addf %176, %180 : vector<49x32xf32>
    %182 = arith.addf %181, %1 : vector<49x32xf32>
    %cst_64 = arith.constant dense<0.000000e+00> : vector<49xf32>
    %183 = vector.multi_reduction <add>, %182, %cst_64 [1] : vector<49x32xf32> to vector<49xf32>
    %184 = vector.shape_cast %183 : vector<49xf32> to vector<49x1xf32>
    %cst_65 = arith.constant 3.200000e+01 : f32
    %185 = vector.broadcast %cst_65 : f32 to vector<49x1xf32>
    %186 = arith.divf %184, %185 : vector<49x1xf32>
    %187 = vector.broadcast %186 : vector<49x1xf32> to vector<49x32xf32>
    %188 = arith.subf %182, %187 : vector<49x32xf32>
    %189 = arith.mulf %188, %188 : vector<49x32xf32>
    %cst_66 = arith.constant dense<0.000000e+00> : vector<49xf32>
    %190 = vector.multi_reduction <add>, %189, %cst_66 [1] : vector<49x32xf32> to vector<49xf32>
    %191 = vector.shape_cast %190 : vector<49xf32> to vector<49x1xf32>
    %cst_67 = arith.constant 3.200000e+01 : f32
    %192 = vector.broadcast %cst_67 : f32 to vector<49x1xf32>
    %193 = arith.divf %191, %192 : vector<49x1xf32>
    %194 = vector.broadcast %186 : vector<49x1xf32> to vector<49x32xf32>
    %195 = arith.subf %182, %194 : vector<49x32xf32>
    %cst_68 = arith.constant 9.99999996E-13 : f32
    %196 = vector.broadcast %cst_68 : f32 to vector<49x1xf32>
    %197 = arith.addf %193, %196 : vector<49x1xf32>
    %198 = math.rsqrt %197 : vector<49x1xf32>
    %199 = vector.broadcast %198 : vector<49x1xf32> to vector<49x32xf32>
    %200 = arith.mulf %195, %199 : vector<49x32xf32>
    %201 = vector.broadcast %178 : vector<1x32xf32> to vector<49x32xf32>
    %202 = arith.mulf %201, %200 : vector<49x32xf32>
    %203 = vector.broadcast %179 : vector<1x32xf32> to vector<49x32xf32>
    %204 = arith.addf %202, %203 : vector<49x32xf32>
    %cst_69 = arith.constant dense<0xFF800000> : vector<32xf32>
    %205 = vector.multi_reduction <maximumf>, %204, %cst_69 [0] : vector<49x32xf32> to vector<32xf32>
    %206 = vector.shape_cast %205 : vector<32xf32> to vector<1x32xf32>
    %207 = vector.broadcast %206 : vector<1x32xf32> to vector<49x32xf32>
    %208 = arith.subf %204, %207 : vector<49x32xf32>
    %209 = math.exp %208 : vector<49x32xf32>
    %cst_70 = arith.constant dense<0.000000e+00> : vector<32xf32>
    %210 = vector.multi_reduction <add>, %209, %cst_70 [0] : vector<49x32xf32> to vector<32xf32>
    %211 = vector.shape_cast %210 : vector<32xf32> to vector<1x32xf32>
    %212 = tpu.reciprocal %211 : vector<1x32xf32> -> vector<1x32xf32>
    %213 = vector.broadcast %212 : vector<1x32xf32> to vector<49x32xf32>
    %214 = arith.mulf %209, %213 : vector<49x32xf32>
    %c0_71 = arith.constant 0 : index
    %c0_72 = arith.constant 0 : index
    %c0_73 = arith.constant 0 : index
    %215 = vector.load %arg6[%c0_71, %c0_72, %c0_73] : memref<1x49x32xf32, #tpu.memory_space<vmem>>, vector<1x49x32xf32>
    %216 = vector.shape_cast %215 : vector<1x49x32xf32> to vector<49x32xf32>
    %217 = vector.shape_cast %214 : vector<49x32xf32> to vector<1x49x32xf32>
    tpu.vector_store %arg6[%c0_71, %c0_72, %c0_73], %217 {strides = array<i32>} : memref<1x49x32xf32, #tpu.memory_space<vmem>>, vector<1x49x32xf32>,
    return
  }
  func.func @transform_0(%arg0: i32) -> (i32, i32, i32) {
    %c0_i32 = arith.constant 0 : i32
    %c0_i32_0 = arith.constant 0 : i32
    %c0_i32_1 = arith.constant 0 : i32
    return %arg0, %c0_i32, %c0_i32_0 : i32, i32, i32
  }
  func.func @transform_1(%arg0: i32) -> (i32, i32) {
    %c0_i32 = arith.constant 0 : i32
    %c0_i32_0 = arith.constant 0 : i32
    %c0_i32_1 = arith.constant 0 : i32
    return %c0_i32, %c0_i32_0 : i32, i32
  }
  func.func @transform_2(%arg0: i32) -> (i32, i32) {
    %c0_i32 = arith.constant 0 : i32
    %c0_i32_0 = arith.constant 0 : i32
    %c0_i32_1 = arith.constant 0 : i32
    return %c0_i32, %c0_i32_0 : i32, i32
  }
  func.func @transform_3(%arg0: i32) -> (i32, i32) {
    %c0_i32 = arith.constant 0 : i32
    %c0_i32_0 = arith.constant 0 : i32
    %c0_i32_1 = arith.constant 0 : i32
    return %c0_i32, %c0_i32_0 : i32, i32
  }
  func.func @transform_4(%arg0: i32) -> (i32, i32) {
    %c0_i32 = arith.constant 0 : i32
    %c0_i32_0 = arith.constant 0 : i32
    %c0_i32_1 = arith.constant 0 : i32
    return %c0_i32, %c0_i32_0 : i32, i32
  }
  func.func @transform_5(%arg0: i32) -> (i32, i32, i32) {
    %c0_i32 = arith.constant 0 : i32
    %c0_i32_0 = arith.constant 0 : i32
    %c0_i32_1 = arith.constant 0 : i32
    return %arg0, %c0_i32, %c0_i32_0 : i32, i32, i32
  }
}

</mosaic_0001>

<bundles_post_ra>
// kernel: cnn_sasm_forward.2
= control target key start
LH: loop header
LB: loop body
LE: loop exit
PB: predicated region body
PF: predicated region fallthrough
CT: control target
= control target key end

     0   :  { %s2640_s18 = smov 0   ;;  %s3135_s0 = inlined_call_operand.vmem [shape: f32[2,32,49], index: 0, kind: input, shape index: {}]   ;;  %s3136_s1 = inlined_call_operand.vmem [shape: bf16[49,192], index: 1, kind: input, shape index: {}]   ;;  %s3137_s2 = inlined_call_operand.vmem [shape: f32[1,192], index: 2, kind: input, shape index: {}]   ;;  %s3138_s3 = inlined_call_operand.vmem [shape: bf16[56,49], index: 3, kind: input, shape index: {}]   ;;  %s3139_s4 = inlined_call_operand.vmem [shape: f32[3,49], index: 4, kind: input, shape index: {}]   ;;  %s3140_s5 = inlined_call_operand.vmem [shape: f32[2,32,49], index: 5, kind: output, shape index: {}]  }
   0x1 LB: > { %s2094_s19 = sadd.s32 4294967295, %s2593_s18   ;;  %p2098_p0 = scmp.ge.s32.totalorder %s2593_s18, 1  ;;  %s2593_s18 = sphi %s2640_s18, %s15_s18  }
   0x2   : > { %p187_p1 = scmp.lt.s32.totalorder %s2593_s18, 3 }
   0x4   : > { %p188_p2 = pnand %p2098_p0, %p187_p1 }
   0x5   : > { %p215_p3 = scmp.lt.s32.totalorder (!%p188_p2), %s2094_s19, 1  ;;  %s2596_s15 = smov (!%p188_p2), 64  }
   0x6   : > { %191 = sbr.rel (%p188_p2) target bundleno = 4039 (0xfc7), region = 40  ;;  %s2597_s16 = smov (!%p188_p2), 56  }
   0x7   : > { %s2598_s17 = smov (!%p188_p2), 48   ;;  %s2599_s20 = smov (!%p188_p2), 120  }
   0x8   : > { %s2600_s21 = smov (!%p188_p2), 112   ;;  %s2601_s22 = smov (!%p188_p2), 40  }
   0x9   : > { %s2602_s23 = smov (!%p188_p2), 104   ;;  %s2603_s24 = smov (!%p188_p2), 32  }
   0xa   : > { %s2604_s25 = smov (!%p188_p2), 96   ;;  %s2605_s26 = smov (!%p188_p2), 24  }
   0xb   : > { %v238_v0 = vld [vmem:[%s3136_s1 + $0x30] sm:$0x11]  ;;  %vm293_vm0 = vcmask 1040384   ;;  %v2595_v2 = vmov 0   ;;  %v2438_v7 = vld [vmem:[%s3136_s1 + $0x24] ss:$8 sps:$4 sm:$0xff]   ;;  %v241_v19 = vlaneseq }
   0xc   : > { %v2110_v1 = vcombine.high %v238_v0, %v238_v0  ;;  %v295_v3 = vsel %vm293_vm0, 65535, %v2595_v2  ;;  %v2109_v4 = vcombine.low %v238_v0, %v238_v0  ;;  %334 = vmatprep.mubr.bf16.mxu0 %v2595_v2  ;;  %s3142_s19 = smov (!%p215_p3, %s2094_s19), 1  ;;  %v2440_v8 = vld [vmem:[%s3136_s1 + $0x20] ss:$8 sps:$4 sm:$0xff]   ;;  %v2441_v9 = vld [vmem:[%s3136_s1 + $0x14] ss:$8 sps:$4 sm:$0xff]  }
   0xd   : > { %s2182_s28 = sshll.u32 %s3142_s19, 5  ;;  %v2443_v10 = vld [vmem:[%s3136_s1 + $0x10] ss:$8 sps:$4 sm:$0xff]   ;;  %v2444_v11 = vld [vmem:[%s3136_s1 + $0x4] ss:$8 sps:$4 sm:$0xff]   ;;  %vm286_vm1 = vcmask 400384  }
   0xe   : > { %v300_v5 = vand.u32 %v2110_v1, %v295_v3  ;;  %v297_v6 = vand.u32 %v2109_v4, %v295_v3  ;;  %s2674_s10 = scalar_lea.vmem %s3135_s0, %s2182_s28  ;;  %v2446_v12 = vld [vmem:[%s3136_s1] ss:$8 sps:$4 sm:$0xff]   ;;  %v242_v20 = vshrl.u32 %v241_v19, 7  ;;  %vm365_vm2 = vcmask 64512   ;;  %s2606_s27 = smov 88  }
   0xf   : > { %v226_v13 = vld [vmem:[%s2674_s10] sm:$0xff]  ;;  %v227_v14 = vld [vmem:[%s2674_s10 + $0x8] sm:$0xff]  ;;  %v228_v16 = vld [vmem:[%s2674_s10 + $0x10] sm:$0xff]  ;;  %vm431_vm3 = vcmask 261120   ;;  %vm549_vm4 = vcmask 60416   ;;  %s2607_s29 = smov 16  }
  0x10   : > { %310 = vmatprep.subr.bf16.mxu0 %v300_v5  ;;  %v230_v15 = vpack.c.bf16 %v227_v14, %v226_v13  ;;  %v229_v17 = vld [vmem:[%s2674_s10 + $0x18] sm:$0xff]  ;;  %v243_v21 = vsub.s32 0, %v242_v20  ;;  %v239_v22 = vld [vmem:[%s3137_s2] sm:$0x3]  ;;  %v247_v23 = vsub.s32 1, %v242_v20  ;;  %s2608_s30 = smov 80  }
  0x11   : > { %311 = vmatpush1.bf16.msra.mxu0 %v297_v6  ;;  %v231_v18 = vpack.c.bf16 %v229_v17, %v228_v16  ;;  %s2609_s6 = smov 8   ;;  %vm760_vm5 = vcmask 126016   ;;  %vm969_vm6 = vcmask 191616   ;;  %vm1178_vm7 = vcmask 257216  }
  0x12   : > { %312 = vmatprep.subr.bf16.mxu0 %v2438_v7  ;;  %v244_v25 = vrot.slane %v239_v22, %v243_v21  ;;  %v248_v27 = vrot.slane %v239_v22, %v247_v23  ;;  %vm1387_vm8 = vcmask 322816   ;;  %vm1596_vm9 = vcmask 388416  }
  0x13   : > { %vm1866_vm10 = vcmask 1043456   ;;  %vm1805_vm11 = vcmask 454016   ;;  %vm1859_vm12 = vcmask 457728  }
  0x15   : > { %313 = vmatpush1.bf16.msra.mxu0 %v2440_v8 }
  0x16   : > { %314 = vmatprep.subr.bf16.mxu0 %v2441_v9 }
  0x19   : > { %315 = vmatpush1.bf16.msra.mxu0 %v2443_v10 }
  0x1a   : > { %316 = vmatprep.subr.bf16.mxu0 %v2444_v11 }
  0x1d   : > { %317 = vmatpush1.bf16.msra.mxu0 %v2446_v12 }
  0x20   : > { %2111 = vmatmul.mubr.msk.bf16.vlgmr.msra.gmra.mxu0 %vm286_vm1, %v230_v15 }
  0x21   : > { %344 = vmatprep.mubr.bf16.mxu0 %v2595_v2 }
  0x28   : > { %2112 = vmatmul.mubr.msk.bf16.gmra.mxu0 %vm286_vm1, %v231_v18 }
  0xe0   : > { %v336_v24 = vpop.f32.mrf.mxu0 }
  0xe1   : > { %v337_v29 = vadd.f32 %v336_v24, %v244_v25 }
  0xe2   : > { %v338_v26 = vpop.f32.mrf.mxu0 }
  0xe3   : > { %v339_v32 = vadd.f32 %v338_v26, %v248_v27 }
  0xe4   : > { %v340_v28 = vpop.f32.mrf.mxu0 }
  0xe5   : > { %v341_v30 = vadd.f32 %v340_v28, %v244_v25 }
  0xe6   : > { %v342_v31 = vpop.f32.mrf.mxu0 }
  0xe7   : > { %v2688_v33 = vpack.c.bf16 %v341_v30, %v337_v29  ;;  %v343_v34 = vadd.f32 %v342_v31, %v248_v27 }
  0xe8   : > { %v346_v35 = vpop.f32.mrf.mxu0 }
  0xe9   : > { %v2690_v36 = vpack.c.bf16 %v343_v34, %v339_v32  ;;  %361 = vrot.lane.b32.xlu1 %v2688_v33, %s2596_s15  ;;  %2278 = vmatprep.mubr.msk.bf16.mxu1 %vm365_vm2, %v2688_v33  ;;  %v347_v39 = vadd.f32 %v346_v35, %v244_v25 }
  0xea   : > { %v348_v37 = vpop.f32.mrf.mxu0 }
  0xeb   : > { %v349_v50 = vadd.f32 %v348_v37, %v248_v27 }
  0xec   : > { %v350_v38 = vpop.f32.mrf.mxu0 }
  0xed   : > { %v351_v40 = vadd.f32 %v350_v38, %v244_v25  ;;  %558 = vrot.lane.b32.xlu1 %v2688_v33, %s2597_s16 }
  0xee   : > { %v352_v45 = vpop.f32.mrf.mxu0 }
  0xef   : > { %v2696_v41 = vpack.c.bf16 %v351_v40, %v347_v39  ;;  %v353_v47 = vadd.f32 %v352_v45, %v248_v27 }
  0xf1   : > { %363 = vrot.lane.b32.xlu0 %v2696_v41, %s2596_s15  ;;  %771 = vrot.lane.b32.xlu1 %v2696_v41, %s2598_s17  ;;  %v2718_v52 = vpack.c.bf16 %v353_v47, %v349_v50 }
  0xf5   : > { %560 = vrot.lane.b32.xlu0 %v2696_v41, %s2597_s16  ;;  %769 = vrot.lane.b32.xlu1 %v2688_v33, %s2598_s17 }
  0xf9   : > { %554 = vrot.lane.b32.xlu0 %v2688_v33, %s2599_s20  ;;  %767 = vrot.lane.b32.xlu1 %v2696_v41, %s2600_s21 }
  0xfd   : > { %556 = vrot.lane.b32.xlu0 %v2696_v41, %s2599_s20 }
 0x101   : > { %765 = vrot.lane.b32.xlu0 %v2688_v33, %s2600_s21 }
 0x15b   : > { %v362_v42 = vpop.permute.xlu1 %361 }
 0x15c   : > { %v373_v53 = vsel %vm365_vm2, %v362_v42, 0 }
 0x15f   : > { %v559_v49 = vpop.permute.xlu1 %558 }
 0x160   : > { %v569_v54 = vsel %vm365_vm2, %v559_v49, 0 }
 0x163   : > { %v364_v43 = vpop.permute.xlu0 %363  ;;  %v772_v55 = vpop.permute.xlu1 %771 }
 0x164   : > { %2398 = vmatprep.subr.msk.bf16.mxu1 %vm365_vm2, %v364_v43  ;;  %v376_v44 = vsel %vm365_vm2, %v364_v43, 0  ;;  %v783_v57 = vsel %vm365_vm2, %v772_v55, 0 }
 0x165   : > { %2275 = vmatpush3.bf16.xpose.msra.mxu1 %v376_v44 }
 0x166   : > { %2399 = vmatprep.subr.msk.bf16.mxu1 %vm365_vm2, %v362_v42 }
 0x167   : > { %v561_v46 = vpop.permute.xlu0 %560  ;;  %v770_v58 = vpop.permute.xlu1 %769 }
 0x168   : > { %2400 = vmatprep.subr.msk.bf16.mxu0 %vm365_vm2, %v561_v46  ;;  %v572_v48 = vsel %vm365_vm2, %v561_v46, 0  ;;  %v780_v60 = vsel %vm365_vm2, %v770_v58, 0 }
 0x169   : > { %2291 = vmatpush3.bf16.xpose.msra.mxu0 %v572_v48 }
 0x16a   : > { %2401 = vmatprep.subr.msk.bf16.mxu0 %vm365_vm2, %v559_v49 }
 0x16b   : > { %v555_v51 = vpop.permute.xlu0 %554  ;;  %v768_v61 = vpop.permute.xlu1 %767 }
 0x16c   : > { %2294 = vmatprep.mubr.msk.bf16.mxu0 %vm365_vm2, %v555_v51 }
 0x16d   : > { %2277 = vmatpush3.bf16.xpose.msra.mxu1 %v373_v53 }
 0x16e   : > { %2282 = vmatprep.subr.bf16.mxu1 %v2718_v52 }
 0x16f   : > { %v557_v56 = vpop.permute.xlu0 %556 }
 0x171   : > { %2293 = vmatpush3.bf16.xpose.msra.mxu0 %v569_v54 }
 0x172   : > { %2402 = vmatprep.subr.msk.bf16.mxu0 %vm365_vm2, %v772_v55 }
 0x173   : > { %v766_v59 = vpop.permute.xlu0 %765 }
 0x174   : > { %2279 = vmatmul.mubr.msk.bf16.vlgmr.msra.gmra.mxu1 %vm365_vm2, %v2696_v41 }
 0x175   : > { %2283 = vmatpush3.bf16.msra.mxu1 %v2718_v52 }
 0x176   : > { %2284 = vmatprep.subr.bf16.mxu1 %v2690_v36 }
 0x178   : > { %2295 = vmatmul.mubr.msk.bf16.vlgmr.msra.gmra.mxu0 %vm365_vm2, %v557_v56 }
 0x179   : > { %2285 = vmatpush3.bf16.msra.mxu1 %v2690_v36  ;;  %2307 = vmatpush3.bf16.xpose.msra.mxu0 %v783_v57 }
 0x17a   : > { %2310 = vmatprep.mubr.msk.bf16.mxu0 %vm365_vm2, %v766_v59  ;;  %2403 = vmatprep.subr.msk.bf16.mxu0 %vm365_vm2, %v770_v58 }
 0x181   : > { %2309 = vmatpush3.bf16.xpose.msra.mxu0 %v780_v60 }
 0x188   : > { %2311 = vmatmul.mubr.msk.bf16.vlgmr.msra.gmra.mxu0 %vm365_vm2, %v768_v61 }
 0x234   : > { %v2280_v62 = vpop.f32.mrf.mxu1 }
 0x235   : > { %v429_v63 = vmul.f32 0.37796447, %v2280_v62 }
 0x236   : > { %v412_v0 = vpop.f32.mrf.mxu1 }
 0x237   : > { %v427_v1 = vmul.f32 0.37796447, %v412_v0  ;;  %v438_v2 = vsel %vm431_vm3, %v429_v63, -inf }
 0x238   : > { %v2296_v3 = vpop.f32.mrf.mxu0  ;;  %439 = vmax.xlane.f32.xlu0 %v438_v2  ;;  %v2281_v4 = vpop.f32.mrf.mxu1 }
 0x239   : > { %v625_v5 = vmul.f32 0.37796447, %v2296_v3  ;;  %v430_v7 = vmul.f32 0.37796447, %v2281_v4  ;;  %v432_v10 = vsel %vm431_vm3, %v427_v1, -inf }
 0x23a   : > { %v608_v6 = vpop.f32.mrf.mxu0  ;;  %v415_v11 = vpop.f32.mrf.mxu1 }
 0x23b   : > { %v623_v8 = vmul.f32 0.37796447, %v608_v6  ;;  %v633_v9 = vsel %vm431_vm3, %v625_v5, -inf  ;;  %v428_v14 = vmul.f32 0.37796447, %v415_v11  ;;  %v441_v17 = vsel %vm431_vm3, %v430_v7, -inf }
 0x23c   : > { %634 = vmax.xlane.f32.xlu1 %v633_v9  ;;  %v2297_v12 = vpop.f32.mrf.mxu0  ;;  %433 = vmax.xlane.f32.xlu0 %v432_v10 }
 0x23d   : > { %v627_v16 = vsel %vm431_vm3, %v623_v8, -inf  ;;  %v626_v18 = vmul.f32 0.37796447, %v2297_v12  ;;  %v435_v20 = vsel %vm431_vm3, %v428_v14, -inf }
 0x23e   : > { %v611_v13 = vpop.f32.mrf.mxu0 }
 0x23f   : > { %v2739_v15 = vmul.f32 0.37796447, %v611_v13  ;;  %v636_v21 = vsel %vm431_vm3, %v626_v18, -inf }
 0x240   : > { %628 = vmax.xlane.f32.xlu1 %v627_v16  ;;  %442 = vmax.xlane.f32.xlu0 %v441_v17 }
 0x241   : > { %v630_v19 = vsel %vm431_vm3, %v2739_v15, -inf }
 0x244   : > { %631 = vmax.xlane.f32.xlu0 %v630_v19  ;;  %436 = vmax.xlane.f32.xlu1 %v435_v20 }
 0x248   : > { %v2312_v22 = vpop.f32.mrf.mxu0  ;;  %637 = vmax.xlane.f32.xlu0 %v636_v21 }
 0x249   : > { %v2747_v23 = vmul.f32 0.37796447, %v2312_v22 }
 0x24a   : > { %v819_v24 = vpop.f32.mrf.mxu0 }
 0x24b   : > { %v2749_v25 = vmul.f32 0.37796447, %v819_v24  ;;  %v844_v26 = vsel %vm431_vm3, %v2747_v23, -inf }
 0x24c   : > { %v2313_v27 = vpop.f32.mrf.mxu0  ;;  %845 = vmax.xlane.f32.xlu1 %v844_v26 }
 0x24d   : > { %v838_v30 = vsel %vm431_vm3, %v2749_v25, -inf  ;;  %v2757_v31 = vmul.f32 0.37796447, %v2313_v27 }
 0x24e   : > { %v822_v28 = vpop.f32.mrf.mxu0 }
 0x24f   : > { %v2753_v29 = vmul.f32 0.37796447, %v822_v28  ;;  %v847_v34 = vsel %vm431_vm3, %v2757_v31, -inf }
 0x250   : > { %839 = vmax.xlane.f32.xlu1 %v838_v30 }
 0x251   : > { %v841_v32 = vsel %vm431_vm3, %v2753_v29, -inf }
 0x252   : > { %842 = vmax.xlane.f32.xlu0 %v841_v32 }
 0x256   : > { %848 = vmax.xlane.f32.xlu0 %v847_v34 }
 0x261   : > { %677 = vrot.lane.b32.xlu1 %v2718_v52, %s2599_s20 }
 0x2c1   : > { %v440_v35 = vpop.xlane.xlu0 %439 }
 0x2c2   : > { %v446_v37 = vsub.f32 %v429_v63, %v440_v35 }
 0x2c4   : > { %v452_v38 = vmul.f32 1.442695, %v446_v37 }
 0x2c5   : > { %v635_v39 = vpop.xlane.xlu1 %634  ;;  %v434_v40 = vpop.xlane.xlu0 %433 }
 0x2c6   : > { %2453 = vpow2.f32 %v452_v38  ;;  %v641_v42 = vsub.f32 %v625_v5, %v635_v39  ;;  %v444_v43 = vsub.f32 %v427_v1, %v434_v40 }
 0x2c8   : > { %v647_v44 = vmul.f32 1.442695, %v641_v42  ;;  %v448_v45 = vmul.f32 1.442695, %v444_v43 }
 0x2c9   : > { %v629_v46 = vpop.xlane.xlu1 %628  ;;  %v443_v47 = vpop.xlane.xlu0 %442 }
 0x2ca   : > { %2455 = vpow2.f32 %v647_v44  ;;  %v639_v48 = vsub.f32 %v623_v8, %v629_v46  ;;  %v447_v49 = vsub.f32 %v430_v7, %v443_v47 }
 0x2cb   : > { %2457 = vpow2.f32 %v448_v45 }
 0x2cc   : > { %v643_v50 = vmul.f32 1.442695, %v639_v48  ;;  %v454_v51 = vmul.f32 1.442695, %v447_v49 }
 0x2cd   : > { %v632_v53 = vpop.xlane.xlu0 %631  ;;  %v437_v54 = vpop.xlane.xlu1 %436 }
 0x2ce   : > { %2459 = vpow2.f32 %v454_v51  ;;  %v445_v55 = vsub.f32 %v428_v14, %v437_v54 }
 0x2cf   : > { %2461 = vpow2.f32 %v643_v50 }
 0x2d0   : > { %v450_v59 = vmul.f32 1.442695, %v445_v55 }
 0x2d1   : > { %v638_v56 = vpop.xlane.xlu0 %637 }
 0x2d2   : > { %v642_v57 = vsub.f32 %v626_v18, %v638_v56  ;;  %v640_v18 = vsub.f32 %v2739_v15, %v632_v53 }
 0x2d3   : > { %v2765_v58 = vpop.eup %2453 }
 0x2d4   : > { %v649_v60 = vmul.f32 1.442695, %v642_v57  ;;  %v462_v61 = vsel %vm431_vm3, %v2765_v58, 0.0  ;;  %v645_v21 = vmul.f32 1.442695, %v640_v18 }
 0x2d5   : > { %463 = vadd.xlane.f32.xlu1 %v462_v61  ;;  %v846_v62 = vpop.xlane.xlu1 %845 }
 0x2d6   : > { %2463 = vpow2.f32 %v649_v60  ;;  %v852_v13 = vsub.f32 %v2747_v23, %v846_v62 }
 0x2d7   : > { %v2769_v63 = vpop.eup %2455  ;;  %2465 = vpow2.f32 %v450_v59 }
 0x2d8   : > { %v657_v0 = vsel %vm431_vm3, %v2769_v63, 0.0  ;;  %v2773_v1 = vpop.eup %2457  ;;  %v858_v16 = vmul.f32 1.442695, %v852_v13 }
 0x2d9   : > { %658 = vadd.xlane.f32.xlu1 %v657_v0  ;;  %v840_v2 = vpop.xlane.xlu1 %839  ;;  %v456_v4 = vsel %vm431_vm3, %v2773_v1, 0.0 }
 0x2da   : > { %v850_v17 = vsub.f32 %v2749_v25, %v840_v2  ;;  %2467 = vpow2.f32 %v858_v16 }
 0x2db   : > { %v2775_v3 = vpop.eup %2459  ;;  %v843_v14 = vpop.xlane.xlu0 %842 }
 0x2dc   : > { %v2779_v5 = vpop.eup %2461  ;;  %v465_v6 = vsel %vm431_vm3, %v2775_v3, 0.0  ;;  %v854_v19 = vmul.f32 1.442695, %v850_v17  ;;  %v851_v24 = vsub.f32 %v2753_v29, %v843_v14 }
 0x2dd   : > { %457 = vadd.xlane.f32.xlu1 %v456_v4  ;;  %v2783_v7 = vpop.permute.xlu1 %677  ;;  %466 = vadd.xlane.f32.xlu0 %v465_v6  ;;  %v651_v8 = vsel %vm431_vm3, %v2779_v5, 0.0 }
 0x2de   : > { %2298 = vmatprep.subr.bf16.mxu1 %v2783_v7  ;;  %2469 = vpow2.f32 %v854_v19  ;;  %v856_v26 = vmul.f32 1.442695, %v851_v24 }
 0x2df   : > { %v849_v20 = vpop.xlane.xlu0 %848  ;;  %2471 = vpow2.f32 %v645_v21 }
 0x2e0   : > { %v853_v22 = vsub.f32 %v2757_v31, %v849_v20 }
 0x2e1   : > { %652 = vadd.xlane.f32.xlu1 %v651_v8 }
 0x2e2   : > { %v860_v23 = vmul.f32 1.442695, %v853_v22 }
 0x2e3   : > { %v2788_v9 = vpop.eup %2463 }
 0x2e4   : > { %v660_v10 = vsel %vm431_vm3, %v2788_v9, 0.0  ;;  %v2466_v11 = vpop.eup %2465  ;;  %2473 = vpow2.f32 %v860_v23 }
 0x2e5   : > { %661 = vadd.xlane.f32.xlu0 %v660_v10  ;;  %v459_v12 = vsel %vm431_vm3, %v2466_v11, 0.0  ;;  %2475 = vpow2.f32 %v856_v26 }
 0x2e7   : > { %v2802_v27 = vpop.eup %2467 }
 0x2e8   : > { %v868_v25 = vsel %vm431_vm3, %v2802_v27, 0.0 }
 0x2e9   : > { %460 = vadd.xlane.f32.xlu0 %v459_v12 }
 0x2eb   : > { %v2806_v15 = vpop.eup %2469 }
 0x2ec   : > { %v862_v28 = vsel %vm431_vm3, %v2806_v15, 0.0  ;;  %v2810_v30 = vpop.eup %2471 }
 0x2ed   : > { %v654_v29 = vsel %vm431_vm3, %v2810_v30, 0.0 }
 0x2f1   : > { %v2814_v31 = vpop.eup %2473 }
 0x2f2   : > { %886 = vrot.lane.b32.xlu1 %v2718_v52, %s2600_s21  ;;  %v871_v32 = vsel %vm431_vm3, %v2814_v31, 0.0  ;;  %v2818_v34 = vpop.eup %2475 }
 0x2f3   : > { %v865_v35 = vsel %vm431_vm3, %v2818_v34, 0.0 }
 0x2ff   : > { %675 = vrot.lane.b32.xlu0 %v2690_v36, %s2599_s20 }
 0x316   : > { %869 = vadd.xlane.f32.xlu1 %v868_v25 }
 0x31a   : > { %863 = vadd.xlane.f32.xlu1 %v862_v28 }
 0x31e   : > { %655 = vadd.xlane.f32.xlu0 %v654_v29 }
 0x322   : > { %872 = vadd.xlane.f32.xlu0 %v871_v32 }
 0x326   : > { %866 = vadd.xlane.f32.xlu0 %v865_v35 }
 0x32b   : > { %884 = vrot.lane.b32.xlu1 %v2690_v36, %s2600_s21 }
 0x32f   : > { %978 = vrot.lane.b32.xlu1 %v2688_v33, %s2601_s22 }
 0x333   : > { %976 = vrot.lane.b32.xlu1 %v2696_v41, %s2602_s23 }
 0x33c   : > { %980 = vrot.lane.b32.xlu0 %v2696_v41, %s2601_s22 }
 0x340   : > { %974 = vrot.lane.b32.xlu0 %v2688_v33, %s2602_s23 }
 0x35e   : > { %v464_v37 = vpop.xlane.xlu1 %463 }
 0x362   : > { %v659_v38 = vpop.xlane.xlu1 %658 }
 0x366   : > { %v467_v39 = vpop.xlane.xlu0 %466  ;;  %v458_v40 = vpop.xlane.xlu1 %457 }
 0x367   : > { %2477 = vrcp.f32 %v467_v39 }
 0x368   : > { %2479 = vrcp.f32 %v458_v40 }
 0x369   : > { %2481 = vrcp.f32 %v464_v37 }
 0x36a   : > { %v653_v55 = vpop.xlane.xlu1 %652 }
 0x36e   : > { %v662_v42 = vpop.xlane.xlu0 %661  ;;  %v887_v57 = vpop.permute.xlu1 %886 }
 0x372   : > { %v461_v43 = vpop.xlane.xlu0 %460 }
 0x373   : > { %2483 = vrcp.f32 %v461_v43 }
 0x374   : > { %v2478_v44 = vpop.eup %2477  ;;  %2485 = vrcp.f32 %v662_v42 }
 0x375   : > { %v2480_v45 = vpop.eup %2479  ;;  %v475_v48 = vmul.f32 %v2478_v44, %v2775_v3  ;;  %2487 = vrcp.f32 %v653_v55 }
 0x376   : > { %v2482_v46 = vpop.eup %2481  ;;  %v472_v49 = vmul.f32 %v2480_v45, %v2773_v1  ;;  %v676_v56 = vpop.permute.xlu0 %675  ;;  %2489 = vrcp.f32 %v659_v38 }
 0x377   : > { %v474_v51 = vmul.f32 %v2482_v46, %v2765_v58 }
 0x379   : > { %v477_v54 = vpack.c.bf16 %v475_v48, %v474_v51 }
 0x380   : > { %v2484_v47 = vpop.eup %2483 }
 0x381   : > { %v473_v50 = vmul.f32 %v2484_v47, %v2466_v11  ;;  %v2486_v0 = vpop.eup %2485 }
 0x382   : > { %v2488_v1 = vpop.eup %2487  ;;  %v670_v4 = vmul.f32 %v2486_v0, %v2788_v9 }
 0x383   : > { %v476_v53 = vpack.c.bf16 %v473_v50, %v472_v49  ;;  %v2490_v2 = vpop.eup %2489  ;;  %v667_v6 = vmul.f32 %v2488_v1, %v2779_v5 }
 0x384   : > { %v669_v8 = vmul.f32 %v2490_v2, %v2769_v63 }
 0x385   : > { %2286 = vmatprep.mubr.msk.bf16.mxu1 %vm431_vm3, %v476_v53 }
 0x386   : > { %2287 = vmatmul.mubr.msk.bf16.vlgmr.msra.gmra.mxu1 %vm431_vm3, %v477_v54  ;;  %v672_v11 = vpack.c.bf16 %v670_v4, %v669_v8 }
 0x387   : > { %2299 = vmatpush3.bf16.msra.mxu1 %v2783_v7 }
 0x388   : > { %2300 = vmatprep.subr.bf16.mxu1 %v676_v56 }
 0x38b   : > { %2301 = vmatpush3.bf16.msra.mxu1 %v676_v56 }
 0x38c   : > { %2314 = vmatprep.subr.bf16.mxu1 %v887_v57 }
 0x39f   : > { %v870_v59 = vpop.xlane.xlu1 %869 }
 0x3a3   : > { %v864_v58 = vpop.xlane.xlu1 %863 }
 0x3a7   : > { %v656_v60 = vpop.xlane.xlu0 %655  ;;  %v885_v16 = vpop.permute.xlu1 %884 }
 0x3a8   : > { %2491 = vrcp.f32 %v656_v60 }
 0x3ab   : > { %v873_v61 = vpop.xlane.xlu0 %872  ;;  %v979_v23 = vpop.permute.xlu1 %978 }
 0x3ac   : > { %2493 = vrcp.f32 %v873_v61  ;;  %v989_v26 = vsel %vm365_vm2, %v979_v23, 0 }
 0x3ad   : > { %2495 = vrcp.f32 %v864_v58 }
 0x3ae   : > { %2497 = vrcp.f32 %v870_v59 }
 0x3af   : > { %v867_v62 = vpop.xlane.xlu0 %866 }
 0x3b0   : > { %2499 = vrcp.f32 %v867_v62 }
 0x3b3   : > { %v981_v18 = vpop.permute.xlu0 %980 }
 0x3b4   : > { %v992_v22 = vsel %vm365_vm2, %v981_v18, 0 }
 0x3b5   : > { %v2492_v3 = vpop.eup %2491 }
 0x3b6   : > { %v668_v7 = vmul.f32 %v2492_v3, %v2810_v30 }
 0x3b7   : > { %v975_v24 = vpop.permute.xlu0 %974 }
 0x3b8   : > { %v671_v10 = vpack.c.bf16 %v668_v7, %v667_v6 }
 0x3b9   : > { %v2494_v12 = vpop.eup %2493 }
 0x3ba   : > { %2302 = vmatprep.mubr.msk.bf16.mxu1 %vm431_vm3, %v671_v10  ;;  %v2496_v13 = vpop.eup %2495  ;;  %v881_v5 = vmul.f32 %v2494_v12, %v2814_v31 }
 0x3bb   : > { %2303 = vmatmul.mubr.msk.bf16.vlgmr.msra.gmra.mxu1 %vm431_vm3, %v672_v11  ;;  %v2498_v14 = vpop.eup %2497  ;;  %v878_v9 = vmul.f32 %v2496_v13, %v2806_v15 }
 0x3bc   : > { %2315 = vmatpush3.bf16.msra.mxu1 %v887_v57  ;;  %v880_v19 = vmul.f32 %v2498_v14, %v2802_v27  ;;  %v977_v27 = vpop.permute.xlu1 %976 }
 0x3bd   : > { %v2500_v17 = vpop.eup %2499  ;;  %2316 = vmatprep.subr.bf16.mxu1 %v885_v16 }
 0x3be   : > { %v879_v63 = vmul.f32 %v2500_v17, %v2818_v34  ;;  %v883_v21 = vpack.c.bf16 %v881_v5, %v880_v19 }
 0x3c0   : > { %2317 = vmatpush3.bf16.msra.mxu1 %v885_v16  ;;  %v882_v20 = vpack.c.bf16 %v879_v63, %v878_v9 }
 0x3c1   : > { %2404 = vmatprep.subr.msk.bf16.mxu1 %vm365_vm2, %v981_v18 }
 0x3c2   : > { %2318 = vmatprep.mubr.msk.bf16.mxu1 %vm431_vm3, %v882_v20 }
 0x3c3   : > { %2319 = vmatmul.mubr.msk.bf16.vlgmr.msra.gmra.mxu1 %vm431_vm3, %v883_v21 }
 0x3c4   : > { %2323 = vmatpush3.bf16.xpose.msra.mxu1 %v992_v22  ;;  %2326 = vmatprep.mubr.msk.bf16.mxu1 %vm365_vm2, %v975_v24 }
 0x3c5   : > { %2405 = vmatprep.subr.msk.bf16.mxu1 %vm365_vm2, %v979_v23 }
 0x3cc   : > { %2325 = vmatpush3.bf16.xpose.msra.mxu1 %v989_v26 }
 0x3d3   : > { %2327 = vmatmul.mubr.msk.bf16.vlgmr.msra.gmra.mxu1 %vm365_vm2, %v977_v27 }
 0x446   : > { %v2288_v25 = vpop.f32.mrf.mxu1 }
 0x447   : > { %v2186_v15 = vpack.c.bf16 %v2288_v25, %v2288_v25 }
 0x448   : > { %v518_v28 = vpop.f32.mrf.mxu1 }
 0x449   : > { %552 = vst.msk [vmem:[#allocation2 + $0x8] sm:$0xf] %vm549_vm4, %v2186_v15  ;;  %v2184_v30 = vpack.c.bf16 %v518_v28, %v518_v28 }
 0x44a   : > { %v2289_v29 = vpop.f32.mrf.mxu1 }
 0x44b   : > { %550 = vst.msk [vmem:[#allocation2] sm:$0xf] %vm549_vm4, %v2184_v30  ;;  %v2187_v31 = vpack.c.bf16 %v2289_v29, %v2289_v29 }
 0x44c   : > { %v521_v32 = vpop.f32.mrf.mxu1 }
 0x44d   : > { %553 = vst.msk [vmem:[#allocation2 + $0xc] sm:$0xf] %vm549_vm4, %v2187_v31  ;;  %v2185_v34 = vpack.c.bf16 %v521_v32, %v521_v32 }
 0x44f   : > { %551 = vst.msk [vmem:[#allocation2 + $0x4] sm:$0xf] %vm549_vm4, %v2185_v34 }
 0x47b   : > { %v2856_v35 = vpop.f32.mrf.mxu1 }
 0x47d   : > { %v2858_v37 = vpop.f32.mrf.mxu1 }
 0x47f   : > { %v2860_v38 = vpop.f32.mrf.mxu1 }
 0x481   : > { %v2862_v39 = vpop.f32.mrf.mxu1 }
 0x483   : > { %v2864_v40 = vpop.f32.mrf.mxu1 }
 0x485   : > { %v2866_v42 = vpop.f32.mrf.mxu1 }
 0x487   : > { %v2868_v43 = vpop.f32.mrf.mxu1 }
 0x489   : > { %v2870_v44 = vpop.f32.mrf.mxu1 }
 0x493   : > { %v2328_v45 = vpop.f32.mrf.mxu1 }
 0x494   : > { %v1045_v49 = vmul.f32 0.37796447, %v2328_v45 }
 0x495   : > { %v1028_v46 = vpop.f32.mrf.mxu1 }
 0x496   : > { %v1043_v47 = vmul.f32 0.37796447, %v1028_v46  ;;  %v1053_v55 = vsel %vm431_vm3, %v1045_v49, -inf }
 0x497   : > { %v2329_v48 = vpop.f32.mrf.mxu1 }
 0x498   : > { %v1047_v50 = vsel %vm431_vm3, %v1043_v47, -inf  ;;  %v1046_v54 = vmul.f32 0.37796447, %v2329_v48 }
 0x499   : > { %1048 = vmax.xlane.f32.xlu0 %v1047_v50  ;;  %v1031_v51 = vpop.f32.mrf.mxu1 }
 0x49a   : > { %v1044_v53 = vmul.f32 0.37796447, %v1031_v51  ;;  %v1056_v57 = vsel %vm431_vm3, %v1046_v54, -inf }
 0x49c   : > { %v1050_v56 = vsel %vm431_vm3, %v1044_v53, -inf }
 0x49d   : > { %1054 = vmax.xlane.f32.xlu0 %v1053_v55  ;;  %1051 = vmax.xlane.f32.xlu1 %v1050_v56 }
 0x4a1   : > { %1057 = vmax.xlane.f32.xlu0 %v1056_v57 }
 0x4ae   : > { %1095 = vrot.lane.b32.xlu1 %v2718_v52, %s2602_s23 }
 0x522   : > { %v1049_v59 = vpop.xlane.xlu0 %1048 }
 0x523   : > { %v1059_v60 = vsub.f32 %v1043_v47, %v1049_v59 }
 0x525   : > { %v1063_v0 = vmul.f32 1.442695, %v1059_v60 }
 0x526   : > { %v1055_v58 = vpop.xlane.xlu0 %1054  ;;  %v1052_v61 = vpop.xlane.xlu1 %1051 }
 0x527   : > { %v1061_v62 = vsub.f32 %v1045_v49, %v1055_v58  ;;  %v1060_v2 = vsub.f32 %v1044_v53, %v1052_v61 }
 0x529   : > { %v1067_v1 = vmul.f32 1.442695, %v1061_v62  ;;  %v1065_v7 = vmul.f32 1.442695, %v1060_v2 }
 0x52a   : > { %v1058_v3 = vpop.xlane.xlu0 %1057  ;;  %v1096_v4 = vpop.permute.xlu1 %1095 }
 0x52b   : > { %2501 = vpow2.f32 %v1067_v1  ;;  %v1062_v6 = vsub.f32 %v1046_v54, %v1058_v3  ;;  %2330 = vmatprep.subr.bf16.mxu0 %v1096_v4 }
 0x52c   : > { %2331 = vmatpush3.bf16.msra.mxu0 %v1096_v4  ;;  %2503 = vpow2.f32 %v1063_v0 }
 0x52d   : > { %v1069_v8 = vmul.f32 1.442695, %v1062_v6 }
 0x52f   : > { %2505 = vpow2.f32 %v1069_v8 }
 0x530   : > { %2507 = vpow2.f32 %v1065_v7 }
 0x538   : > { %v2502_v10 = vpop.eup %2501 }
 0x539   : > { %v1077_v11 = vsel %vm431_vm3, %v2502_v10, 0.0  ;;  %v2504_v12 = vpop.eup %2503 }
 0x53a   : > { %1078 = vadd.xlane.f32.xlu1 %v1077_v11  ;;  %v1071_v16 = vsel %vm431_vm3, %v2504_v12, 0.0 }
 0x53c   : > { %v2506_v13 = vpop.eup %2505 }
 0x53d   : > { %v1080_v14 = vsel %vm431_vm3, %v2506_v13, 0.0  ;;  %v2508_v17 = vpop.eup %2507 }
 0x53e   : > { %1081 = vadd.xlane.f32.xlu0 %v1080_v14  ;;  %1072 = vadd.xlane.f32.xlu1 %v1071_v16  ;;  %v1074_v18 = vsel %vm431_vm3, %v2508_v17, 0.0 }
 0x542   : > { %1075 = vadd.xlane.f32.xlu0 %v1074_v18 }
 0x54f   : > { %1189 = vrot.lane.b32.xlu1 %v2696_v41, %s2603_s24 }
 0x553   : > { %1187 = vrot.lane.b32.xlu1 %v2688_v33, %s2603_s24 }
 0x557   : > { %1185 = vrot.lane.b32.xlu1 %v2696_v41, %s2604_s25 }
 0x558   : > { %1093 = vrot.lane.b32.xlu0 %v2690_v36, %s2602_s23 }
 0x55c   : > { %1183 = vrot.lane.b32.xlu0 %v2688_v33, %s2604_s25 }
 0x5c3   : > { %v1079_v5 = vpop.xlane.xlu1 %1078 }
 0x5c7   : > { %v1082_v9 = vpop.xlane.xlu0 %1081  ;;  %v1073_v63 = vpop.xlane.xlu1 %1072 }
 0x5c8   : > { %2509 = vrcp.f32 %v1082_v9 }
 0x5c9   : > { %2511 = vrcp.f32 %v1073_v63 }
 0x5ca   : > { %2513 = vrcp.f32 %v1079_v5 }
 0x5cb   : > { %v1076_v19 = vpop.xlane.xlu0 %1075  ;;  %v1190_v21 = vpop.permute.xlu1 %1189 }
 0x5cc   : > { %2515 = vrcp.f32 %v1076_v19  ;;  %v1201_v31 = vsel %vm365_vm2, %v1190_v21, 0 }
 0x5cf   : > { %v1094_v20 = vpop.permute.xlu0 %1093  ;;  %v1188_v34 = vpop.permute.xlu1 %1187 }
 0x5d0   : > { %2332 = vmatprep.subr.bf16.mxu0 %v1094_v20  ;;  %v1198_v45 = vsel %vm365_vm2, %v1188_v34, 0 }
 0x5d1   : > { %2333 = vmatpush3.bf16.msra.mxu0 %v1094_v20 }
 0x5d2   : > { %2406 = vmatprep.subr.msk.bf16.mxu0 %vm365_vm2, %v1190_v21 }
 0x5d3   : > { %v1184_v32 = vpop.permute.xlu0 %1183  ;;  %v1186_v46 = vpop.permute.xlu1 %1185 }
 0x5d5   : > { %v2510_v22 = vpop.eup %2509 }
 0x5d6   : > { %v2512_v24 = vpop.eup %2511  ;;  %v1090_v27 = vmul.f32 %v2510_v22, %v2506_v13 }
 0x5d7   : > { %v2514_v23 = vpop.eup %2513  ;;  %v1087_v25 = vmul.f32 %v2512_v24, %v2504_v12 }
 0x5d8   : > { %v1089_v28 = vmul.f32 %v2514_v23, %v2502_v10 }
 0x5d9   : > { %v2516_v26 = vpop.eup %2515 }
 0x5da   : > { %v1088_v15 = vmul.f32 %v2516_v26, %v2508_v17  ;;  %v1092_v29 = vpack.c.bf16 %v1090_v27, %v1089_v28 }
 0x5dc   : > { %v1091_v30 = vpack.c.bf16 %v1088_v15, %v1087_v25 }
 0x5de   : > { %2334 = vmatprep.mubr.msk.bf16.mxu0 %vm431_vm3, %v1091_v30 }
 0x5df   : > { %2335 = vmatmul.mubr.msk.bf16.vlgmr.msra.gmra.mxu0 %vm431_vm3, %v1092_v29 }
 0x5e0   : > { %2339 = vmatpush3.bf16.xpose.msra.mxu0 %v1201_v31  ;;  %2342 = vmatprep.mubr.msk.bf16.mxu0 %vm365_vm2, %v1184_v32 }
 0x5e1   : > { %2407 = vmatprep.subr.msk.bf16.mxu0 %vm365_vm2, %v1188_v34 }
 0x5e8   : > { %2341 = vmatpush3.bf16.xpose.msra.mxu0 %v1198_v45 }
 0x5ef   : > { %2343 = vmatmul.mubr.msk.bf16.vlgmr.msra.gmra.mxu0 %vm365_vm2, %v1186_v46 }
 0x69f   : > { %v2900_v47 = vpop.f32.mrf.mxu0 }
 0x6a1   : > { %v2902_v48 = vpop.f32.mrf.mxu0 }
 0x6a3   : > { %v2904_v49 = vpop.f32.mrf.mxu0 }
 0x6a5   : > { %v2906_v50 = vpop.f32.mrf.mxu0 }
 0x6af   : > { %v2344_v51 = vpop.f32.mrf.mxu0 }
 0x6b0   : > { %v1254_v56 = vmul.f32 0.37796447, %v2344_v51 }
 0x6b1   : > { %v1237_v53 = vpop.f32.mrf.mxu0 }
 0x6b2   : > { %v1252_v54 = vmul.f32 0.37796447, %v1237_v53  ;;  %v1262_v61 = vsel %vm431_vm3, %v1254_v56, -inf }
 0x6b3   : > { %v2345_v55 = vpop.f32.mrf.mxu0 }
 0x6b4   : > { %v1256_v57 = vsel %vm431_vm3, %v1252_v54, -inf  ;;  %v1255_v58 = vmul.f32 0.37796447, %v2345_v55 }
 0x6b5   : > { %1257 = vmax.xlane.f32.xlu0 %v1256_v57  ;;  %v1240_v59 = vpop.f32.mrf.mxu0 }
 0x6b6   : > { %v1253_v60 = vmul.f32 0.37796447, %v1240_v59  ;;  %v1265_v0 = vsel %vm431_vm3, %v1255_v58, -inf }
 0x6b8   : > { %v1259_v62 = vsel %vm431_vm3, %v1253_v60, -inf }
 0x6b9   : > { %1263 = vmax.xlane.f32.xlu0 %v1262_v61  ;;  %1260 = vmax.xlane.f32.xlu1 %v1259_v62 }
 0x6bd   : > { %1266 = vmax.xlane.f32.xlu0 %v1265_v0 }
 0x6ca   : > { %1304 = vrot.lane.b32.xlu1 %v2718_v52, %s2604_s25 }
 0x73e   : > { %v1258_v1 = vpop.xlane.xlu0 %1257 }
 0x73f   : > { %v1268_v2 = vsub.f32 %v1252_v54, %v1258_v1 }
 0x741   : > { %v1272_v7 = vmul.f32 1.442695, %v1268_v2 }
 0x742   : > { %v1264_v3 = vpop.xlane.xlu0 %1263  ;;  %v1261_v4 = vpop.xlane.xlu1 %1260 }
 0x743   : > { %v1270_v6 = vsub.f32 %v1254_v56, %v1264_v3  ;;  %v1269_v10 = vsub.f32 %v1253_v60, %v1261_v4 }
 0x745   : > { %v1276_v8 = vmul.f32 1.442695, %v1270_v6  ;;  %v1274_v14 = vmul.f32 1.442695, %v1269_v10 }
 0x746   : > { %v1267_v11 = vpop.xlane.xlu0 %1266  ;;  %v1305_v12 = vpop.permute.xlu1 %1304 }
 0x747   : > { %2517 = vpow2.f32 %v1276_v8  ;;  %v1271_v13 = vsub.f32 %v1255_v58, %v1267_v11  ;;  %2346 = vmatprep.subr.bf16.mxu1 %v1305_v12 }
 0x748   : > { %2347 = vmatpush3.bf16.msra.mxu1 %v1305_v12  ;;  %2519 = vpow2.f32 %v1272_v7 }
 0x749   : > { %v1278_v16 = vmul.f32 1.442695, %v1271_v13 }
 0x74b   : > { %2521 = vpow2.f32 %v1278_v16 }
 0x74c   : > { %2523 = vpow2.f32 %v1274_v14 }
 0x754   : > { %v2518_v17 = vpop.eup %2517 }
 0x755   : > { %v1286_v18 = vsel %vm431_vm3, %v2518_v17, 0.0  ;;  %v2520_v5 = vpop.eup %2519 }
 0x756   : > { %1287 = vadd.xlane.f32.xlu1 %v1286_v18  ;;  %v1280_v19 = vsel %vm431_vm3, %v2520_v5, 0.0 }
 0x758   : > { %v2522_v9 = vpop.eup %2521 }
 0x759   : > { %v1289_v63 = vsel %vm431_vm3, %v2522_v9, 0.0  ;;  %v2524_v20 = vpop.eup %2523 }
 0x75a   : > { %1290 = vadd.xlane.f32.xlu0 %v1289_v63  ;;  %1281 = vadd.xlane.f32.xlu1 %v1280_v19  ;;  %v1283_v21 = vsel %vm431_vm3, %v2524_v20, 0.0 }
 0x75e   : > { %1284 = vadd.xlane.f32.xlu0 %v1283_v21 }
 0x76b   : > { %1398 = vrot.lane.b32.xlu1 %v2696_v41, %s2605_s26 }
 0x76f   : > { %1396 = vrot.lane.b32.xlu1 %v2688_v33, %s2605_s26 }
 0x773   : > { %1394 = vrot.lane.b32.xlu1 %v2696_v41, %s2606_s27 }
 0x774   : > { %1302 = vrot.lane.b32.xlu0 %v2690_v36, %s2604_s25  ;;  %s224_s25 = scalar_lea.vmem %s3140_s5, %s2182_s28 }
 0x778   : > { %1392 = vrot.lane.b32.xlu0 %v2688_v33, %s2606_s27 }
 0x7df   : > { %v1288_v22 = vpop.xlane.xlu1 %1287 }
 0x7e3   : > { %v1291_v24 = vpop.xlane.xlu0 %1290  ;;  %v1282_v23 = vpop.xlane.xlu1 %1281 }
 0x7e4   : > { %2525 = vrcp.f32 %v1291_v24 }
 0x7e5   : > { %2527 = vrcp.f32 %v1282_v23 }
 0x7e6   : > { %2529 = vrcp.f32 %v1288_v22 }
 0x7e7   : > { %v1285_v26 = vpop.xlane.xlu0 %1284  ;;  %v1399_v25 = vpop.permute.xlu1 %1398 }
 0x7e8   : > { %2531 = vrcp.f32 %v1285_v26  ;;  %v1410_v53 = vsel %vm365_vm2, %v1399_v25, 0 }
 0x7eb   : > { %v1303_v27 = vpop.permute.xlu0 %1302  ;;  %v1397_v55 = vpop.permute.xlu1 %1396 }
 0x7ec   : > { %2348 = vmatprep.subr.bf16.mxu1 %v1303_v27  ;;  %v1407_v56 = vsel %vm365_vm2, %v1397_v55, 0 }
 0x7ed   : > { %2349 = vmatpush3.bf16.msra.mxu1 %v1303_v27 }
 0x7ee   : > { %2408 = vmatprep.subr.msk.bf16.mxu1 %vm365_vm2, %v1399_v25 }
 0x7ef   : > { %v1393_v54 = vpop.permute.xlu0 %1392  ;;  %v1395_v57 = vpop.permute.xlu1 %1394 }
 0x7f1   : > { %v2526_v15 = vpop.eup %2525 }
 0x7f2   : > { %v2528_v28 = vpop.eup %2527  ;;  %v1299_v31 = vmul.f32 %v2526_v15, %v2522_v9 }
 0x7f3   : > { %v2530_v30 = vpop.eup %2529  ;;  %v1296_v32 = vmul.f32 %v2528_v28, %v2520_v5 }
 0x7f4   : > { %v1298_v45 = vmul.f32 %v2530_v30, %v2518_v17 }
 0x7f5   : > { %v2532_v29 = vpop.eup %2531 }
 0x7f6   : > { %v1297_v34 = vmul.f32 %v2532_v29, %v2524_v20  ;;  %v1301_v51 = vpack.c.bf16 %v1299_v31, %v1298_v45 }
 0x7f8   : > { %v1300_v46 = vpack.c.bf16 %v1297_v34, %v1296_v32 }
 0x7fa   : > { %2350 = vmatprep.mubr.msk.bf16.mxu1 %vm431_vm3, %v1300_v46 }
 0x7fb   : > { %2351 = vmatmul.mubr.msk.bf16.vlgmr.msra.gmra.mxu1 %vm431_vm3, %v1301_v51 }
 0x7fc   : > { %2355 = vmatpush3.bf16.xpose.msra.mxu1 %v1410_v53  ;;  %2358 = vmatprep.mubr.msk.bf16.mxu1 %vm365_vm2, %v1393_v54 }
 0x7fd   : > { %2409 = vmatprep.subr.msk.bf16.mxu1 %vm365_vm2, %v1397_v55 }
 0x804   : > { %2357 = vmatpush3.bf16.xpose.msra.mxu1 %v1407_v56 }
 0x80b   : > { %2359 = vmatmul.mubr.msk.bf16.vlgmr.msra.gmra.mxu1 %vm365_vm2, %v1395_v57 }
 0x8bb   : > { %v2936_v59 = vpop.f32.mrf.mxu1 }
 0x8bd   : > { %v2938_v60 = vpop.f32.mrf.mxu1 }
 0x8bf   : > { %v2940_v58 = vpop.f32.mrf.mxu1 }
 0x8c1   : > { %v2942_v61 = vpop.f32.mrf.mxu1 }
 0x8cb   : > { %v2360_v62 = vpop.f32.mrf.mxu1 }
 0x8cc   : > { %v1463_v3 = vmul.f32 0.37796447, %v2360_v62 }
 0x8cd   : > { %v1446_v0 = vpop.f32.mrf.mxu1 }
 0x8ce   : > { %v1461_v1 = vmul.f32 0.37796447, %v1446_v0  ;;  %v1471_v10 = vsel %vm431_vm3, %v1463_v3, -inf }
 0x8cf   : > { %v2361_v2 = vpop.f32.mrf.mxu1 }
 0x8d0   : > { %v1465_v4 = vsel %vm431_vm3, %v1461_v1, -inf  ;;  %v1464_v8 = vmul.f32 0.37796447, %v2361_v2 }
 0x8d1   : > { %1466 = vmax.xlane.f32.xlu0 %v1465_v4  ;;  %v1449_v6 = vpop.f32.mrf.mxu1 }
 0x8d2   : > { %v1462_v7 = vmul.f32 0.37796447, %v1449_v6  ;;  %v1474_v12 = vsel %vm431_vm3, %v1464_v8, -inf }
 0x8d4   : > { %v1468_v11 = vsel %vm431_vm3, %v1462_v7, -inf }
 0x8d5   : > { %1472 = vmax.xlane.f32.xlu0 %v1471_v10  ;;  %1469 = vmax.xlane.f32.xlu1 %v1468_v11 }
 0x8d9   : > { %1475 = vmax.xlane.f32.xlu0 %v1474_v12 }
 0x8e6   : > { %1513 = vrot.lane.b32.xlu1 %v2718_v52, %s2606_s27 }
 0x95a   : > { %v1467_v13 = vpop.xlane.xlu0 %1466 }
 0x95b   : > { %v1477_v14 = vsub.f32 %v1461_v1, %v1467_v13 }
 0x95d   : > { %v1481_v5 = vmul.f32 1.442695, %v1477_v14 }
 0x95e   : > { %v1473_v16 = vpop.xlane.xlu0 %1472  ;;  %v1470_v17 = vpop.xlane.xlu1 %1469 }
 0x95f   : > { %v1479_v18 = vsub.f32 %v1463_v3, %v1473_v16  ;;  %v1478_v63 = vsub.f32 %v1462_v7, %v1470_v17 }
 0x961   : > { %v1485_v9 = vmul.f32 1.442695, %v1479_v18  ;;  %v1483_v22 = vmul.f32 1.442695, %v1478_v63 }
 0x962   : > { %v1476_v19 = vpop.xlane.xlu0 %1475  ;;  %v1514_v20 = vpop.permute.xlu1 %1513 }
 0x963   : > { %2533 = vpow2.f32 %v1485_v9  ;;  %v1480_v21 = vsub.f32 %v1464_v8, %v1476_v19  ;;  %2362 = vmatprep.subr.bf16.mxu0 %v1514_v20 }
 0x964   : > { %2363 = vmatpush3.bf16.msra.mxu0 %v1514_v20  ;;  %2535 = vpow2.f32 %v1481_v5 }
 0x965   : > { %v1487_v24 = vmul.f32 1.442695, %v1480_v21 }
 0x967   : > { %2537 = vpow2.f32 %v1487_v24 }
 0x968   : > { %2539 = vpow2.f32 %v1483_v22 }
 0x970   : > { %v2534_v23 = vpop.eup %2533 }
 0x971   : > { %v1495_v26 = vsel %vm431_vm3, %v2534_v23, 0.0  ;;  %v2536_v27 = vpop.eup %2535 }
 0x972   : > { %1496 = vadd.xlane.f32.xlu1 %v1495_v26  ;;  %v1489_v28 = vsel %vm431_vm3, %v2536_v27, 0.0 }
 0x974   : > { %v2538_v25 = vpop.eup %2537 }
 0x975   : > { %v1498_v15 = vsel %vm431_vm3, %v2538_v25, 0.0  ;;  %v2540_v30 = vpop.eup %2539 }
 0x976   : > { %1499 = vadd.xlane.f32.xlu0 %v1498_v15  ;;  %1490 = vadd.xlane.f32.xlu1 %v1489_v28  ;;  %v1492_v29 = vsel %vm431_vm3, %v2540_v30, 0.0 }
 0x97a   : > { %1493 = vadd.xlane.f32.xlu0 %v1492_v29 }
 0x987   : > { %1607 = vrot.lane.b32.xlu1 %v2696_v41, %s2607_s29 }
 0x98b   : > { %1605 = vrot.lane.b32.xlu1 %v2688_v33, %s2607_s29 }
 0x98f   : > { %1603 = vrot.lane.b32.xlu1 %v2696_v41, %s2608_s30 }
 0x990   : > { %1511 = vrot.lane.b32.xlu0 %v2690_v36, %s2606_s27 }
 0x994   : > { %1601 = vrot.lane.b32.xlu0 %v2688_v33, %s2608_s30 }
 0x9fb   : > { %v1497_v31 = vpop.xlane.xlu1 %1496 }
 0x9ff   : > { %v1500_v32 = vpop.xlane.xlu0 %1499  ;;  %v1491_v34 = vpop.xlane.xlu1 %1490 }
 0xa00   : > { %2541 = vrcp.f32 %v1500_v32 }
 0xa01   : > { %2543 = vrcp.f32 %v1491_v34 }
 0xa02   : > { %2545 = vrcp.f32 %v1497_v31 }
 0xa03   : > { %v1494_v45 = vpop.xlane.xlu0 %1493  ;;  %v1608_v51 = vpop.permute.xlu1 %1607 }
 0xa04   : > { %2547 = vrcp.f32 %v1494_v45  ;;  %v1619_v2 = vsel %vm365_vm2, %v1608_v51, 0 }
 0xa07   : > { %v1512_v46 = vpop.permute.xlu0 %1511  ;;  %v1606_v4 = vpop.permute.xlu1 %1605 }
 0xa08   : > { %2364 = vmatprep.subr.bf16.mxu0 %v1512_v46  ;;  %v1616_v6 = vsel %vm365_vm2, %v1606_v4, 0 }
 0xa09   : > { %2365 = vmatpush3.bf16.msra.mxu0 %v1512_v46 }
 0xa0a   : > { %2410 = vmatprep.subr.msk.bf16.mxu0 %vm365_vm2, %v1608_v51 }
 0xa0b   : > { %v1602_v3 = vpop.permute.xlu0 %1601  ;;  %v1604_v7 = vpop.permute.xlu1 %1603 }
 0xa0d   : > { %v2542_v41 = vpop.eup %2541 }
 0xa0e   : > { %v2544_v53 = vpop.eup %2543  ;;  %v1508_v56 = vmul.f32 %v2542_v41, %v2538_v25 }
 0xa0f   : > { %v2546_v54 = vpop.eup %2545  ;;  %v1505_v33 = vmul.f32 %v2544_v53, %v2536_v27 }
 0xa10   : > { %v1507_v62 = vmul.f32 %v2546_v54, %v2534_v23 }
 0xa11   : > { %v2548_v55 = vpop.eup %2547 }
 0xa12   : > { %v1506_v57 = vmul.f32 %v2548_v55, %v2540_v30  ;;  %v1510_v1 = vpack.c.bf16 %v1508_v56, %v1507_v62  ;;  %v2191_v62 = vpack.c.bf16 %v2860_v38, %v2860_v38  ;;  %v2194_v38 = vpack.c.bf16 %v2864_v40, %v2864_v40 }
 0xa13   : > { %v2198_v40 = vpack.c.bf16 %v2900_v47, %v2900_v47  ;;  %v2202_v47 = vpack.c.bf16 %v2936_v59, %v2936_v59 }
 0xa14   : > { %v1509_v0 = vpack.c.bf16 %v1506_v57, %v1505_v33  ;;  %v2188_v33 = vpack.c.bf16 %v2858_v37, %v2858_v37  ;;  %v2189_v57 = vpack.c.bf16 %v2862_v39, %v2862_v39  ;;  %v2192_v37 = vpack.c.bf16 %v2866_v42, %v2866_v42 }
 0xa15   : > { %v2196_v39 = vpack.c.bf16 %v2902_v48, %v2902_v48  ;;  %v2199_v42 = vpack.c.bf16 %v2904_v49, %v2904_v49  ;;  %v2203_v48 = vpack.c.bf16 %v2940_v58, %v2940_v58 }
 0xa16   : > { %2366 = vmatprep.mubr.msk.bf16.mxu0 %vm431_vm3, %v1509_v0  ;;  %v2190_v0 = vpack.c.bf16 %v2856_v35, %v2856_v35  ;;  %v2197_v35 = vpack.c.bf16 %v2906_v50, %v2906_v50 }
 0xa17   : > { %2367 = vmatmul.mubr.msk.bf16.vlgmr.msra.gmra.mxu0 %vm431_vm3, %v1510_v1 }
 0xa18   : > { %2371 = vmatpush3.bf16.xpose.msra.mxu0 %v1619_v2  ;;  %2374 = vmatprep.mubr.msk.bf16.mxu0 %vm365_vm2, %v1602_v3 }
 0xa19   : > { %2411 = vmatprep.subr.msk.bf16.mxu0 %vm365_vm2, %v1606_v4 }
 0xa20   : > { %2373 = vmatpush3.bf16.xpose.msra.mxu0 %v1616_v6 }
 0xa27   : > { %2375 = vmatmul.mubr.msk.bf16.vlgmr.msra.gmra.mxu0 %vm365_vm2, %v1604_v7 }
 0xad7   : > { %v2972_v8 = vpop.f32.mrf.mxu0 }
 0xad8   : > { %v2206_v59 = vpack.c.bf16 %v2972_v8, %v2972_v8 }
 0xad9   : > { %v2974_v10 = vpop.f32.mrf.mxu0 }
 0xada   : > { %v2204_v50 = vpack.c.bf16 %v2974_v10, %v2974_v10 }
 0xadb   : > { %v2976_v11 = vpop.f32.mrf.mxu0 }
 0xadd   : > { %v2978_v12 = vpop.f32.mrf.mxu0 }
 0xade   : > { %v2205_v49 = vpack.c.bf16 %v2978_v12, %v2978_v12 }
 0xae7   : > { %v2376_v13 = vpop.f32.mrf.mxu0 }
 0xae8   : > { %v1672_v18 = vmul.f32 0.37796447, %v2376_v13 }
 0xae9   : > { %v1655_v14 = vpop.f32.mrf.mxu0 }
 0xaea   : > { %v1670_v16 = vmul.f32 0.37796447, %v1655_v14  ;;  %v1680_v20 = vsel %vm431_vm3, %v1672_v18, -inf }
 0xaeb   : > { %v2377_v17 = vpop.f32.mrf.mxu0 }
 0xaec   : > { %v1674_v5 = vsel %vm431_vm3, %v1670_v16, -inf  ;;  %v1673_v19 = vmul.f32 0.37796447, %v2377_v17 }
 0xaed   : > { %1675 = vmax.xlane.f32.xlu0 %v1674_v5  ;;  %v1658_v9 = vpop.f32.mrf.mxu0 }
 0xaee   : > { %v1671_v63 = vmul.f32 0.37796447, %v1658_v9  ;;  %v1683_v22 = vsel %vm431_vm3, %v1673_v19, -inf }
 0xaf0   : > { %v1677_v21 = vsel %vm431_vm3, %v1671_v63, -inf }
 0xaf1   : > { %1681 = vmax.xlane.f32.xlu0 %v1680_v20  ;;  %1678 = vmax.xlane.f32.xlu1 %v1677_v21 }
 0xaf5   : > { %1684 = vmax.xlane.f32.xlu0 %v1683_v22 }
 0xb76   : > { %v1676_v24 = vpop.xlane.xlu0 %1675 }
 0xb77   : > { %v1686_v23 = vsub.f32 %v1670_v16, %v1676_v24 }
 0xb79   : > { %v1690_v15 = vmul.f32 1.442695, %v1686_v23 }
 0xb7a   : > { %v1682_v26 = vpop.xlane.xlu0 %1681  ;;  %v1679_v27 = vpop.xlane.xlu1 %1678 }
 0xb7b   : > { %v1688_v25 = vsub.f32 %v1672_v18, %v1682_v26  ;;  %v1687_v30 = vsub.f32 %v1671_v63, %v1679_v27 }
 0xb7d   : > { %v1694_v28 = vmul.f32 1.442695, %v1688_v25  ;;  %v1692_v32 = vmul.f32 1.442695, %v1687_v30 }
 0xb7e   : > { %v1685_v29 = vpop.xlane.xlu0 %1684 }
 0xb7f   : > { %2549 = vpow2.f32 %v1694_v28  ;;  %v1689_v31 = vsub.f32 %v1673_v19, %v1685_v29 }
 0xb80   : > { %2551 = vpow2.f32 %v1690_v15 }
 0xb81   : > { %v1696_v34 = vmul.f32 1.442695, %v1689_v31 }
 0xb83   : > { %2553 = vpow2.f32 %v1696_v34 }
 0xb84   : > { %2555 = vpow2.f32 %v1692_v32 }
 0xb8c   : > { %v2984_v45 = vpop.eup %2549 }
 0xb8d   : > { %v1704_v46 = vsel %vm431_vm3, %v2984_v45, 0.0  ;;  %v2988_v51 = vpop.eup %2551 }
 0xb8e   : > { %1705 = vadd.xlane.f32.xlu1 %v1704_v46  ;;  %v1698_v54 = vsel %vm431_vm3, %v2988_v51, 0.0 }
 0xb90   : > { %v2990_v41 = vpop.eup %2553 }
 0xb91   : > { %v1707_v53 = vsel %vm431_vm3, %v2990_v41, 0.0  ;;  %v2996_v55 = vpop.eup %2555 }
 0xb92   : > { %1708 = vadd.xlane.f32.xlu0 %v1707_v53  ;;  %1699 = vadd.xlane.f32.xlu1 %v1698_v54  ;;  %v1701_v56 = vsel %vm431_vm3, %v2996_v55, 0.0  ;;  %v2449_v53 = vld [vmem:[%s3138_s3 + $0x8] sm:$0xff]   ;;  %v2450_v54 = vld [vmem:[%s3138_s3] sm:$0xff]  }
 0xb96   : > { %1702 = vadd.xlane.f32.xlu0 %v1701_v56 }
 0xba3   : > { %1722 = vrot.lane.b32.xlu1 %v2718_v52, %s2608_s30  ;;  %v2193_v52 = vpack.c.bf16 %v2870_v44, %v2870_v44  ;;  %v2200_v44 = vpack.c.bf16 %v2938_v60, %v2938_v60  ;;  %v2207_v60 = vpack.c.bf16 %v2976_v11, %v2976_v11 }
 0xba7   : > { %748 = vrot.lane.b32.xlu1 %v2188_v33, %s2609_s6 }
 0xbab   : > { %750 = vrot.lane.b32.xlu1 %v2189_v57, %s2609_s6 }
 0xbac   : > { %1720 = vrot.lane.b32.xlu0 %v2690_v36, %s2608_s30  ;;  %v2195_v36 = vpack.c.bf16 %v2868_v43, %v2868_v43  ;;  %v2201_v43 = vpack.c.bf16 %v2942_v61, %v2942_v61 }
 0xbaf   : > { %754 = vrot.lane.b32.xlu1 %v2191_v62, %s2609_s6 }
 0xbb0   : > { %752 = vrot.lane.b32.xlu0 %v2190_v0, %s2609_s6 }
 0xbb3   : > { %959 = vrot.lane.b32.xlu1 %v2193_v52, %s2607_s29 }
 0xbb4   : > { %957 = vrot.lane.b32.xlu0 %v2192_v37, %s2607_s29 }
 0xbb7   : > { %963 = vrot.lane.b32.xlu1 %v2195_v36, %s2607_s29 }
 0xbb8   : > { %961 = vrot.lane.b32.xlu0 %v2194_v38, %s2607_s29 }
 0xbbb   : > { %1168 = vrot.lane.b32.xlu1 %v2197_v35, %s2605_s26 }
 0xbbc   : > { %1166 = vrot.lane.b32.xlu0 %v2196_v39, %s2605_s26 }
 0xbbf   : > { %1172 = vrot.lane.b32.xlu1 %v2199_v42, %s2605_s26 }
 0xbc0   : > { %1170 = vrot.lane.b32.xlu0 %v2198_v40, %s2605_s26 }
 0xbc3   : > { %1377 = vrot.lane.b32.xlu1 %v2201_v43, %s2603_s24  ;;  %v2169_v43 = vld [vmem:[%s3139_s4] ss:$0 sm:$0xff] }
 0xbc4   : > { %1375 = vrot.lane.b32.xlu0 %v2200_v44, %s2603_s24 }
 0xbc7   : > { %1381 = vrot.lane.b32.xlu1 %v2203_v48, %s2603_s24 }
 0xbc8   : > { %1379 = vrot.lane.b32.xlu0 %v2202_v47, %s2603_s24 }
 0xbcb   : > { %1586 = vrot.lane.b32.xlu1 %v2205_v49, %s2601_s22 }
 0xbcc   : > { %1584 = vrot.lane.b32.xlu0 %v2204_v50, %s2601_s22  ;;  %v2583_v50 = vld [vmem:[%s2674_s10] sm:$0xff] }
 0xbcf   : > { %1590 = vrot.lane.b32.xlu1 %v2207_v60, %s2601_s22 }
 0xbd0   : > { %1588 = vrot.lane.b32.xlu0 %v2206_v59, %s2601_s22 }
 0xc17   : > { %v1706_v58 = vpop.xlane.xlu1 %1705 }
 0xc1b   : > { %v1709_v61 = vpop.xlane.xlu0 %1708  ;;  %v1700_v1 = vpop.xlane.xlu1 %1699 }
 0xc1c   : > { %2557 = vrcp.f32 %v1709_v61 }
 0xc1d   : > { %2559 = vrcp.f32 %v1700_v1 }
 0xc1e   : > { %2561 = vrcp.f32 %v1706_v58  ;;  %v2584_v58 = vld [vmem:[%s2674_s10 + $0x10] sm:$0xff] }
 0xc1f   : > { %v1703_v2 = vpop.xlane.xlu0 %1702  ;;  %v1723_v3 = vpop.permute.xlu1 %1722 }
 0xc20   : > { %2563 = vrcp.f32 %v1703_v2  ;;  %2378 = vmatprep.subr.bf16.mxu1 %v1723_v3 }
 0xc21   : > { %2379 = vmatpush3.bf16.msra.mxu1 %v1723_v3 }
 0xc23   : > { %v1721_v4 = vpop.permute.xlu0 %1720  ;;  %v749_v6 = vpop.permute.xlu1 %748 }
 0xc24   : > { %761 = vst.msk [vmem:[#allocation2] sm:$0xf] %vm760_vm5, %v749_v6  ;;  %2380 = vmatprep.subr.bf16.mxu1 %v1721_v4 }
 0xc25   : > { %2381 = vmatpush3.bf16.msra.mxu1 %v1721_v4  ;;  %v2585_v4 = vld [vmem:[%s2674_s10 + $0x8] sm:$0xff] }
 0xc27   : > { %v753_v7 = vpop.permute.xlu0 %752  ;;  %v751_v8 = vpop.permute.xlu1 %750 }
 0xc28   : > { %763 = vst.msk [vmem:[#allocation2 + $0x8] sm:$0xf] %vm760_vm5, %v753_v7  ;;  %762 = vst.msk [vmem:[#allocation2 + $0x4] sm:$0xf] %vm760_vm5, %v751_v8  ;;  %v2586_v7 = vld [vmem:[%s2674_s10 + $0x18] sm:$0xff] }
 0xc29   : > { %v2558_v10 = vpop.eup %2557 }
 0xc2a   : > { %v2560_v11 = vpop.eup %2559  ;;  %v1717_v17 = vmul.f32 %v2558_v10, %v2990_v41 }
 0xc2b   : > { %v958_v12 = vpop.permute.xlu0 %957  ;;  %v755_v13 = vpop.permute.xlu1 %754  ;;  %v1714_v18 = vmul.f32 %v2560_v11, %v2988_v51  ;;  %v2448_v51 = vld [vmem:[%s3138_s3 + $0x10] sm:$0xff]  }
 0xc2c   : > { %v2562_v14 = vpop.eup %2561  ;;  %970 = vst.msk [vmem:[#allocation2] sm:$0xf] %vm969_vm6, %v958_v12 }
 0xc2d   : > { %764 = vst.msk [vmem:[#allocation2 + $0xc] sm:$0xf] %vm760_vm5, %v755_v13  ;;  %v2564_v16 = vpop.eup %2563  ;;  %v1716_v19 = vmul.f32 %v2562_v14, %v2984_v45  ;;  %v2447_v45 = vld [vmem:[%s3138_s3 + $0x18] ss:$0 sps:$4 sm:$0xff]  }
 0xc2e   : > { %v1715_v5 = vmul.f32 %v2564_v16, %v2996_v55  ;;  %2412 = vmatprep.subr.msk.bf16.mxu1 %vm1866_vm10, %v2447_v45  ;;  %v1868_v46 = vsel %vm1866_vm10, %v2447_v45, 0 }
 0xc2f   : > { %v962_v9 = vpop.permute.xlu0 %961  ;;  %v960_v63 = vpop.permute.xlu1 %959  ;;  %v1719_v21 = vpack.c.bf16 %v1717_v17, %v1716_v19 }
 0xc30   : > { %972 = vst.msk [vmem:[#allocation2 + $0x8] sm:$0xf] %vm969_vm6, %v962_v9  ;;  %971 = vst.msk [vmem:[#allocation2 + $0x4] sm:$0xf] %vm969_vm6, %v960_v63  ;;  %v1718_v20 = vpack.c.bf16 %v1715_v5, %v1714_v18 }
 0xc32   : > { %2382 = vmatprep.mubr.msk.bf16.mxu1 %vm431_vm3, %v1718_v20 }
 0xc33   : > { %v1167_v22 = vpop.permute.xlu0 %1166  ;;  %2383 = vmatmul.mubr.msk.bf16.vlgmr.msra.gmra.mxu1 %vm431_vm3, %v1719_v21  ;;  %v964_v24 = vpop.permute.xlu1 %963 }
 0xc34   : > { %1179 = vst.msk [vmem:[#allocation2] sm:$0xf] %vm1178_vm7, %v1167_v22  ;;  %2387 = vmatpush3.bf16.msra.mxu1 %v1868_v46 }
 0xc35   : > { %973 = vst.msk [vmem:[#allocation2 + $0xc] sm:$0xf] %vm969_vm6, %v964_v24  ;;  %2388 = vmatprep.subr.bf16.mxu1 %v2448_v51 }
 0xc37   : > { %v1171_v23 = vpop.permute.xlu0 %1170  ;;  %v1169_v26 = vpop.permute.xlu1 %1168 }
 0xc38   : > { %1181 = vst.msk [vmem:[#allocation2 + $0x8] sm:$0xf] %vm1178_vm7, %v1171_v23  ;;  %1180 = vst.msk [vmem:[#allocation2 + $0x4] sm:$0xf] %vm1178_vm7, %v1169_v26  ;;  %2389 = vmatpush3.bf16.msra.mxu1 %v2448_v51 }
 0xc39   : > { %2390 = vmatprep.subr.bf16.mxu1 %v2449_v53 }
 0xc3b   : > { %v1376_v27 = vpop.permute.xlu0 %1375  ;;  %v1173_v25 = vpop.permute.xlu1 %1172 }
 0xc3c   : > { %1388 = vst.msk [vmem:[#allocation2] sm:$0xf] %vm1387_vm8, %v1376_v27  ;;  %2391 = vmatpush3.bf16.msra.mxu1 %v2449_v53 }
 0xc3d   : > { %1182 = vst.msk [vmem:[#allocation2 + $0xc] sm:$0xf] %vm1178_vm7, %v1173_v25  ;;  %2392 = vmatprep.subr.bf16.mxu1 %v2450_v54 }
 0xc3f   : > { %v1380_v15 = vpop.permute.xlu0 %1379  ;;  %v1378_v28 = vpop.permute.xlu1 %1377 }
 0xc40   : > { %1390 = vst.msk [vmem:[#allocation2 + $0x8] sm:$0xf] %vm1387_vm8, %v1380_v15  ;;  %1389 = vst.msk [vmem:[#allocation2 + $0x4] sm:$0xf] %vm1387_vm8, %v1378_v28  ;;  %2393 = vmatpush3.bf16.msra.mxu1 %v2450_v54 }
 0xc43   : > { %v1585_v30 = vpop.permute.xlu0 %1584  ;;  %v1382_v29 = vpop.permute.xlu1 %1381 }
 0xc44   : > { %1597 = vst.msk [vmem:[#allocation2] sm:$0xf] %vm1596_vm9, %v1585_v30 }
 0xc45   : > { %1391 = vst.msk [vmem:[#allocation2 + $0xc] sm:$0xf] %vm1387_vm8, %v1382_v29 }
 0xc47   : > { %v1589_v31 = vpop.permute.xlu0 %1588  ;;  %v1587_v32 = vpop.permute.xlu1 %1586 }
 0xc48   : > { %1599 = vst.msk [vmem:[#allocation2 + $0x8] sm:$0xf] %vm1596_vm9, %v1589_v31  ;;  %1598 = vst.msk [vmem:[#allocation2 + $0x4] sm:$0xf] %vm1596_vm9, %v1587_v32 }
 0xc4b   : > { %v1591_v34 = vpop.permute.xlu1 %1590 }
 0xc4c   : > { %1600 = vst.msk [vmem:[#allocation2 + $0xc] sm:$0xf] %vm1596_vm9, %v1591_v34 }
 0xcf3   : > { %v2384_v41 = vpop.f32.mrf.mxu1 }
 0xcf4   : > { %v2210_v62 = vpack.c.bf16 %v2384_v41, %v2384_v41 }
 0xcf5   : > { %v1766_v55 = vpop.f32.mrf.mxu1 }
 0xcf6   : > { %v2208_v56 = vpack.c.bf16 %v1766_v55, %v1766_v55 }
 0xcf7   : > { %v2385_v33 = vpop.f32.mrf.mxu1 }
 0xcf8   : > { %1793 = vrot.lane.b32.xlu0 %v2208_v56, %s2598_s17  ;;  %v2211_v52 = vpack.c.bf16 %v2385_v33, %v2385_v33 }
 0xcf9   : > { %v1769_v57 = vpop.f32.mrf.mxu1 }
 0xcfa   : > { %v2209_v0 = vpack.c.bf16 %v1769_v57, %v1769_v57 }
 0xcfc   : > { %1797 = vrot.lane.b32.xlu0 %v2210_v62, %s2598_s17  ;;  %1795 = vrot.lane.b32.xlu1 %v2209_v0, %s2598_s17  ;;  %v2178_v0 = vld [vmem:[%s3139_s4 + $0x1] ss:$0 sm:$0xff] }
 0xd00   : > { %1799 = vrot.lane.b32.xlu1 %v2211_v52, %s2598_s17 }
 0xd6a   : > { %v1794_v37 = vpop.permute.xlu0 %1793 }
 0xd6b   : > { %1806 = vst.msk [vmem:[#allocation2] sm:$0xf] %vm1805_vm11, %v1794_v37 }
 0xd6e   : > { %v1798_v36 = vpop.permute.xlu0 %1797  ;;  %v1796_v38 = vpop.permute.xlu1 %1795 }
 0xd6f   : > { %1808 = vst.msk [vmem:[#allocation2 + $0x8] sm:$0xf] %vm1805_vm11, %v1798_v36  ;;  %1807 = vst.msk [vmem:[#allocation2 + $0x4] sm:$0xf] %vm1805_vm11, %v1796_v38 }
 0xd72   : > { %v1800_v35 = vpop.permute.xlu1 %1799 }
 0xd73   : > { %1809 = vst.msk [vmem:[#allocation2 + $0xc] sm:$0xf] %vm1805_vm11, %v1800_v35 }
 0xd76   : > { %v2451_v39 = vld [vmem:[#allocation2] sm:$0xff]  }
 0xd77   : > { %2394 = vmatprep.mubr.msk.bf16.mxu1 %vm1859_vm12, %v2451_v39 }
 0xd7a   : > { %v2452_v42 = vld [vmem:[#allocation2 + $0x8] sm:$0xff]  }
 0xd7b   : > { %2395 = vmatmul.mubr.msk.bf16.vlgmr.msra.gmra.mxu1 %vm1859_vm12, %v2452_v42  ;;  %v2179_v42 = vld [vmem:[%s3139_s4 + $0x2] ss:$0 sm:$0xff] }
 0xe3b   : > { %v2396_v40 = vpop.f32.mrf.mxu1 }
 0xe3c   : > { %v1913_v48 = vadd.f32 %v2396_v40, %v2169_v43 }
 0xe3d   : > { %v1904_v44 = vpop.f32.mrf.mxu1 }
 0xe3e   : > { %v1905_v47 = vadd.f32 %v2169_v43, %v1904_v44  ;;  %v1921_v61 = vadd.f32 %v2584_v58, %v1913_v48 }
 0xe3f   : > { %v2397_v49 = vpop.f32.mrf.mxu1 }
 0xe40   : > { %v1919_v60 = vadd.f32 %v2583_v50, %v1905_v47  ;;  %v1916_v1 = vadd.f32 %v2397_v49, %v2169_v43  ;;  %v1929_v11 = vsel %vm286_vm1, %v1921_v61, 0.0 }
 0xe41   : > { %v1907_v59 = vpop.f32.mrf.mxu1 }
 0xe42   : > { %v1908_v2 = vadd.f32 %v2169_v43, %v1907_v59  ;;  %v1923_v3 = vsel %vm286_vm1, %v1919_v60, 0.0  ;;  %v1922_v8 = vadd.f32 %v2586_v7, %v1916_v1 }
 0xe43   : > { %1924 = vadd.xlane.f32.xlu0 %v1923_v3 }
 0xe44   : > { %v1920_v6 = vadd.f32 %v2585_v4, %v1908_v2  ;;  %v1932_v12 = vsel %vm286_vm1, %v1922_v8, 0.0 }
 0xe46   : > { %v1926_v10 = vsel %vm286_vm1, %v1920_v6, 0.0 }
 0xe47   : > { %1927 = vadd.xlane.f32.xlu1 %v1926_v10  ;;  %1930 = vadd.xlane.f32.xlu0 %v1929_v11 }
 0xe4b   : > { %1933 = vadd.xlane.f32.xlu0 %v1932_v12 }
 0xecc   : > { %v1925_v13 = vpop.xlane.xlu0 %1924 }
 0xecd   : > { %v1936_v14 = vmul.f32 0.020408163, %v1925_v13 }
 0xecf   : > { %v1940_v16 = vsub.f32 %v1919_v60, %v1936_v14 }
 0xed0   : > { %v1928_v17 = vpop.xlane.xlu1 %1927  ;;  %v1931_v18 = vpop.xlane.xlu0 %1930 }
 0xed1   : > { %v1937_v5 = vmul.f32 0.020408163, %v1928_v17  ;;  %v1938_v9 = vmul.f32 0.020408163, %v1931_v18  ;;  %v1944_v63 = vmul.f32 %v1940_v16, %v1940_v16 }
 0xed3   : > { %v1941_v19 = vsub.f32 %v1920_v6, %v1937_v5  ;;  %v1942_v20 = vsub.f32 %v1921_v61, %v1938_v9  ;;  %v1948_v21 = vsel %vm286_vm1, %v1944_v63, 0.0 }
 0xed4   : > { %1949 = vadd.xlane.f32.xlu1 %v1948_v21  ;;  %v1934_v22 = vpop.xlane.xlu0 %1933 }
 0xed5   : > { %v1939_v24 = vmul.f32 0.020408163, %v1934_v22  ;;  %v1945_v23 = vmul.f32 %v1941_v19, %v1941_v19  ;;  %v1946_v26 = vmul.f32 %v1942_v20, %v1942_v20 }
 0xed7   : > { %v1943_v27 = vsub.f32 %v1922_v8, %v1939_v24  ;;  %v1951_v25 = vsel %vm286_vm1, %v1945_v23, 0.0  ;;  %v1954_v15 = vsel %vm286_vm1, %v1946_v26, 0.0 }
 0xed8   : > { %1952 = vadd.xlane.f32.xlu0 %v1951_v25  ;;  %1955 = vadd.xlane.f32.xlu1 %v1954_v15 }
 0xed9   : > { %v1947_v28 = vmul.f32 %v1943_v27, %v1943_v27 }
 0xedb   : > { %v1957_v30 = vsel %vm286_vm1, %v1947_v28, 0.0 }
 0xedc   : > { %1958 = vadd.xlane.f32.xlu0 %v1957_v30 }
 0xf5d   : > { %v1950_v29 = vpop.xlane.xlu1 %1949 }
 0xf5e   : > { %v1960_v31 = vmul.f32 0.020408163, %v1950_v29 }
 0xf60   : > { %v1964_v32 = vadd.f32 1e-12, %v1960_v31 }
 0xf61   : > { %v1956_v34 = vpop.xlane.xlu1 %1955  ;;  %v1953_v45 = vpop.xlane.xlu0 %1952 }
 0xf62   : > { %2565 = vrsqrt.f32 %v1964_v32  ;;  %v1962_v46 = vmul.f32 0.020408163, %v1956_v34  ;;  %v1961_v51 = vmul.f32 0.020408163, %v1953_v45 }
 0xf64   : > { %v1966_v41 = vadd.f32 1e-12, %v1962_v46  ;;  %v1965_v53 = vadd.f32 1e-12, %v1961_v51 }
 0xf65   : > { %v1959_v54 = vpop.xlane.xlu0 %1958 }
 0xf66   : > { %2567 = vrsqrt.f32 %v1966_v41  ;;  %v1963_v55 = vmul.f32 0.020408163, %v1959_v54 }
 0xf67   : > { %2569 = vrsqrt.f32 %v1965_v53 }
 0xf68   : > { %v1967_v56 = vadd.f32 1e-12, %v1963_v55 }
 0xf6a   : > { %2571 = vrsqrt.f32 %v1967_v56 }
 0xf6f   : > { %v2566_v33 = vpop.eup %2565 }
 0xf70   : > { %v1972_v57 = vmul.f32 %v2566_v33, %v1940_v16 }
 0xf72   : > { %v1980_v38 = vmul.f32 %v2178_v0, %v1972_v57 }
 0xf73   : > { %v2568_v62 = vpop.eup %2567 }
 0xf74   : > { %v2570_v52 = vpop.eup %2569  ;;  %v1974_v37 = vmul.f32 %v2568_v62, %v1942_v20  ;;  %v1988_v48 = vadd.f32 %v2179_v42, %v1980_v38 }
 0xf75   : > { %v1973_v36 = vmul.f32 %v2570_v52, %v1941_v19 }
 0xf76   : > { %v1982_v35 = vmul.f32 %v2178_v0, %v1974_v37  ;;  %v1992_v59 = vsel %vm286_vm1, %v1988_v48, -inf }
 0xf77   : > { %v2572_v39 = vpop.eup %2571  ;;  %v1981_v40 = vmul.f32 %v2178_v0, %v1973_v36 }
 0xf78   : > { %v1975_v43 = vmul.f32 %v2572_v39, %v1943_v27  ;;  %v1990_v47 = vadd.f32 %v2179_v42, %v1982_v35 }
 0xf79   : > { %v1989_v44 = vadd.f32 %v2179_v42, %v1981_v40 }
 0xf7a   : > { %v1983_v49 = vmul.f32 %v2178_v0, %v1975_v43  ;;  %v1994_v58 = vsel %vm286_vm1, %v1990_v47, -inf }
 0xf7b   : > { %v1993_v50 = vsel %vm286_vm1, %v1989_v44, -inf }
 0xf7c   : > { %v1991_v60 = vadd.f32 %v2179_v42, %v1983_v49  ;;  %v1996_v1 = vmax.f32 %v1992_v59, %v1993_v50 }
 0xf7e   : > { %v1995_v61 = vsel %vm286_vm1, %v1991_v60, -inf }
 0xf7f   : > { %v1997_v2 = vmax.f32 %v1994_v58, %v1995_v61 }
 0xf81   : > { %v1998_v3 = vmax.f32 %v1996_v1, %v1997_v2 }
 0xf83   : > { %v1999_v4 = vrot.slane %v1998_v3, 4 }
 0xf85   : > { %v2000_v6 = vmax.f32 %v1998_v3, %v1999_v4 }
 0xf87   : > { %v2001_v7 = vrot.slane %v2000_v6, 2 }
 0xf89   : > { %v2002_v8 = vmax.f32 %v2000_v6, %v2001_v7 }
 0xf8b   : > { %v2003_v10 = vrot.slane %v2002_v8, 1 }
 0xf8d   : > { %v2004_v11 = vmax.f32 %v2002_v8, %v2003_v10 }
 0xf8f   : > { %v2005_v12 = vsub.f32 %v1988_v48, %v2004_v11  ;;  %v2006_v13 = vsub.f32 %v1989_v44, %v2004_v11  ;;  %v2007_v14 = vsub.f32 %v1990_v47, %v2004_v11  ;;  %v2008_v16 = vsub.f32 %v1991_v60, %v2004_v11 }
 0xf91   : > { %v2009_v17 = vmul.f32 1.442695, %v2005_v12  ;;  %v2011_v18 = vmul.f32 1.442695, %v2006_v13  ;;  %v2013_v5 = vmul.f32 1.442695, %v2007_v14 }
 0xf92   : > { %v2015_v9 = vmul.f32 1.442695, %v2008_v16 }
 0xf93   : > { %2573 = vpow2.f32 %v2009_v17 }
 0xf94   : > { %2575 = vpow2.f32 %v2011_v18 }
 0xf95   : > { %2577 = vpow2.f32 %v2013_v5 }
 0xf96   : > { %2579 = vpow2.f32 %v2015_v9 }
 0xfa0   : > { %v2574_v63 = vpop.eup %2573 }
 0xfa1   : > { %v2576_v19 = vpop.eup %2575  ;;  %v2017_v20 = vsel %vm286_vm1, %v2574_v63, 0.0 }
 0xfa2   : > { %v2578_v21 = vpop.eup %2577  ;;  %v2018_v22 = vsel %vm286_vm1, %v2576_v19, 0.0 }
 0xfa3   : > { %v2580_v24 = vpop.eup %2579  ;;  %v2019_v23 = vadd.f32 %v2018_v22, %v2017_v20  ;;  %v2020_v26 = vsel %vm286_vm1, %v2578_v21, 0.0 }
 0xfa4   : > { %v2022_v25 = vsel %vm286_vm1, %v2580_v24, 0.0 }
 0xfa5   : > { %v2021_v27 = vadd.f32 %v2020_v26, %v2019_v23 }
 0xfa7   : > { %v2023_v15 = vadd.f32 %v2022_v25, %v2021_v27 }
 0xfa9   : > { %v2024_v28 = vrot.slane %v2023_v15, 4 }
 0xfab   : > { %v2025_v30 = vadd.f32 %v2024_v28, %v2023_v15 }
 0xfad   : > { %v2026_v29 = vrot.slane %v2025_v30, 2 }
 0xfaf   : > { %v2027_v31 = vadd.f32 %v2026_v29, %v2025_v30 }
 0xfb1   : > { %v2028_v32 = vrot.slane %v2027_v31, 1 }
 0xfb3   : > { %v2029_v34 = vadd.f32 %v2028_v32, %v2027_v31 }
 0xfb5   : > { %2581 = vrcp.f32 %v2029_v34 }
 0xfc2   : > { %v2582_v45 = vpop.eup %2581 }
 0xfc3   : > { %v2031_v46 = vmul.f32 %v2582_v45, %v2574_v63  ;;  %v2032_v51 = vmul.f32 %v2582_v45, %v2576_v19  ;;  %v2033_v41 = vmul.f32 %v2582_v45, %v2578_v21  ;;  %v2034_v53 = vmul.f32 %v2582_v45, %v2580_v24 }
 0xfc5   : > { %2035 = vst.msk [vmem:[%s224_s25] sm:$0xff] %vm286_vm1, %v2031_v46  ;;  %2036 = vst.msk [vmem:[%s224_s25 + $0x8] sm:$0xff] %vm286_vm1, %v2032_v51 }
 0xfc6   : > { %2037 = vst.msk [vmem:[%s224_s25 + $0x10] sm:$0xff] %vm286_vm1, %v2033_v41  ;;  %2038 = vst.msk [vmem:[%s224_s25 + $0x18] sm:$0xff] %vm286_vm1, %v2034_v53 }
 0xfc7 PF: > { %s15_s18 = sadd.s32 1, %s2593_s18  }
 0xfc8   : > { %p12_p4 = scmp.ge.s32.totalorder %s15_s18, 4  }
 0xfca   :  { %14 = sbr.rel (!%p12_p4) target bundleno = 1 (0x1), region = 70 }

// kernel: cnn_sasm_forward.3
= control target key start
LH: loop header
LB: loop body
LE: loop exit
PB: predicated region body
PF: predicated region fallthrough
CT: control target
= control target key end

     0   :  { %s4437_s18 = smov 0   ;;  %s5519_s0 = inlined_call_operand.vmem [shape: f32[2,49,32], index: 0, kind: input, shape index: {}]   ;;  %s5520_s1 = inlined_call_operand.vmem [shape: bf16[32,192], index: 1, kind: input, shape index: {}]   ;;  %s5521_s2 = inlined_call_operand.vmem [shape: f32[1,192], index: 2, kind: input, shape index: {}]   ;;  %s5522_s3 = inlined_call_operand.vmem [shape: bf16[64,32], index: 3, kind: input, shape index: {}]   ;;  %s5523_s4 = inlined_call_operand.vmem [shape: f32[3,32], index: 4, kind: input, shape index: {}]   ;;  %s5524_s5 = inlined_call_operand.vmem [shape: f32[2,49,32], index: 5, kind: output, shape index: {}]  }
   0x1 LB: > { %s3435_s19 = sadd.s32 4294967295, %s4389_s18   ;;  %p3439_p0 = scmp.ge.s32.totalorder %s4389_s18, 1  ;;  %s4389_s18 = sphi %s4437_s18, %s15_s18  }
   0x2   : > { %p187_p1 = scmp.lt.s32.totalorder %s4389_s18, 3 }
   0x4   : > { %p188_p2 = pnand %p3439_p0, %p187_p1 }
   0x6   : > { %191 = sbr.rel (%p188_p2) target bundleno = 5441 (0x1541), region = 40 }
   0xb   : > { %v4108_v0 = vld [vmem:[%s5520_s1 + $0x14] ss:$8 sps:$4 sm:$0xff]   ;;  %v4110_v1 = vld [vmem:[%s5520_s1 + $0x10] ss:$8 sps:$4 sm:$0xff]   ;;  %v4391_v2 = vmov 0   ;;  %p215_p3 = scmp.lt.s32.totalorder %s3435_s19, 1  ;;  %v243_v16 = vlaneseq }
   0xc   : > { %318 = vmatprep.mubr.bf16.mxu0 %v4391_v2  ;;  %298 = vmatprep.subr.bf16.mxu0 %v4108_v0  ;;  %v4111_v3 = vld [vmem:[%s5520_s1 + $0x4] ss:$8 sps:$4 sm:$0xff]   ;;  %v4113_v4 = vld [vmem:[%s5520_s1] ss:$8 sps:$4 sm:$0xff]   ;;  %vm273_vm0 = vcmask 261120   ;;  %vm377_vm1 = vcmask 64512  }
   0xd   : > { %299 = vmatpush1.bf16.msra.mxu0 %v4110_v1  ;;  %s5538_s19 = smov (!%p215_p3, %s3435_s19), 1  ;;  %v244_v17 = vshrl.u32 %v243_v16, 7  ;;  %v241_v19 = vld [vmem:[%s5521_s2] sm:$0x3]  ;;  %s4392_s9 = smov 64   ;;  %vm568_vm2 = vcmask 1040384  }
   0xe   : > { %300 = vmatprep.subr.bf16.mxu0 %v4111_v3  ;;  %s4083_s28 = smul.u32 56, %s5538_s19  ;;  %s4393_s10 = smov 56   ;;  %v4502_v49 = vsel %vm568_vm2, 65535, %v4391_v2  ;;  %vm473_vm3 = vcmask 400384   ;;  %vm492_vm4 = vcmask 393216   ;;  %vm667_vm5 = vcmask 60416  }
   0xf   : > { %v245_v18 = vsub.s32 0, %v244_v17  ;;  %v249_v38 = vsub.s32 1, %v244_v17  ;;  %s4394_s11 = smov 120   ;;  %s4395_s12 = smov 48   ;;  %vm674_vm6 = vcmask 57344   ;;  %vm1016_vm9 = vcmask 122944  }
  0x10   : > { %s4466_s6 = scalar_lea.vmem %s5519_s0, %s4083_s28  ;;  %s4396_s13 = smov 112   ;;  %vm675_vm7 = vsmask.f32 256  ;;  %vm1009_vm11 = vcmask 126016   ;;  %vm1346_vm12 = vcmask 191616   ;;  %vm1683_vm13 = vcmask 257216  }
  0x11   : > { %301 = vmatpush1.bf16.msra.mxu0 %v4113_v4  ;;  %v226_v5 = vld [vmem:[%s4466_s6] sm:$0xff]  ;;  %v227_v6 = vld [vmem:[%s4466_s6 + $0x8] sm:$0xff]  ;;  %v228_v8 = vld [vmem:[%s4466_s6 + $0x10] sm:$0xff]  ;;  %v246_v21 = vrot.slane %v241_v19, %v245_v18  ;;  %v250_v44 = vrot.slane %v241_v19, %v249_v38  ;;  %s4397_s14 = smov 40   ;;  %s4398_s15 = smov 104   ;;  %vm2020_vm14 = vcmask 322816  }
  0x12   : > { %v233_v7 = vpack.c.bf16 %v227_v6, %v226_v5  ;;  %v229_v9 = vld [vmem:[%s4466_s6 + $0x18] sm:$0xff]  ;;  %v230_v11 = vld [vmem:[%s4466_s6 + $0x20] sm:$0xff]  ;;  %v231_v12 = vld [vmem:[%s4466_s6 + $0x28] sm:$0xff]  ;;  %s4399_s16 = smov 32   ;;  %s4400_s17 = smov 96   ;;  %vm2357_vm15 = vcmask 388416  }
  0x13   : > { %v234_v10 = vpack.c.bf16 %v229_v9, %v228_v8  ;;  %v235_v13 = vpack.c.bf16 %v231_v12, %v230_v11  ;;  %v232_v14 = vld [vmem:[%s4466_s6 + $0x30] sm:$0x1]  ;;  %vm676_vm8 = vmand %vm674_vm6, %vm675_vm7  ;;  %s4401_s20 = smov 24   ;;  %s4402_s21 = smov 88  }
  0x14   : > { %3446 = vmatmul.mubr.msk.bf16.vlgmr.msra.gmra.mxu0 %vm273_vm0, %v233_v7  ;;  %v236_v15 = vpack.c.bf16 %v232_v14, %v232_v14  ;;  %s4403_s22 = smov 16   ;;  %s4404_s23 = smov 80   ;;  %vm1017_vm10 = vmand %vm1016_vm9, %vm675_vm7 }
  0x15   : > { %328 = vmatprep.mubr.bf16.mxu0 %v4391_v2  ;;  %s4405_s24 = smov 8   ;;  %s4406_s25 = smov 72  }
  0x1c   : > { %3447 = vmatmul.mubr.msk.bf16.gmra.mxu0 %vm273_vm0, %v234_v10 }
  0x1d   : > { %338 = vmatprep.mubr.bf16.mxu0 %v4391_v2 }
  0x24   : > { %3448 = vmatmul.mubr.msk.bf16.gmra.mxu0 %vm273_vm0, %v235_v13 }
  0x25   : > { %348 = vmatprep.mubr.bf16.mxu0 %v4391_v2 }
  0x2c   : > { %3449 = vmatmul.mubr.msk.bf16.gmra.mxu0 %vm273_vm0, %v236_v15 }
  0xd4   : > { %v320_v20 = vpop.f32.mrf.mxu0 }
  0xd5   : > { %v321_v24 = vadd.f32 %v320_v20, %v246_v21 }
  0xd6   : > { %v322_v22 = vpop.f32.mrf.mxu0 }
  0xd7   : > { %v323_v61 = vadd.f32 %v322_v22, %v250_v44 }
  0xd8   : > { %v324_v23 = vpop.f32.mrf.mxu0 }
  0xd9   : > { %v325_v25 = vadd.f32 %v324_v23, %v246_v21 }
  0xda   : > { %v326_v26 = vpop.f32.mrf.mxu0 }
  0xdb   : > { %v4485_v27 = vpack.c.bf16 %v325_v25, %v321_v24  ;;  %v327_v59 = vadd.f32 %v326_v26, %v250_v44 }
  0xdc   : > { %v330_v28 = vpop.f32.mrf.mxu0 }
  0xdd   : > { %3787 = vmatprep.mubr.msk.bf16.mxu1 %vm377_vm1, %v4485_v27  ;;  %v331_v31 = vadd.f32 %v330_v28, %v246_v21  ;;  %v4527_v62 = vpack.c.bf16 %v327_v59, %v323_v61 }
  0xde   : > { %v332_v29 = vpop.f32.mrf.mxu0 }
  0xdf   : > { %v333_v58 = vadd.f32 %v332_v29, %v250_v44 }
  0xe0   : > { %v334_v30 = vpop.f32.mrf.mxu0 }
  0xe1   : > { %v335_v32 = vadd.f32 %v334_v30, %v246_v21 }
  0xe2   : > { %v336_v33 = vpop.f32.mrf.mxu0 }
  0xe3   : > { %v4489_v34 = vpack.c.bf16 %v335_v32, %v331_v31  ;;  %v337_v56 = vadd.f32 %v336_v33, %v250_v44 }
  0xe4   : > { %v340_v35 = vpop.f32.mrf.mxu0 }
  0xe5   : > { %371 = vrot.lane.b32.xlu1 %v4489_v34, %s4392_s9  ;;  %v341_v39 = vadd.f32 %v340_v35, %v246_v21  ;;  %v4519_v60 = vpack.c.bf16 %v337_v56, %v333_v58 }
  0xe6   : > { %v342_v36 = vpop.f32.mrf.mxu0 }
  0xe7   : > { %v343_v54 = vadd.f32 %v342_v36, %v250_v44 }
  0xe8   : > { %v344_v37 = vpop.f32.mrf.mxu0 }
  0xe9   : > { %v345_v40 = vadd.f32 %v344_v37, %v246_v21  ;;  %369 = vrot.lane.b32.xlu1 %v4485_v27, %s4392_s9 }
  0xea   : > { %v346_v41 = vpop.f32.mrf.mxu0 }
  0xeb   : > { %v4495_v42 = vpack.c.bf16 %v345_v40, %v341_v39  ;;  %v347_v51 = vadd.f32 %v346_v41, %v250_v44 }
  0xec   : > { %v350_v43 = vpop.f32.mrf.mxu0 }
  0xed   : > { %v351_v45 = vadd.f32 %v350_v43, %v246_v21  ;;  %692 = vrot.lane.b32.xlu1 %v4495_v42, %s4393_s10  ;;  %v4512_v57 = vpack.c.bf16 %v347_v51, %v343_v54 }
  0xee   : > { %v352_v46 = vpop.f32.mrf.mxu0 }
  0xef   : > { %v4499_v47 = vpack.c.bf16 %v351_v45, %v351_v45  ;;  %v353_v48 = vadd.f32 %v352_v46, %v250_v44 }
  0xf0   : > { %v354_v50 = vpop.f32.mrf.mxu0 }
  0xf1   : > { %v4504_v52 = vpack.c.bf16 %v353_v48, %v353_v48  ;;  %375 = vrot.lane.b32.xlu0 %v4499_v47, %s4392_s9  ;;  %688 = vrot.lane.b32.xlu1 %v4485_v27, %s4393_s10 }
  0xf2   : > { %v355_v53 = vpop.f32.mrf.mxu0 }
  0xf3   : > { %v572_v55 = vand.u32 %v4502_v49, %v4504_v52 }
  0xf5   : > { %3795 = vmatprep.subr.bf16.mxu0 %v572_v55  ;;  %373 = vrot.lane.b32.xlu0 %v4495_v42, %s4392_s9 }
  0xf6   : > { %682 = vrot.lane.b32.xlu1 %v4489_v34, %s4394_s11  ;;  %3796 = vmatpush3.bf16.msra.mxu0 %v572_v55 }
  0xf7   : > { %3797 = vmatprep.subr.bf16.mxu0 %v4512_v57 }
  0xf9   : > { %694 = vrot.lane.b32.xlu0 %v4499_v47, %s4393_s10 }
  0xfa   : > { %686 = vrot.lane.b32.xlu1 %v4499_v47, %s4394_s11  ;;  %3798 = vmatpush3.bf16.msra.mxu0 %v4512_v57 }
  0xfb   : > { %3799 = vmatprep.subr.bf16.mxu0 %v4519_v60 }
  0xfd   : > { %690 = vrot.lane.b32.xlu0 %v4489_v34, %s4393_s10 }
  0xfe   : > { %3800 = vmatpush3.bf16.msra.mxu0 %v4519_v60 }
  0xff   : > { %3801 = vmatprep.subr.bf16.mxu0 %v4527_v62 }
 0x101   : > { %680 = vrot.lane.b32.xlu0 %v4485_v27, %s4394_s11 }
 0x102   : > { %3802 = vmatpush3.bf16.msra.mxu0 %v4527_v62 }
 0x105   : > { %684 = vrot.lane.b32.xlu0 %v4495_v42, %s4394_s11 }
 0x157   : > { %v372_v3 = vpop.permute.xlu1 %371 }
 0x158   : > { %v394_v4 = vsel %vm377_vm1, %v372_v3, 0 }
 0x15b   : > { %v370_v5 = vpop.permute.xlu1 %369 }
 0x15c   : > { %v391_v6 = vsel %vm377_vm1, %v370_v5, 0 }
 0x15f   : > { %v693_v9 = vpop.permute.xlu1 %692 }
 0x160   : > { %v715_v12 = vsel %vm377_vm1, %v693_v9, 0 }
 0x163   : > { %v376_v63 = vpop.permute.xlu0 %375  ;;  %v689_v14 = vpop.permute.xlu1 %688 }
 0x164   : > { %4051 = vmatprep.subr.msk.bf16.mxu1 %vm377_vm1, %v376_v63  ;;  %v400_v0 = vsel %vm377_vm1, %v376_v63, 0  ;;  %v709_v15 = vsel %vm377_vm1, %v689_v14, 0 }
 0x165   : > { %3780 = vmatpush3.bf16.xpose.msra.mxu1 %v400_v0 }
 0x167   : > { %v374_v1 = vpop.permute.xlu0 %373 }
 0x168   : > { %4052 = vmatprep.subr.msk.bf16.mxu1 %vm377_vm1, %v374_v1  ;;  %v397_v2 = vsel %vm377_vm1, %v374_v1, 0  ;;  %v683_v16 = vpop.permute.xlu1 %682 }
 0x16b   : > { %v695_v7 = vpop.permute.xlu0 %694 }
 0x16c   : > { %v718_v8 = vsel %vm377_vm1, %v695_v7, 0  ;;  %v687_v18 = vpop.permute.xlu1 %686 }
 0x16d   : > { %3782 = vmatpush3.bf16.xpose.msra.mxu1 %v397_v2 }
 0x16e   : > { %4053 = vmatprep.subr.msk.bf16.mxu1 %vm377_vm1, %v372_v3 }
 0x16f   : > { %v691_v10 = vpop.permute.xlu0 %690 }
 0x170   : > { %v712_v13 = vsel %vm377_vm1, %v691_v10, 0 }
 0x173   : > { %v681_v11 = vpop.permute.xlu0 %680 }
 0x175   : > { %3784 = vmatpush3.bf16.xpose.msra.mxu1 %v394_v4 }
 0x176   : > { %4054 = vmatprep.subr.msk.bf16.mxu1 %vm377_vm1, %v370_v5 }
 0x177   : > { %v685_v17 = vpop.permute.xlu0 %684 }
 0x17d   : > { %3786 = vmatpush3.bf16.xpose.msra.mxu1 %v391_v6 }
 0x17e   : > { %4055 = vmatprep.subr.msk.bf16.mxu1 %vm377_vm1, %v695_v7 }
 0x184   : > { %3788 = vmatmul.mubr.msk.bf16.vlgmr.msra.gmra.mxu1 %vm377_vm1, %v4489_v34 }
 0x185   : > { %3791 = vmatprep.mubr.msk.bf16.mxu1 %vm377_vm1, %v4495_v42  ;;  %3812 = vmatpush3.bf16.xpose.msra.mxu1 %v718_v8 }
 0x186   : > { %4056 = vmatprep.subr.msk.bf16.mxu1 %vm377_vm1, %v693_v9 }
 0x18c   : > { %3792 = vmatmul.mubr.msk.bf16.gmra.mxu1 %vm377_vm1, %v4499_v47 }
 0x18d   : > { %3814 = vmatpush3.bf16.xpose.msra.mxu1 %v715_v12  ;;  %3819 = vmatprep.mubr.msk.bf16.mxu1 %vm377_vm1, %v681_v11 }
 0x18e   : > { %4057 = vmatprep.subr.msk.bf16.mxu1 %vm377_vm1, %v691_v10 }
 0x195   : > { %3816 = vmatpush3.bf16.xpose.msra.mxu1 %v712_v13 }
 0x196   : > { %4058 = vmatprep.subr.msk.bf16.mxu1 %vm377_vm1, %v689_v14 }
 0x19d   : > { %3818 = vmatpush3.bf16.xpose.msra.mxu1 %v709_v15 }
 0x1a4   : > { %3820 = vmatmul.mubr.msk.bf16.vlgmr.msra.gmra.mxu1 %vm377_vm1, %v683_v16 }
 0x1a5   : > { %3823 = vmatprep.mubr.msk.bf16.mxu1 %vm377_vm1, %v685_v17 }
 0x1ac   : > { %3824 = vmatmul.mubr.msk.bf16.gmra.mxu1 %vm377_vm1, %v687_v18 }
 0x244   : > { %v3789_v19 = vpop.f32.mrf.mxu1 }
 0x245   : > { %v4564_v20 = vmul.f32 0.5, %v3789_v19 }
 0x246   : > { %v436_v21 = vpop.f32.mrf.mxu1 }
 0x247   : > { %v4566_v22 = vmul.f32 0.5, %v436_v21  ;;  %v480_v23 = vsel %vm473_vm3, %v4564_v20, -inf }
 0x248   : > { %481 = vmax.xlane.f32.xlu0 %v480_v23  ;;  %v3790_v24 = vpop.f32.mrf.mxu1 }
 0x249   : > { %v4570_v26 = vmul.f32 0.5, %v3790_v24  ;;  %v474_v29 = vsel %vm473_vm3, %v4566_v22, -inf }
 0x24a   : > { %v439_v25 = vpop.f32.mrf.mxu1 }
 0x24b   : > { %v4572_v28 = vmul.f32 0.5, %v439_v25  ;;  %v483_v35 = vsel %vm473_vm3, %v4570_v26, -inf }
 0x24c   : > { %475 = vmax.xlane.f32.xlu0 %v474_v29  ;;  %v3793_v30 = vpop.f32.mrf.mxu1 }
 0x24d   : > { %v4576_v31 = vmul.f32 0.5, %v3793_v30  ;;  %v477_v32 = vsel %vm473_vm3, %v4572_v28, -inf }
 0x24e   : > { %478 = vmax.xlane.f32.xlu1 %v477_v32  ;;  %v452_v33 = vpop.f32.mrf.mxu1 }
 0x24f   : > { %v4582_v37 = vmul.f32 0.5, %v452_v33  ;;  %v493_v38 = vsel %vm492_vm4, %v4576_v31, -inf }
 0x250   : > { %484 = vmax.xlane.f32.xlu0 %v483_v35  ;;  %v3794_v36 = vpop.f32.mrf.mxu1 }
 0x251   : > { %v486_v41 = vsel %vm473_vm3, %v4582_v37, -inf }
 0x252   : > { %494 = vmax.xlane.f32.xlu1 %v493_v38  ;;  %v455_v39 = vpop.f32.mrf.mxu1 }
 0x253   : > { %v471_v40 = vmul.f32 0.5, %v455_v39 }
 0x255   : > { %v489_v43 = vsel %vm473_vm3, %v471_v40, -inf }
 0x256   : > { %487 = vmax.xlane.f32.xlu1 %v486_v41  ;;  %490 = vmax.xlane.f32.xlu0 %v489_v43 }
 0x264   : > { %v3821_v44 = vpop.f32.mrf.mxu1 }
 0x265   : > { %v4589_v45 = vmul.f32 0.5, %v3821_v44 }
 0x266   : > { %v754_v46 = vpop.f32.mrf.mxu1 }
 0x267   : > { %v4591_v48 = vmul.f32 0.5, %v754_v46  ;;  %v797_v50 = vsel %vm473_vm3, %v4589_v45, -inf }
 0x268   : > { %v3822_v51 = vpop.f32.mrf.mxu1  ;;  %798 = vmax.xlane.f32.xlu0 %v797_v50 }
 0x269   : > { %v4595_v53 = vmul.f32 0.5, %v3822_v51  ;;  %v791_v58 = vsel %vm473_vm3, %v4591_v48, -inf }
 0x26a   : > { %v757_v54 = vpop.f32.mrf.mxu1 }
 0x26b   : > { %v4597_v55 = vmul.f32 0.5, %v757_v54  ;;  %v800_v56 = vsel %vm473_vm3, %v4595_v53, -inf }
 0x26c   : > { %801 = vmax.xlane.f32.xlu1 %v800_v56  ;;  %v3825_v59 = vpop.f32.mrf.mxu1  ;;  %792 = vmax.xlane.f32.xlu0 %v791_v58 }
 0x26d   : > { %v4603_v61 = vmul.f32 0.5, %v3825_v59  ;;  %v794_v1 = vsel %vm473_vm3, %v4597_v55, -inf }
 0x26e   : > { %v770_v63 = vpop.f32.mrf.mxu1 }
 0x26f   : > { %v4605_v0 = vmul.f32 0.5, %v770_v63  ;;  %v809_v2 = vsel %vm492_vm4, %v4603_v61, -inf }
 0x270   : > { %795 = vmax.xlane.f32.xlu1 %v794_v1  ;;  %v3826_v3 = vpop.f32.mrf.mxu1  ;;  %810 = vmax.xlane.f32.xlu0 %v809_v2 }
 0x271   : > { %v803_v4 = vsel %vm473_vm3, %v4605_v0, -inf }
 0x272   : > { %v773_v5 = vpop.f32.mrf.mxu1 }
 0x273   : > { %v4619_v6 = vmul.f32 0.5, %v773_v5 }
 0x274   : > { %804 = vmax.xlane.f32.xlu0 %v803_v4 }
 0x275   : > { %v806_v7 = vsel %vm473_vm3, %v4619_v6, -inf }
 0x281   : > { %880 = vrot.lane.b32.xlu1 %v4512_v57, %s4394_s11 }
 0x285   : > { %878 = vrot.lane.b32.xlu1 %v4519_v60, %s4394_s11 }
 0x28a   : > { %882 = vrot.lane.b32.xlu0 %v4504_v52, %s4394_s11 }
 0x2a9   : > { %807 = vmax.xlane.f32.xlu1 %v806_v7 }
 0x2d1   : > { %v482_v8 = vpop.xlane.xlu0 %481 }
 0x2d2   : > { %v498_v9 = vsub.f32 %v4564_v20, %v482_v8 }
 0x2d4   : > { %v507_v10 = vmul.f32 1.442695, %v498_v9 }
 0x2d5   : > { %v476_v11 = vpop.xlane.xlu0 %475 }
 0x2d6   : > { %4122 = vpow2.f32 %v507_v10  ;;  %v496_v12 = vsub.f32 %v4566_v22, %v476_v11 }
 0x2d7   : > { %v479_v13 = vpop.xlane.xlu1 %478 }
 0x2d8   : > { %v503_v14 = vmul.f32 1.442695, %v496_v12  ;;  %v497_v15 = vsub.f32 %v4572_v28, %v479_v13 }
 0x2d9   : > { %v485_v16 = vpop.xlane.xlu0 %484 }
 0x2da   : > { %4124 = vpow2.f32 %v503_v14  ;;  %v499_v17 = vsub.f32 %v4570_v26, %v485_v16  ;;  %v505_v18 = vmul.f32 1.442695, %v497_v15 }
 0x2db   : > { %v495_v19 = vpop.xlane.xlu1 %494 }
 0x2dc   : > { %v509_v21 = vmul.f32 1.442695, %v499_v17  ;;  %v502_v23 = vsub.f32 %v4576_v31, %v495_v19 }
 0x2de   : > { %4126 = vpow2.f32 %v509_v21  ;;  %v515_v20 = vmul.f32 1.442695, %v502_v23 }
 0x2df   : > { %4128 = vpow2.f32 %v505_v18  ;;  %v488_v24 = vpop.xlane.xlu1 %487  ;;  %v491_v25 = vpop.xlane.xlu0 %490 }
 0x2e0   : > { %4130 = vpow2.f32 %v515_v20  ;;  %v500_v22 = vsub.f32 %v4582_v37, %v488_v24  ;;  %v501_v29 = vsub.f32 %v471_v40, %v491_v25 }
 0x2e2   : > { %v511_v30 = vmul.f32 1.442695, %v500_v22  ;;  %v513_v28 = vmul.f32 1.442695, %v501_v29 }
 0x2e3   : > { %v4629_v32 = vpop.eup %4122 }
 0x2e4   : > { %4132 = vpow2.f32 %v511_v30  ;;  %v523_v26 = vsel %vm473_vm3, %v4629_v32, 0.0 }
 0x2e5   : > { %4134 = vpow2.f32 %v513_v28  ;;  %524 = vadd.xlane.f32.xlu1 %v523_v26 }
 0x2e7   : > { %v4633_v31 = vpop.eup %4124 }
 0x2e8   : > { %v517_v33 = vsel %vm473_vm3, %v4633_v31, 0.0 }
 0x2e9   : > { %518 = vadd.xlane.f32.xlu1 %v517_v33 }
 0x2eb   : > { %v4637_v35 = vpop.eup %4126 }
 0x2ec   : > { %v4639_v36 = vpop.eup %4128  ;;  %v526_v37 = vsel %vm473_vm3, %v4637_v35, 0.0 }
 0x2ed   : > { %v4643_v38 = vpop.eup %4130  ;;  %527 = vadd.xlane.f32.xlu0 %v526_v37  ;;  %v520_v40 = vsel %vm473_vm3, %v4639_v36, 0.0 }
 0x2ee   : > { %v535_v39 = vsel %vm492_vm4, %v4643_v38, 0.0 }
 0x2ef   : > { %536 = vadd.xlane.f32.xlu1 %v535_v39 }
 0x2f1   : > { %v4649_v41 = vpop.eup %4132  ;;  %521 = vadd.xlane.f32.xlu0 %v520_v40  ;;  %v799_v43 = vpop.xlane.xlu0 %798 }
 0x2f2   : > { %v4651_v44 = vpop.eup %4134  ;;  %v814_v46 = vsub.f32 %v4589_v45, %v799_v43  ;;  %v529_v50 = vsel %vm473_vm3, %v4649_v41, 0.0 }
 0x2f3   : > { %530 = vadd.xlane.f32.xlu1 %v529_v50  ;;  %v532_v54 = vsel %vm473_vm3, %v4651_v44, 0.0 }
 0x2f4   : > { %v823_v51 = vmul.f32 1.442695, %v814_v46 }
 0x2f5   : > { %533 = vadd.xlane.f32.xlu0 %v532_v54  ;;  %v793_v56 = vpop.xlane.xlu0 %792  ;;  %v802_v7 = vpop.xlane.xlu1 %801 }
 0x2f6   : > { %4136 = vpow2.f32 %v823_v51  ;;  %v812_v58 = vsub.f32 %v4591_v48, %v793_v56  ;;  %v815_v8 = vsub.f32 %v4595_v53, %v802_v7 }
 0x2f8   : > { %v819_v59 = vmul.f32 1.442695, %v812_v58  ;;  %v825_v10 = vmul.f32 1.442695, %v815_v8 }
 0x2f9   : > { %v811_v63 = vpop.xlane.xlu0 %810  ;;  %v796_v9 = vpop.xlane.xlu1 %795 }
 0x2fa   : > { %4138 = vpow2.f32 %v819_v59  ;;  %v813_v11 = vsub.f32 %v4597_v55, %v796_v9  ;;  %v818_v14 = vsub.f32 %v4603_v61, %v811_v63 }
 0x2fb   : > { %4140 = vpow2.f32 %v825_v10 }
 0x2fc   : > { %v821_v12 = vmul.f32 1.442695, %v813_v11  ;;  %v831_v53 = vmul.f32 1.442695, %v818_v14 }
 0x2fd   : > { %v805_v1 = vpop.xlane.xlu0 %804  ;;  %v881_v21 = vpop.permute.xlu1 %880 }
 0x2fe   : > { %4142 = vpow2.f32 %v821_v12  ;;  %v816_v17 = vsub.f32 %v4605_v0, %v805_v1 }
 0x2ff   : > { %4144 = vpow2.f32 %v831_v53 }
 0x300   : > { %v827_v18 = vmul.f32 1.442695, %v816_v17 }
 0x301   : > { %v883_v2 = vpop.permute.xlu0 %882  ;;  %v879_v0 = vpop.permute.xlu1 %878 }
 0x302   : > { %v4660_v45 = vand.u32 %v883_v2, %v4502_v49  ;;  %4146 = vpow2.f32 %v827_v18 }
 0x303   : > { %v4662_v3 = vpop.eup %4136 }
 0x304   : > { %1035 = vrot.lane.b32.xlu1 %v4499_v47, %s4395_s12  ;;  %3827 = vmatprep.subr.bf16.mxu0 %v4660_v45  ;;  %v839_v4 = vsel %vm473_vm3, %v4662_v3, 0.0 }
 0x305   : > { %840 = vadd.xlane.f32.xlu0 %v839_v4 }
 0x307   : > { %v4669_v48 = vpop.eup %4138 }
 0x308   : > { %v833_v5 = vsel %vm473_vm3, %v4669_v48, 0.0  ;;  %v4677_v13 = vpop.eup %4140 }
 0x309   : > { %834 = vadd.xlane.f32.xlu0 %v833_v5  ;;  %v842_v15 = vsel %vm473_vm3, %v4677_v13, 0.0 }
 0x30b   : > { %v4682_v16 = vpop.eup %4142 }
 0x30c   : > { %v836_v55 = vsel %vm473_vm3, %v4682_v16, 0.0  ;;  %v4687_v19 = vpop.eup %4144 }
 0x30d   : > { %v851_v61 = vsel %vm492_vm4, %v4687_v19, 0.0 }
 0x30f   : > { %v4693_v23 = vpop.eup %4146 }
 0x310   : > { %v845_v20 = vsel %vm473_vm3, %v4693_v23, 0.0 }
 0x31f   : > { %876 = vrot.lane.b32.xlu0 %v4527_v62, %s4394_s11 }
 0x328   : > { %843 = vadd.xlane.f32.xlu1 %v842_v15 }
 0x32c   : > { %837 = vadd.xlane.f32.xlu1 %v836_v55 }
 0x332   : > { %v808_v24 = vpop.xlane.xlu1 %807 }
 0x333   : > { %v817_v25 = vsub.f32 %v4619_v6, %v808_v24 }
 0x335   : > { %v829_v22 = vmul.f32 1.442695, %v817_v25 }
 0x337   : > { %4148 = vpow2.f32 %v829_v22 }
 0x33d   : > { %1033 = vrot.lane.b32.xlu1 %v4495_v42, %s4395_s12 }
 0x33e   : > { %852 = vadd.xlane.f32.xlu0 %v851_v61 }
 0x342   : > { %846 = vadd.xlane.f32.xlu0 %v845_v20 }
 0x344   : > { %v4700_v29 = vpop.eup %4148 }
 0x345   : > { %v848_v30 = vsel %vm473_vm3, %v4700_v29, 0.0 }
 0x358   : > { %1031 = vrot.lane.b32.xlu0 %v4489_v34, %s4395_s12 }
 0x35c   : > { %1021 = vrot.lane.b32.xlu0 %v4485_v27, %s4396_s13 }
 0x360   : > { %1025 = vrot.lane.b32.xlu0 %v4495_v42, %s4396_s13 }
 0x361   : > { %849 = vadd.xlane.f32.xlu1 %v848_v30 }
 0x36e   : > { %v525_v28 = vpop.xlane.xlu1 %524 }
 0x372   : > { %1029 = vrot.lane.b32.xlu1 %v4485_v27, %s4395_s12  ;;  %v519_v6 = vpop.xlane.xlu1 %518 }
 0x376   : > { %1023 = vrot.lane.b32.xlu1 %v4489_v34, %s4396_s13  ;;  %v528_v26 = vpop.xlane.xlu0 %527 }
 0x377   : > { %4150 = vrcp.f32 %v528_v26 }
 0x378   : > { %v537_v33 = vpop.xlane.xlu1 %536  ;;  %4152 = vrcp.f32 %v519_v6 }
 0x379   : > { %4154 = vrcp.f32 %v525_v28 }
 0x37a   : > { %1027 = vrot.lane.b32.xlu1 %v4499_v47, %s4396_s13  ;;  %v522_v37 = vpop.xlane.xlu0 %521 }
 0x37b   : > { %4156 = vrcp.f32 %v522_v37 }
 0x37c   : > { %v531_v39 = vpop.xlane.xlu1 %530 }
 0x37d   : > { %4158 = vrcp.f32 %v531_v39 }
 0x37e   : > { %v534_v40 = vpop.xlane.xlu0 %533 }
 0x37f   : > { %4160 = vrcp.f32 %v534_v40 }
 0x380   : > { %4162 = vrcp.f32 %v537_v33 }
 0x384   : > { %v4151_v43 = vpop.eup %4150 }
 0x385   : > { %v4153_v46 = vpop.eup %4152  ;;  %v548_v54 = vmul.f32 %v4151_v43, %v4637_v35 }
 0x386   : > { %v4155_v50 = vpop.eup %4154  ;;  %v545_v56 = vmul.f32 %v4153_v46, %v4633_v31 }
 0x387   : > { %v547_v63 = vmul.f32 %v4155_v50, %v4629_v32 }
 0x388   : > { %v4157_v51 = vpop.eup %4156 }
 0x389   : > { %v546_v58 = vmul.f32 %v4157_v51, %v4639_v36  ;;  %v553_v4 = vpack.c.bf16 %v548_v54, %v547_v63 }
 0x38a   : > { %v4159_v59 = vpop.eup %4158 }
 0x38b   : > { %v552_v1 = vpack.c.bf16 %v546_v58, %v545_v56  ;;  %v549_v7 = vmul.f32 %v4159_v59, %v4649_v41 }
 0x38c   : > { %v4161_v2 = vpop.eup %4160 }
 0x38d   : > { %v4163_v5 = vpop.eup %4162  ;;  %3803 = vmatprep.mubr.msk.bf16.mxu0 %vm473_vm3, %v552_v1  ;;  %v550_v8 = vmul.f32 %v4161_v2, %v4651_v44  ;;  %v1036_v44 = vpop.permute.xlu1 %1035  ;;  %v677_v2 = vld [vmem:[#allocation2 + $0x18] sm:$0x1] }
 0x38e   : > { %3804 = vmatmul.mubr.msk.bf16.vlgmr.msra.gmra.mxu0 %vm473_vm3, %v553_v4  ;;  %v841_v35 = vpop.xlane.xlu0 %840  ;;  %v551_v36 = vmul.f32 %v4163_v5, %v4643_v38 }
 0x38f   : > { %3828 = vmatpush3.bf16.msra.mxu0 %v4660_v45  ;;  %v554_v31 = vpack.c.bf16 %v550_v8, %v549_v7 }
 0x390   : > { %3829 = vmatprep.subr.bf16.mxu0 %v881_v21  ;;  %v555_v9 = vpack.c.bf16 %v551_v36, %v551_v36 }
 0x391   : > { %3807 = vmatprep.mubr.msk.bf16.mxu0 %vm473_vm3, %v554_v31 }
 0x392   : > { %v835_v32 = vpop.xlane.xlu0 %834 }
 0x393   : > { %3830 = vmatpush3.bf16.msra.mxu0 %v881_v21 }
 0x394   : > { %3831 = vmatprep.subr.bf16.mxu0 %v879_v0 }
 0x396   : > { %3808 = vmatmul.mubr.msk.bf16.gmra.mxu0 %vm473_vm3, %v555_v9  ;;  %v877_v41 = vpop.permute.xlu0 %876 }
 0x397   : > { %3832 = vmatpush3.bf16.msra.mxu0 %v879_v0  ;;  %v1059_v0 = vsel %vm377_vm1, %v1036_v44, 0 }
 0x398   : > { %3833 = vmatprep.subr.bf16.mxu0 %v877_v41 }
 0x39b   : > { %3834 = vmatpush3.bf16.msra.mxu0 %v877_v41 }
 0x39c   : > { %4059 = vmatprep.subr.msk.bf16.mxu0 %vm377_vm1, %v1036_v44 }
 0x3b1   : > { %v844_v45 = vpop.xlane.xlu1 %843 }
 0x3b2   : > { %4164 = vrcp.f32 %v844_v45 }
 0x3b3   : > { %4166 = vrcp.f32 %v835_v32 }
 0x3b4   : > { %4168 = vrcp.f32 %v841_v35 }
 0x3b5   : > { %v838_v38 = vpop.xlane.xlu1 %837 }
 0x3b6   : > { %4170 = vrcp.f32 %v838_v38 }
 0x3b9   : > { %v1034_v20 = vpop.permute.xlu1 %1033 }
 0x3bf   : > { %v4165_v10 = vpop.eup %4164 }
 0x3c0   : > { %v4167_v11 = vpop.eup %4166  ;;  %v864_v15 = vmul.f32 %v4165_v10, %v4677_v13 }
 0x3c1   : > { %v4169_v12 = vpop.eup %4168  ;;  %v861_v53 = vmul.f32 %v4167_v11, %v4669_v48  ;;  %v1056_v48 = vsel %vm377_vm1, %v1034_v20, 0 }
 0x3c2   : > { %v863_v55 = vmul.f32 %v4169_v12, %v4662_v3 }
 0x3c3   : > { %v4171_v14 = vpop.eup %4170 }
 0x3c4   : > { %v862_v17 = vmul.f32 %v4171_v14, %v4682_v16  ;;  %v869_v21 = vpack.c.bf16 %v864_v15, %v863_v55 }
 0x3c6   : > { %v868_v18 = vpack.c.bf16 %v862_v17, %v861_v53 }
 0x3c7   : > { %v853_v61 = vpop.xlane.xlu0 %852 }
 0x3c8   : > { %3835 = vmatprep.mubr.msk.bf16.mxu0 %vm473_vm3, %v868_v18  ;;  %4172 = vrcp.f32 %v853_v61 }
 0x3c9   : > { %3836 = vmatmul.mubr.msk.bf16.vlgmr.msra.gmra.mxu0 %vm473_vm3, %v869_v21 }
 0x3ca   : > { %3844 = vmatpush3.bf16.xpose.msra.mxu0 %v1059_v0 }
 0x3cb   : > { %4060 = vmatprep.subr.msk.bf16.mxu0 %vm377_vm1, %v1034_v20  ;;  %v847_v13 = vpop.xlane.xlu0 %846 }
 0x3cc   : > { %4174 = vrcp.f32 %v847_v13 }
 0x3cf   : > { %v1032_v24 = vpop.permute.xlu0 %1031 }
 0x3d0   : > { %v1053_v3 = vsel %vm377_vm1, %v1032_v24, 0 }
 0x3d2   : > { %3846 = vmatpush3.bf16.xpose.msra.mxu0 %v1056_v48 }
 0x3d3   : > { %4061 = vmatprep.subr.msk.bf16.mxu0 %vm377_vm1, %v1032_v24  ;;  %v1022_v43 = vpop.permute.xlu0 %1021 }
 0x3d5   : > { %v4173_v30 = vpop.eup %4172 }
 0x3d6   : > { %v867_v26 = vmul.f32 %v4173_v30, %v4687_v19 }
 0x3d7   : > { %v1026_v50 = vpop.permute.xlu0 %1025 }
 0x3d8   : > { %v871_v40 = vpack.c.bf16 %v867_v26, %v867_v26 }
 0x3d9   : > { %v4175_v28 = vpop.eup %4174 }
 0x3da   : > { %3848 = vmatpush3.bf16.xpose.msra.mxu0 %v1053_v3  ;;  %v865_v33 = vmul.f32 %v4175_v28, %v4693_v23 }
 0x3ea   : > { %v850_v16 = vpop.xlane.xlu1 %849 }
 0x3eb   : > { %4176 = vrcp.f32 %v850_v16 }
 0x3ee   : > { %v1030_v25 = vpop.permute.xlu1 %1029 }
 0x3ef   : > { %4062 = vmatprep.subr.msk.bf16.mxu0 %vm377_vm1, %v1030_v25  ;;  %v1050_v22 = vsel %vm377_vm1, %v1030_v25, 0 }
 0x3f0   : > { %3850 = vmatpush3.bf16.xpose.msra.mxu0 %v1050_v22 }
 0x3f2   : > { %v1024_v46 = vpop.permute.xlu1 %1023 }
 0x3f6   : > { %v1028_v19 = vpop.permute.xlu1 %1027 }
 0x3f8   : > { %v4177_v6 = vpop.eup %4176 }
 0x3f9   : > { %v866_v37 = vmul.f32 %v4177_v6, %v4700_v29 }
 0x3fb   : > { %v870_v39 = vpack.c.bf16 %v866_v37, %v865_v33 }
 0x3fd   : > { %3839 = vmatprep.mubr.msk.bf16.mxu0 %vm473_vm3, %v870_v39 }
 0x3fe   : > { %3840 = vmatmul.mubr.msk.bf16.gmra.mxu0 %vm473_vm3, %v871_v40 }
 0x3ff   : > { %3851 = vmatprep.mubr.msk.bf16.mxu0 %vm377_vm1, %v1022_v43 }
 0x406   : > { %3852 = vmatmul.mubr.msk.bf16.vlgmr.msra.gmra.mxu0 %vm377_vm1, %v1024_v46 }
 0x407   : > { %3855 = vmatprep.mubr.msk.bf16.mxu0 %vm377_vm1, %v1026_v50 }
 0x40e   : > { %3856 = vmatmul.mubr.msk.bf16.gmra.mxu0 %vm377_vm1, %v1028_v19 }
 0x44e   : > { %v3805_v23 = vpop.f32.mrf.mxu0 }
 0x44f   : > { %v3589_v29 = vpack.c.bf16 %v3805_v23, %v3805_v23 }
 0x450   : > { %v608_v51 = vpop.f32.mrf.mxu0 }
 0x451   : > { %670 = vst.msk [vmem:[#allocation2 + $0x8] sm:$0xf] %vm667_vm5, %v3589_v29  ;;  %v3587_v54 = vpack.c.bf16 %v608_v51, %v608_v51 }
 0x452   : > { %v3806_v56 = vpop.f32.mrf.mxu0 }
 0x453   : > { %668 = vst.msk [vmem:[#allocation2] sm:$0xf] %vm667_vm5, %v3587_v54  ;;  %v3590_v58 = vpack.c.bf16 %v3806_v56, %v3806_v56 }
 0x454   : > { %v611_v59 = vpop.f32.mrf.mxu0 }
 0x455   : > { %671 = vst.msk [vmem:[#allocation2 + $0xc] sm:$0xf] %vm667_vm5, %v3590_v58  ;;  %v3588_v63 = vpack.c.bf16 %v611_v59, %v611_v59 }
 0x456   : > { %v3809_v1 = vpop.f32.mrf.mxu0 }
 0x457   : > { %669 = vst.msk [vmem:[#allocation2 + $0x4] sm:$0xf] %vm667_vm5, %v3588_v63  ;;  %v3593_v4 = vpack.c.bf16 %v3809_v1, %v3809_v1 }
 0x458   : > { %v624_v5 = vpop.f32.mrf.mxu0 }
 0x459   : > { %v678_v7 = vsel %vm676_vm8, %v3593_v4, %v677_v2  ;;  %v3591_v8 = vpack.c.bf16 %v624_v5, %v624_v5  ;;  %vm2027_vm8 = vcmask 319744  }
 0x45a   : > { %679 = vst [vmem:[#allocation2 + $0x18] sm:$0x1] %v678_v7  ;;  %v3810_v35 = vpop.f32.mrf.mxu0  ;;  %vm2028_vm9 = vmand %vm2027_vm8, %vm675_vm7 }
 0x45b   : > { %672 = vst.msk [vmem:[#allocation2 + $0x10] sm:$0xf] %vm667_vm5, %v3591_v8 }
 0x45c   : > { %v627_v31 = vpop.f32.mrf.mxu0 }
 0x45d   : > { %v3592_v36 = vpack.c.bf16 %v627_v31, %v627_v31 }
 0x45f   : > { %673 = vst.msk [vmem:[#allocation2 + $0x14] sm:$0xf] %vm667_vm5, %v3592_v36  ;;  %vm1690_vm5 = vcmask 254144  }
 0x460   : > { %vm1691_vm6 = vmand %vm1690_vm5, %vm675_vm7 }
 0x489   : > { %v4756_v32 = vpop.f32.mrf.mxu0 }
 0x48b   : > { %v4758_v9 = vpop.f32.mrf.mxu0 }
 0x48d   : > { %v4760_v41 = vpop.f32.mrf.mxu0 }
 0x48f   : > { %v4762_v44 = vpop.f32.mrf.mxu0 }
 0x4be   : > { %v4764_v45 = vpop.f32.mrf.mxu0 }
 0x4c0   : > { %v4766_v38 = vpop.f32.mrf.mxu0 }
 0x4c2   : > { %v3842_v10 = vpop.f32.mrf.mxu0 }
 0x4c4   : > { %v4768_v11 = vpop.f32.mrf.mxu0 }
 0x4c5   : > { %5525 = vst [vmem:[#allocation3_spill] sm:$0xff] %v4768_v11 }
 0x4c6   : > { %v3853_v12 = vpop.f32.mrf.mxu0 }
 0x4c7   : > { %v1127_v14 = vmul.f32 0.5, %v3853_v12 }
 0x4c8   : > { %v1095_v15 = vpop.f32.mrf.mxu0 }
 0x4c9   : > { %v1125_v53 = vmul.f32 0.5, %v1095_v15  ;;  %v1138_v17 = vsel %vm473_vm3, %v1127_v14, -inf }
 0x4ca   : > { %1139 = vmax.xlane.f32.xlu0 %v1138_v17  ;;  %v3854_v55 = vpop.f32.mrf.mxu0 }
 0x4cb   : > { %v1128_v21 = vmul.f32 0.5, %v3854_v55  ;;  %v1132_v0 = vsel %vm473_vm3, %v1125_v53, -inf }
 0x4cc   : > { %v1098_v18 = vpop.f32.mrf.mxu0 }
 0x4cd   : > { %v1126_v61 = vmul.f32 0.5, %v1098_v18  ;;  %v1141_v3 = vsel %vm473_vm3, %v1128_v21, -inf }
 0x4ce   : > { %1133 = vmax.xlane.f32.xlu0 %v1132_v0  ;;  %v3857_v20 = vpop.f32.mrf.mxu0 }
 0x4cf   : > { %v4772_v13 = vmul.f32 0.5, %v3857_v20  ;;  %v1135_v48 = vsel %vm473_vm3, %v1126_v61, -inf }
 0x4d0   : > { %1136 = vmax.xlane.f32.xlu1 %v1135_v48  ;;  %v1111_v24 = vpop.f32.mrf.mxu0 }
 0x4d1   : > { %v1129_v25 = vmul.f32 0.5, %v1111_v24  ;;  %v1150_v22 = vsel %vm492_vm4, %v4772_v13, -inf }
 0x4d2   : > { %1142 = vmax.xlane.f32.xlu0 %v1141_v3  ;;  %v3858_v16 = vpop.f32.mrf.mxu0 }
 0x4d3   : > { %v1144_v6 = vsel %vm473_vm3, %v1129_v25, -inf }
 0x4d4   : > { %1151 = vmax.xlane.f32.xlu1 %v1150_v22  ;;  %v1114_v30 = vpop.f32.mrf.mxu0 }
 0x4d5   : > { %v1130_v28 = vmul.f32 0.5, %v1114_v30 }
 0x4d7   : > { %v1147_v26 = vsel %vm473_vm3, %v1130_v28, -inf }
 0x4d8   : > { %1145 = vmax.xlane.f32.xlu1 %v1144_v6  ;;  %1148 = vmax.xlane.f32.xlu0 %v1147_v26 }
 0x4e9   : > { %1217 = vrot.lane.b32.xlu1 %v4512_v57, %s4396_s13 }
 0x4ed   : > { %1215 = vrot.lane.b32.xlu1 %v4519_v60, %s4396_s13 }
 0x4ee   : > { %1219 = vrot.lane.b32.xlu0 %v4504_v52, %s4396_s13 }
 0x4f1   : > { %1372 = vrot.lane.b32.xlu1 %v4499_v47, %s4397_s14 }
 0x553   : > { %v1140_v33 = vpop.xlane.xlu0 %1139 }
 0x554   : > { %v1155_v37 = vsub.f32 %v1127_v14, %v1140_v33 }
 0x556   : > { %v1164_v39 = vmul.f32 1.442695, %v1155_v37 }
 0x557   : > { %v1134_v40 = vpop.xlane.xlu0 %1133 }
 0x558   : > { %4178 = vpow2.f32 %v1164_v39  ;;  %v1153_v43 = vsub.f32 %v1125_v53, %v1134_v40 }
 0x559   : > { %v1137_v46 = vpop.xlane.xlu1 %1136 }
 0x55a   : > { %v1160_v50 = vmul.f32 1.442695, %v1153_v43  ;;  %v1154_v19 = vsub.f32 %v1126_v61, %v1137_v46 }
 0x55b   : > { %v1143_v23 = vpop.xlane.xlu0 %1142 }
 0x55c   : > { %4180 = vpow2.f32 %v1160_v50  ;;  %v1156_v29 = vsub.f32 %v1128_v21, %v1143_v23  ;;  %v1162_v54 = vmul.f32 1.442695, %v1154_v19 }
 0x55d   : > { %v1152_v51 = vpop.xlane.xlu1 %1151 }
 0x55e   : > { %v1166_v56 = vmul.f32 1.442695, %v1156_v29  ;;  %v1159_v14 = vsub.f32 %v4772_v13, %v1152_v51 }
 0x560   : > { %4182 = vpow2.f32 %v1166_v56  ;;  %v1172_v15 = vmul.f32 1.442695, %v1159_v14 }
 0x561   : > { %v1146_v58 = vpop.xlane.xlu1 %1145  ;;  %v1149_v59 = vpop.xlane.xlu0 %1148  ;;  %4184 = vpow2.f32 %v1162_v54 }
 0x562   : > { %v1157_v53 = vsub.f32 %v1129_v25, %v1146_v58  ;;  %4186 = vpow2.f32 %v1172_v15  ;;  %v1158_v55 = vsub.f32 %v1130_v28, %v1149_v59 }
 0x564   : > { %v1168_v17 = vmul.f32 1.442695, %v1157_v53  ;;  %v1170_v18 = vmul.f32 1.442695, %v1158_v55 }
 0x565   : > { %v4788_v63 = vpop.eup %4178  ;;  %v1220_v1 = vpop.permute.xlu0 %1219 }
 0x566   : > { %v1237_v2 = vand.u32 %v1220_v1, %v4502_v49  ;;  %v1180_v4 = vsel %vm473_vm3, %v4788_v63, 0.0  ;;  %v1218_v5 = vpop.permute.xlu1 %1217  ;;  %4188 = vpow2.f32 %v1168_v17 }
 0x567   : > { %1181 = vadd.xlane.f32.xlu0 %v1180_v4  ;;  %4190 = vpow2.f32 %v1170_v18 }
 0x568   : > { %3859 = vmatprep.subr.bf16.mxu1 %v1237_v2 }
 0x569   : > { %v4181_v7 = vpop.eup %4180  ;;  %3860 = vmatpush3.bf16.msra.mxu1 %v1237_v2 }
 0x56a   : > { %3861 = vmatprep.subr.bf16.mxu1 %v1218_v5  ;;  %v1174_v8 = vsel %vm473_vm3, %v4181_v7, 0.0  ;;  %v1216_v31 = vpop.permute.xlu1 %1215 }
 0x56b   : > { %1175 = vadd.xlane.f32.xlu0 %v1174_v8 }
 0x56d   : > { %v4183_v35 = vpop.eup %4182  ;;  %3862 = vmatpush3.bf16.msra.mxu1 %v1218_v5 }
 0x56e   : > { %3863 = vmatprep.subr.bf16.mxu1 %v1216_v31  ;;  %v1183_v36 = vsel %vm473_vm3, %v4183_v35, 0.0  ;;  %v4185_v10 = vpop.eup %4184  ;;  %v1373_v3 = vpop.permute.xlu1 %1372 }
 0x56f   : > { %1184 = vadd.xlane.f32.xlu1 %v1183_v36  ;;  %v1177_v12 = vsel %vm473_vm3, %v4185_v10, 0.0  ;;  %v4801_v21 = vpop.eup %4186  ;;  %v1396_v19 = vsel %vm377_vm1, %v1373_v3, 0 }
 0x570   : > { %v1192_v61 = vsel %vm492_vm4, %v4801_v21, 0.0 }
 0x571   : > { %3864 = vmatpush3.bf16.msra.mxu1 %v1216_v31 }
 0x573   : > { %1178 = vadd.xlane.f32.xlu1 %v1177_v12  ;;  %v4805_v0 = vpop.eup %4188 }
 0x574   : > { %v1186_v20 = vsel %vm473_vm3, %v4805_v0, 0.0  ;;  %v4191_v13 = vpop.eup %4190 }
 0x575   : > { %v1189_v48 = vsel %vm473_vm3, %v4191_v13, 0.0 }
 0x581   : > { %1213 = vrot.lane.b32.xlu0 %v4527_v62, %s4396_s13 }
 0x584   : > { %1370 = vrot.lane.b32.xlu1 %v4495_v42, %s4397_s14 }
 0x5a0   : > { %1193 = vadd.xlane.f32.xlu0 %v1192_v61 }
 0x5a4   : > { %1187 = vadd.xlane.f32.xlu0 %v1186_v20 }
 0x5a8   : > { %1190 = vadd.xlane.f32.xlu1 %v1189_v48 }
 0x5b9   : > { %1366 = vrot.lane.b32.xlu1 %v4485_v27, %s4397_s14 }
 0x5ba   : > { %1368 = vrot.lane.b32.xlu0 %v4489_v34, %s4397_s14 }
 0x5bd   : > { %1360 = vrot.lane.b32.xlu1 %v4489_v34, %s4398_s15 }
 0x5be   : > { %1358 = vrot.lane.b32.xlu0 %v4485_v27, %s4398_s15 }
 0x5c1   : > { %1364 = vrot.lane.b32.xlu1 %v4499_v47, %s4398_s15 }
 0x5c2   : > { %1362 = vrot.lane.b32.xlu0 %v4495_v42, %s4398_s15 }
 0x5f0   : > { %v1182_v24 = vpop.xlane.xlu0 %1181 }
 0x5f4   : > { %v1176_v16 = vpop.xlane.xlu0 %1175 }
 0x5f8   : > { %v1185_v25 = vpop.xlane.xlu1 %1184  ;;  %v1214_v22 = vpop.permute.xlu0 %1213 }
 0x5f9   : > { %3865 = vmatprep.subr.bf16.mxu1 %v1214_v22  ;;  %4192 = vrcp.f32 %v1185_v25 }
 0x5fa   : > { %3866 = vmatpush3.bf16.msra.mxu1 %v1214_v22  ;;  %4194 = vrcp.f32 %v1176_v16 }
 0x5fb   : > { %4063 = vmatprep.subr.msk.bf16.mxu1 %vm377_vm1, %v1373_v3  ;;  %4196 = vrcp.f32 %v1182_v24 }
 0x5fc   : > { %v1179_v30 = vpop.xlane.xlu1 %1178 }
 0x5fd   : > { %4198 = vrcp.f32 %v1179_v30 }
 0x600   : > { %v1371_v23 = vpop.permute.xlu1 %1370 }
 0x601   : > { %v1393_v29 = vsel %vm377_vm1, %v1371_v23, 0 }
 0x606   : > { %v4193_v28 = vpop.eup %4192 }
 0x607   : > { %v4195_v6 = vpop.eup %4194  ;;  %v1205_v37 = vmul.f32 %v4193_v28, %v4183_v35 }
 0x608   : > { %v4197_v26 = vpop.eup %4196  ;;  %v1202_v39 = vmul.f32 %v4195_v6, %v4181_v7 }
 0x609   : > { %v1204_v43 = vmul.f32 %v4197_v26, %v4788_v63 }
 0x60a   : > { %v4199_v33 = vpop.eup %4198 }
 0x60b   : > { %v1203_v40 = vmul.f32 %v4199_v33, %v4185_v10  ;;  %v1210_v50 = vpack.c.bf16 %v1205_v37, %v1204_v43 }
 0x60d   : > { %v1209_v46 = vpack.c.bf16 %v1203_v40, %v1202_v39 }
 0x60f   : > { %3867 = vmatprep.mubr.msk.bf16.mxu1 %vm473_vm3, %v1209_v46 }
 0x610   : > { %3868 = vmatmul.mubr.msk.bf16.vlgmr.msra.gmra.mxu1 %vm473_vm3, %v1210_v50 }
 0x611   : > { %3876 = vmatpush3.bf16.xpose.msra.mxu1 %v1396_v19 }
 0x612   : > { %4064 = vmatprep.subr.msk.bf16.mxu1 %vm377_vm1, %v1371_v23 }
 0x619   : > { %3878 = vmatpush3.bf16.xpose.msra.mxu1 %v1393_v29 }
 0x629   : > { %v1194_v51 = vpop.xlane.xlu0 %1193 }
 0x62a   : > { %4200 = vrcp.f32 %v1194_v51 }
 0x62d   : > { %v1188_v54 = vpop.xlane.xlu0 %1187 }
 0x62e   : > { %4202 = vrcp.f32 %v1188_v54 }
 0x631   : > { %v1191_v56 = vpop.xlane.xlu1 %1190  ;;  %v1369_v58 = vpop.permute.xlu0 %1368 }
 0x632   : > { %4204 = vrcp.f32 %v1191_v56  ;;  %4065 = vmatprep.subr.msk.bf16.mxu1 %vm377_vm1, %v1369_v58  ;;  %v1390_v59 = vsel %vm377_vm1, %v1369_v58, 0 }
 0x633   : > { %3880 = vmatpush3.bf16.xpose.msra.mxu1 %v1390_v59 }
 0x635   : > { %v1367_v63 = vpop.permute.xlu1 %1366  ;;  %v1359_v10 = vpop.permute.xlu0 %1358 }
 0x636   : > { %4066 = vmatprep.subr.msk.bf16.mxu1 %vm377_vm1, %v1367_v63  ;;  %v1387_v1 = vsel %vm377_vm1, %v1367_v63, 0 }
 0x637   : > { %v4201_v2 = vpop.eup %4200 }
 0x638   : > { %v1208_v7 = vmul.f32 %v4201_v2, %v4801_v21 }
 0x639   : > { %v1361_v12 = vpop.permute.xlu1 %1360  ;;  %v1363_v14 = vpop.permute.xlu0 %1362 }
 0x63a   : > { %v1212_v36 = vpack.c.bf16 %v1208_v7, %v1208_v7 }
 0x63b   : > { %3882 = vmatpush3.bf16.xpose.msra.mxu1 %v1387_v1  ;;  %v4203_v4 = vpop.eup %4202 }
 0x63c   : > { %v1206_v8 = vmul.f32 %v4203_v4, %v4805_v0 }
 0x63d   : > { %v1365_v15 = vpop.permute.xlu1 %1364 }
 0x63f   : > { %v4205_v5 = vpop.eup %4204 }
 0x640   : > { %v1207_v35 = vmul.f32 %v4205_v5, %v4191_v13 }
 0x642   : > { %v1211_v31 = vpack.c.bf16 %v1207_v35, %v1206_v8 }
 0x644   : > { %3871 = vmatprep.mubr.msk.bf16.mxu1 %vm473_vm3, %v1211_v31 }
 0x645   : > { %3872 = vmatmul.mubr.msk.bf16.gmra.mxu1 %vm473_vm3, %v1212_v36 }
 0x646   : > { %3883 = vmatprep.mubr.msk.bf16.mxu1 %vm377_vm1, %v1359_v10 }
 0x64d   : > { %3884 = vmatmul.mubr.msk.bf16.vlgmr.msra.gmra.mxu1 %vm377_vm1, %v1361_v12 }
 0x64e   : > { %3887 = vmatprep.mubr.msk.bf16.mxu1 %vm377_vm1, %v1363_v14 }
 0x655   : > { %3888 = vmatmul.mubr.msk.bf16.gmra.mxu1 %vm377_vm1, %v1365_v15 }
 0x6d0   : > { %v4841_v53 = vpop.f32.mrf.mxu1 }
 0x6d2   : > { %v4843_v17 = vpop.f32.mrf.mxu1 }
 0x6d4   : > { %v4845_v55 = vpop.f32.mrf.mxu1 }
 0x6d6   : > { %v4847_v18 = vpop.f32.mrf.mxu1 }
 0x705   : > { %v4849_v21 = vpop.f32.mrf.mxu1 }
 0x707   : > { %v4851_v61 = vpop.f32.mrf.mxu1 }
 0x709   : > { %v3874_v0 = vpop.f32.mrf.mxu1 }
 0x70b   : > { %v4853_v20 = vpop.f32.mrf.mxu1 }
 0x70c   : > { %5526 = vst [vmem:[#allocation4_spill] sm:$0xff] %v4853_v20 }
 0x70d   : > { %v3885_v13 = vpop.f32.mrf.mxu1 }
 0x70e   : > { %v1464_v48 = vmul.f32 0.5, %v3885_v13 }
 0x70f   : > { %v1432_v24 = vpop.f32.mrf.mxu1 }
 0x710   : > { %v1462_v3 = vmul.f32 0.5, %v1432_v24  ;;  %v1475_v16 = vsel %vm473_vm3, %v1464_v48, -inf }
 0x711   : > { %1476 = vmax.xlane.f32.xlu0 %v1475_v16  ;;  %v3886_v25 = vpop.f32.mrf.mxu1 }
 0x712   : > { %v1465_v30 = vmul.f32 0.5, %v3886_v25  ;;  %v1469_v6 = vsel %vm473_vm3, %v1462_v3, -inf }
 0x713   : > { %v1435_v22 = vpop.f32.mrf.mxu1 }
 0x714   : > { %v1463_v28 = vmul.f32 0.5, %v1435_v22  ;;  %v1478_v40 = vsel %vm473_vm3, %v1465_v30, -inf }
 0x715   : > { %1470 = vmax.xlane.f32.xlu0 %v1469_v6  ;;  %v3889_v26 = vpop.f32.mrf.mxu1 }
 0x716   : > { %v4857_v33 = vmul.f32 0.5, %v3889_v26  ;;  %v1472_v37 = vsel %vm473_vm3, %v1463_v28, -inf }
 0x717   : > { %1473 = vmax.xlane.f32.xlu1 %v1472_v37  ;;  %v1448_v39 = vpop.f32.mrf.mxu1 }
 0x718   : > { %v1466_v46 = vmul.f32 0.5, %v1448_v39  ;;  %v1487_v50 = vsel %vm492_vm4, %v4857_v33, -inf }
 0x719   : > { %1479 = vmax.xlane.f32.xlu0 %v1478_v40  ;;  %v3890_v43 = vpop.f32.mrf.mxu1 }
 0x71a   : > { %v1481_v29 = vsel %vm473_vm3, %v1466_v46, -inf }
 0x71b   : > { %1488 = vmax.xlane.f32.xlu1 %v1487_v50  ;;  %v1451_v19 = vpop.f32.mrf.mxu1 }
 0x71c   : > { %v1467_v23 = vmul.f32 0.5, %v1451_v19 }
 0x71e   : > { %v1484_v51 = vsel %vm473_vm3, %v1467_v23, -inf }
 0x71f   : > { %1482 = vmax.xlane.f32.xlu1 %v1481_v29  ;;  %1485 = vmax.xlane.f32.xlu0 %v1484_v51 }
 0x730   : > { %1554 = vrot.lane.b32.xlu1 %v4512_v57, %s4398_s15 }
 0x734   : > { %1552 = vrot.lane.b32.xlu1 %v4519_v60, %s4398_s15 }
 0x735   : > { %1556 = vrot.lane.b32.xlu0 %v4504_v52, %s4398_s15 }
 0x738   : > { %1709 = vrot.lane.b32.xlu1 %v4499_v47, %s4399_s16 }
 0x79a   : > { %v1477_v54 = vpop.xlane.xlu0 %1476 }
 0x79b   : > { %v1492_v56 = vsub.f32 %v1464_v48, %v1477_v54 }
 0x79d   : > { %v1501_v58 = vmul.f32 1.442695, %v1492_v56 }
 0x79e   : > { %v1471_v59 = vpop.xlane.xlu0 %1470 }
 0x79f   : > { %4206 = vpow2.f32 %v1501_v58  ;;  %v1490_v63 = vsub.f32 %v1462_v3, %v1471_v59 }
 0x7a0   : > { %v1474_v1 = vpop.xlane.xlu1 %1473 }
 0x7a1   : > { %v1497_v2 = vmul.f32 1.442695, %v1490_v63  ;;  %v1491_v4 = vsub.f32 %v1463_v28, %v1474_v1 }
 0x7a2   : > { %v1480_v5 = vpop.xlane.xlu0 %1479 }
 0x7a3   : > { %4208 = vpow2.f32 %v1497_v2  ;;  %v1493_v7 = vsub.f32 %v1465_v30, %v1480_v5  ;;  %v1499_v35 = vmul.f32 1.442695, %v1491_v4 }
 0x7a4   : > { %v1489_v8 = vpop.xlane.xlu1 %1488 }
 0x7a5   : > { %v1503_v31 = vmul.f32 1.442695, %v1493_v7  ;;  %v1496_v28 = vsub.f32 %v4857_v33, %v1489_v8 }
 0x7a7   : > { %4210 = vpow2.f32 %v1503_v31  ;;  %v1509_v6 = vmul.f32 1.442695, %v1496_v28 }
 0x7a8   : > { %v1483_v36 = vpop.xlane.xlu1 %1482  ;;  %v1486_v10 = vpop.xlane.xlu0 %1485  ;;  %4212 = vpow2.f32 %v1499_v35 }
 0x7a9   : > { %v1494_v26 = vsub.f32 %v1466_v46, %v1483_v36  ;;  %4214 = vpow2.f32 %v1509_v6  ;;  %v1495_v39 = vsub.f32 %v1467_v23, %v1486_v10 }
 0x7ab   : > { %v1505_v37 = vmul.f32 1.442695, %v1494_v26  ;;  %v1507_v40 = vmul.f32 1.442695, %v1495_v39 }
 0x7ac   : > { %v4873_v12 = vpop.eup %4206  ;;  %v1557_v14 = vpop.permute.xlu0 %1556 }
 0x7ad   : > { %v1574_v15 = vand.u32 %v1557_v14, %v4502_v49  ;;  %v1517_v0 = vsel %vm473_vm3, %v4873_v12, 0.0  ;;  %v1555_v13 = vpop.permute.xlu1 %1554  ;;  %4216 = vpow2.f32 %v1505_v37 }
 0x7ae   : > { %1518 = vadd.xlane.f32.xlu0 %v1517_v0  ;;  %4218 = vpow2.f32 %v1507_v40 }
 0x7af   : > { %3891 = vmatprep.subr.bf16.mxu0 %v1574_v15 }
 0x7b0   : > { %v4209_v48 = vpop.eup %4208  ;;  %3892 = vmatpush3.bf16.msra.mxu0 %v1574_v15 }
 0x7b1   : > { %3893 = vmatprep.subr.bf16.mxu0 %v1555_v13  ;;  %v1511_v24 = vsel %vm473_vm3, %v4209_v48, 0.0  ;;  %v1553_v16 = vpop.permute.xlu1 %1552 }
 0x7b2   : > { %1512 = vadd.xlane.f32.xlu0 %v1511_v24 }
 0x7b4   : > { %v4211_v3 = vpop.eup %4210  ;;  %3894 = vmatpush3.bf16.msra.mxu0 %v1555_v13 }
 0x7b5   : > { %3895 = vmatprep.subr.bf16.mxu0 %v1553_v16  ;;  %v1520_v25 = vsel %vm473_vm3, %v4211_v3, 0.0  ;;  %v4213_v22 = vpop.eup %4212  ;;  %v1710_v51 = vpop.permute.xlu1 %1709 }
 0x7b6   : > { %1521 = vadd.xlane.f32.xlu1 %v1520_v25  ;;  %v1514_v30 = vsel %vm473_vm3, %v4213_v22, 0.0  ;;  %v4886_v43 = vpop.eup %4214  ;;  %v1733_v10 = vsel %vm377_vm1, %v1710_v51, 0 }
 0x7b7   : > { %v1529_v50 = vsel %vm492_vm4, %v4886_v43, 0.0 }
 0x7b8   : > { %3896 = vmatpush3.bf16.msra.mxu0 %v1553_v16 }
 0x7ba   : > { %1515 = vadd.xlane.f32.xlu1 %v1514_v30  ;;  %v4890_v19 = vpop.eup %4216 }
 0x7bb   : > { %v1523_v29 = vsel %vm473_vm3, %v4890_v19, 0.0  ;;  %v4219_v33 = vpop.eup %4218 }
 0x7bc   : > { %v1526_v46 = vsel %vm473_vm3, %v4219_v33, 0.0 }
 0x7c8   : > { %1550 = vrot.lane.b32.xlu0 %v4527_v62, %s4398_s15 }
 0x7cb   : > { %1707 = vrot.lane.b32.xlu1 %v4495_v42, %s4399_s16 }
 0x7e7   : > { %1530 = vadd.xlane.f32.xlu0 %v1529_v50 }
 0x7eb   : > { %1524 = vadd.xlane.f32.xlu0 %v1523_v29 }
 0x7ef   : > { %1527 = vadd.xlane.f32.xlu1 %v1526_v46 }
 0x800   : > { %1703 = vrot.lane.b32.xlu1 %v4485_v27, %s4399_s16 }
 0x801   : > { %1705 = vrot.lane.b32.xlu0 %v4489_v34, %s4399_s16 }
 0x804   : > { %1697 = vrot.lane.b32.xlu1 %v4489_v34, %s4400_s17 }
 0x805   : > { %1695 = vrot.lane.b32.xlu0 %v4485_v27, %s4400_s17 }
 0x808   : > { %1701 = vrot.lane.b32.xlu1 %v4499_v47, %s4400_s17 }
 0x809   : > { %1699 = vrot.lane.b32.xlu0 %v4495_v42, %s4400_s17 }
 0x837   : > { %v1519_v23 = vpop.xlane.xlu0 %1518 }
 0x83b   : > { %v1513_v54 = vpop.xlane.xlu0 %1512 }
 0x83f   : > { %v1522_v56 = vpop.xlane.xlu1 %1521  ;;  %v1551_v58 = vpop.permute.xlu0 %1550 }
 0x840   : > { %3897 = vmatprep.subr.bf16.mxu0 %v1551_v58  ;;  %4220 = vrcp.f32 %v1522_v56 }
 0x841   : > { %3898 = vmatpush3.bf16.msra.mxu0 %v1551_v58  ;;  %4222 = vrcp.f32 %v1513_v54 }
 0x842   : > { %4067 = vmatprep.subr.msk.bf16.mxu0 %vm377_vm1, %v1710_v51  ;;  %4224 = vrcp.f32 %v1519_v23 }
 0x843   : > { %v1516_v59 = vpop.xlane.xlu1 %1515 }
 0x844   : > { %4226 = vrcp.f32 %v1516_v59 }
 0x847   : > { %v1708_v14 = vpop.permute.xlu1 %1707 }
 0x848   : > { %v1730_v15 = vsel %vm377_vm1, %v1708_v14, 0 }
 0x84d   : > { %v4221_v63 = vpop.eup %4220 }
 0x84e   : > { %v4223_v1 = vpop.eup %4222  ;;  %v1542_v5 = vmul.f32 %v4221_v63, %v4211_v3 }
 0x84f   : > { %v4225_v2 = vpop.eup %4224  ;;  %v1539_v7 = vmul.f32 %v4223_v1, %v4209_v48 }
 0x850   : > { %v1541_v35 = vmul.f32 %v4225_v2, %v4873_v12 }
 0x851   : > { %v4227_v4 = vpop.eup %4226 }
 0x852   : > { %v1540_v8 = vmul.f32 %v4227_v4, %v4213_v22  ;;  %v1547_v36 = vpack.c.bf16 %v1542_v5, %v1541_v35 }
 0x854   : > { %v1546_v31 = vpack.c.bf16 %v1540_v8, %v1539_v7 }
 0x856   : > { %3899 = vmatprep.mubr.msk.bf16.mxu0 %vm473_vm3, %v1546_v31 }
 0x857   : > { %3900 = vmatmul.mubr.msk.bf16.vlgmr.msra.gmra.mxu0 %vm473_vm3, %v1547_v36 }
 0x858   : > { %3908 = vmatpush3.bf16.xpose.msra.mxu0 %v1733_v10 }
 0x859   : > { %4068 = vmatprep.subr.msk.bf16.mxu0 %vm377_vm1, %v1708_v14 }
 0x860   : > { %3910 = vmatpush3.bf16.xpose.msra.mxu0 %v1730_v15 }
 0x870   : > { %v1531_v0 = vpop.xlane.xlu0 %1530 }
 0x871   : > { %4228 = vrcp.f32 %v1531_v0 }
 0x874   : > { %v1525_v13 = vpop.xlane.xlu0 %1524 }
 0x875   : > { %4230 = vrcp.f32 %v1525_v13 }
 0x878   : > { %v1528_v12 = vpop.xlane.xlu1 %1527  ;;  %v1706_v48 = vpop.permute.xlu0 %1705 }
 0x879   : > { %4232 = vrcp.f32 %v1528_v12  ;;  %4069 = vmatprep.subr.msk.bf16.mxu0 %vm377_vm1, %v1706_v48  ;;  %v1727_v24 = vsel %vm377_vm1, %v1706_v48, 0 }
 0x87a   : > { %3912 = vmatpush3.bf16.xpose.msra.mxu0 %v1727_v24 }
 0x87c   : > { %v1704_v3 = vpop.permute.xlu1 %1703  ;;  %v1696_v40 = vpop.permute.xlu0 %1695 }
 0x87d   : > { %4070 = vmatprep.subr.msk.bf16.mxu0 %vm377_vm1, %v1704_v3  ;;  %v1724_v16 = vsel %vm377_vm1, %v1704_v3, 0 }
 0x87e   : > { %v4229_v25 = vpop.eup %4228 }
 0x87f   : > { %v1545_v28 = vmul.f32 %v4229_v25, %v4886_v43 }
 0x880   : > { %v1698_v50 = vpop.permute.xlu1 %1697  ;;  %v1700_v29 = vpop.permute.xlu0 %1699 }
 0x881   : > { %v1549_v39 = vpack.c.bf16 %v1545_v28, %v1545_v28 }
 0x882   : > { %3914 = vmatpush3.bf16.xpose.msra.mxu0 %v1724_v16  ;;  %v4231_v22 = vpop.eup %4230 }
 0x883   : > { %v1543_v6 = vmul.f32 %v4231_v22, %v4890_v19 }
 0x884   : > { %v1702_v46 = vpop.permute.xlu1 %1701 }
 0x886   : > { %v4233_v30 = vpop.eup %4232 }
 0x887   : > { %v1544_v26 = vmul.f32 %v4233_v30, %v4219_v33 }
 0x889   : > { %v1548_v37 = vpack.c.bf16 %v1544_v26, %v1543_v6 }
 0x88b   : > { %3903 = vmatprep.mubr.msk.bf16.mxu0 %vm473_vm3, %v1548_v37 }
 0x88c   : > { %3904 = vmatmul.mubr.msk.bf16.gmra.mxu0 %vm473_vm3, %v1549_v39 }
 0x88d   : > { %3915 = vmatprep.mubr.msk.bf16.mxu0 %vm377_vm1, %v1696_v40 }
 0x894   : > { %3916 = vmatmul.mubr.msk.bf16.vlgmr.msra.gmra.mxu0 %vm377_vm1, %v1698_v50 }
 0x895   : > { %3919 = vmatprep.mubr.msk.bf16.mxu0 %vm377_vm1, %v1700_v29 }
 0x89c   : > { %3920 = vmatmul.mubr.msk.bf16.gmra.mxu0 %vm377_vm1, %v1702_v46 }
 0x917   : > { %v4926_v43 = vpop.f32.mrf.mxu0 }
 0x919   : > { %v4928_v19 = vpop.f32.mrf.mxu0 }
 0x91b   : > { %v4930_v33 = vpop.f32.mrf.mxu0 }
 0x91d   : > { %v4932_v23 = vpop.f32.mrf.mxu0 }
 0x94c   : > { %v4934_v51 = vpop.f32.mrf.mxu0 }
 0x94e   : > { %v4936_v54 = vpop.f32.mrf.mxu0 }
 0x950   : > { %v3906_v56 = vpop.f32.mrf.mxu0 }
 0x952   : > { %v4938_v58 = vpop.f32.mrf.mxu0 }
 0x953   : > { %5527 = vst [vmem:[#allocation5_spill] sm:$0xff] %v4938_v58 }
 0x954   : > { %v3917_v59 = vpop.f32.mrf.mxu0 }
 0x955   : > { %v1801_v63 = vmul.f32 0.5, %v3917_v59 }
 0x956   : > { %v1769_v1 = vpop.f32.mrf.mxu0 }
 0x957   : > { %v1799_v2 = vmul.f32 0.5, %v1769_v1  ;;  %v1812_v4 = vsel %vm473_vm3, %v1801_v63, -inf }
 0x958   : > { %1813 = vmax.xlane.f32.xlu0 %v1812_v4  ;;  %v3918_v5 = vpop.f32.mrf.mxu0 }
 0x959   : > { %v1802_v8 = vmul.f32 0.5, %v3918_v5  ;;  %v1806_v31 = vsel %vm473_vm3, %v1799_v2, -inf }
 0x95a   : > { %v1772_v7 = vpop.f32.mrf.mxu0 }
 0x95b   : > { %v1800_v35 = vmul.f32 0.5, %v1772_v7  ;;  %v1815_v0 = vsel %vm473_vm3, %v1802_v8, -inf }
 0x95c   : > { %1807 = vmax.xlane.f32.xlu0 %v1806_v31  ;;  %v3921_v36 = vpop.f32.mrf.mxu0 }
 0x95d   : > { %v4942_v10 = vmul.f32 0.5, %v3921_v36  ;;  %v1809_v14 = vsel %vm473_vm3, %v1800_v35, -inf }
 0x95e   : > { %1810 = vmax.xlane.f32.xlu1 %v1809_v14  ;;  %v1785_v15 = vpop.f32.mrf.mxu0 }
 0x95f   : > { %v1803_v12 = vmul.f32 0.5, %v1785_v15  ;;  %v1824_v48 = vsel %vm492_vm4, %v4942_v10, -inf }
 0x960   : > { %1816 = vmax.xlane.f32.xlu0 %v1815_v0  ;;  %v3922_v13 = vpop.f32.mrf.mxu0 }
 0x961   : > { %v1818_v16 = vsel %vm473_vm3, %v1803_v12, -inf }
 0x962   : > { %1825 = vmax.xlane.f32.xlu1 %v1824_v48  ;;  %v1788_v24 = vpop.f32.mrf.mxu0 }
 0x963   : > { %v1804_v3 = vmul.f32 0.5, %v1788_v24 }
 0x965   : > { %v1821_v25 = vsel %vm473_vm3, %v1804_v3, -inf }
 0x966   : > { %1819 = vmax.xlane.f32.xlu1 %v1818_v16  ;;  %1822 = vmax.xlane.f32.xlu0 %v1821_v25 }
 0x977   : > { %1891 = vrot.lane.b32.xlu1 %v4512_v57, %s4400_s17 }
 0x97b   : > { %1889 = vrot.lane.b32.xlu1 %v4519_v60, %s4400_s17 }
 0x97c   : > { %1893 = vrot.lane.b32.xlu0 %v4504_v52, %s4400_s17 }
 0x97f   : > { %2046 = vrot.lane.b32.xlu1 %v4499_v47, %s4401_s20 }
 0x9e1   : > { %v1814_v22 = vpop.xlane.xlu0 %1813 }
 0x9e2   : > { %v1829_v30 = vsub.f32 %v1801_v63, %v1814_v22 }
 0x9e4   : > { %v1838_v28 = vmul.f32 1.442695, %v1829_v30 }
 0x9e5   : > { %v1808_v6 = vpop.xlane.xlu0 %1807 }
 0x9e6   : > { %4234 = vpow2.f32 %v1838_v28  ;;  %v1827_v26 = vsub.f32 %v1799_v2, %v1808_v6 }
 0x9e7   : > { %v1811_v37 = vpop.xlane.xlu1 %1810 }
 0x9e8   : > { %v1834_v39 = vmul.f32 1.442695, %v1827_v26  ;;  %v1828_v40 = vsub.f32 %v1800_v35, %v1811_v37 }
 0x9e9   : > { %v1817_v50 = vpop.xlane.xlu0 %1816 }
 0x9ea   : > { %4236 = vpow2.f32 %v1834_v39  ;;  %v1830_v29 = vsub.f32 %v1802_v8, %v1817_v50  ;;  %v1836_v56 = vmul.f32 1.442695, %v1828_v40 }
 0x9eb   : > { %v1826_v46 = vpop.xlane.xlu1 %1825 }
 0x9ec   : > { %v1840_v59 = vmul.f32 1.442695, %v1830_v29  ;;  %v1833_v48 = vsub.f32 %v4942_v10, %v1826_v46 }
 0x9ee   : > { %4238 = vpow2.f32 %v1840_v59  ;;  %v1846_v24 = vmul.f32 1.442695, %v1833_v48 }
 0x9ef   : > { %v1820_v1 = vpop.xlane.xlu1 %1819  ;;  %v1823_v4 = vpop.xlane.xlu0 %1822  ;;  %4240 = vpow2.f32 %v1836_v56 }
 0x9f0   : > { %v1831_v16 = vsub.f32 %v1803_v12, %v1820_v1  ;;  %4242 = vpow2.f32 %v1846_v24  ;;  %v1832_v22 = vsub.f32 %v1804_v3, %v1823_v4 }
 0x9f2   : > { %v1842_v25 = vmul.f32 1.442695, %v1831_v16  ;;  %v1844_v30 = vmul.f32 1.442695, %v1832_v22 }
 0x9f3   : > { %v4958_v5 = vpop.eup %4234  ;;  %v1894_v63 = vpop.permute.xlu0 %1893 }
 0x9f4   : > { %v1911_v7 = vand.u32 %v1894_v63, %v4502_v49  ;;  %v1854_v2 = vsel %vm473_vm3, %v4958_v5, 0.0  ;;  %v1892_v31 = vpop.permute.xlu1 %1891  ;;  %4244 = vpow2.f32 %v1842_v25 }
 0x9f5   : > { %1855 = vadd.xlane.f32.xlu0 %v1854_v2  ;;  %4246 = vpow2.f32 %v1844_v30 }
 0x9f6   : > { %3923 = vmatprep.subr.bf16.mxu1 %v1911_v7 }
 0x9f7   : > { %v4237_v35 = vpop.eup %4236  ;;  %3924 = vmatpush3.bf16.msra.mxu1 %v1911_v7 }
 0x9f8   : > { %3925 = vmatprep.subr.bf16.mxu1 %v1892_v31  ;;  %v1848_v8 = vsel %vm473_vm3, %v4237_v35, 0.0  ;;  %v1890_v14 = vpop.permute.xlu1 %1889 }
 0x9f9   : > { %1849 = vadd.xlane.f32.xlu0 %v1848_v8 }
 0x9fb   : > { %v4239_v36 = vpop.eup %4238  ;;  %3926 = vmatpush3.bf16.msra.mxu1 %v1892_v31 }
 0x9fc   : > { %3927 = vmatprep.subr.bf16.mxu1 %v1890_v14  ;;  %v1857_v15 = vsel %vm473_vm3, %v4239_v36, 0.0  ;;  %v4241_v0 = vpop.eup %4240  ;;  %v2047_v39 = vpop.permute.xlu1 %2046 }
 0x9fd   : > { %1858 = vadd.xlane.f32.xlu1 %v1857_v15  ;;  %v1851_v13 = vsel %vm473_vm3, %v4241_v0, 0.0  ;;  %v4971_v28 = vpop.eup %4242  ;;  %v2070_v15 = vsel %vm377_vm1, %v2047_v39, 0 }
 0x9fe   : > { %v1866_v6 = vsel %vm492_vm4, %v4971_v28, 0.0 }
 0x9ff   : > { %3928 = vmatpush3.bf16.msra.mxu1 %v1890_v14 }
 0xa01   : > { %1852 = vadd.xlane.f32.xlu1 %v1851_v13  ;;  %v4975_v26 = vpop.eup %4244 }
 0xa02   : > { %v1860_v37 = vsel %vm473_vm3, %v4975_v26, 0.0  ;;  %v4247_v10 = vpop.eup %4246 }
 0xa03   : > { %v1863_v12 = vsel %vm473_vm3, %v4247_v10, 0.0 }
 0xa0f   : > { %1887 = vrot.lane.b32.xlu0 %v4527_v62, %s4400_s17 }
 0xa12   : > { %2044 = vrot.lane.b32.xlu1 %v4495_v42, %s4401_s20 }
 0xa2e   : > { %1867 = vadd.xlane.f32.xlu0 %v1866_v6 }
 0xa32   : > { %1861 = vadd.xlane.f32.xlu0 %v1860_v37 }
 0xa36   : > { %1864 = vadd.xlane.f32.xlu1 %v1863_v12 }
 0xa47   : > { %2040 = vrot.lane.b32.xlu1 %v4485_v27, %s4401_s20 }
 0xa48   : > { %2042 = vrot.lane.b32.xlu0 %v4489_v34, %s4401_s20 }
 0xa4b   : > { %2034 = vrot.lane.b32.xlu1 %v4489_v34, %s4402_s21 }
 0xa4c   : > { %2032 = vrot.lane.b32.xlu0 %v4485_v27, %s4402_s21 }
 0xa4f   : > { %2038 = vrot.lane.b32.xlu1 %v4499_v47, %s4402_s21 }
 0xa50   : > { %2036 = vrot.lane.b32.xlu0 %v4495_v42, %s4402_s21 }
 0xa7e   : > { %v1856_v3 = vpop.xlane.xlu0 %1855 }
 0xa82   : > { %v1850_v40 = vpop.xlane.xlu0 %1849 }
 0xa86   : > { %v1859_v50 = vpop.xlane.xlu1 %1858  ;;  %v1888_v29 = vpop.permute.xlu0 %1887 }
 0xa87   : > { %3929 = vmatprep.subr.bf16.mxu1 %v1888_v29  ;;  %4248 = vrcp.f32 %v1859_v50 }
 0xa88   : > { %3930 = vmatpush3.bf16.msra.mxu1 %v1888_v29  ;;  %4250 = vrcp.f32 %v1850_v40 }
 0xa89   : > { %4071 = vmatprep.subr.msk.bf16.mxu1 %vm377_vm1, %v2047_v39  ;;  %4252 = vrcp.f32 %v1856_v3 }
 0xa8a   : > { %v1853_v46 = vpop.xlane.xlu1 %1852 }
 0xa8b   : > { %4254 = vrcp.f32 %v1853_v46 }
 0xa8e   : > { %v2045_v13 = vpop.permute.xlu1 %2044 }
 0xa8f   : > { %v2067_v48 = vsel %vm377_vm1, %v2045_v13, 0 }
 0xa94   : > { %v4249_v56 = vpop.eup %4248 }
 0xa95   : > { %v4251_v59 = vpop.eup %4250  ;;  %v1879_v63 = vmul.f32 %v4249_v56, %v4239_v36 }
 0xa96   : > { %v4253_v1 = vpop.eup %4252  ;;  %v1876_v7 = vmul.f32 %v4251_v59, %v4237_v35 }
 0xa97   : > { %v1878_v31 = vmul.f32 %v4253_v1, %v4958_v5 }
 0xa98   : > { %v4255_v4 = vpop.eup %4254 }
 0xa99   : > { %v1877_v2 = vmul.f32 %v4255_v4, %v4241_v0  ;;  %v1884_v14 = vpack.c.bf16 %v1879_v63, %v1878_v31 }
 0xa9b   : > { %v1883_v8 = vpack.c.bf16 %v1877_v2, %v1876_v7 }
 0xa9d   : > { %3931 = vmatprep.mubr.msk.bf16.mxu1 %vm473_vm3, %v1883_v8 }
 0xa9e   : > { %3932 = vmatmul.mubr.msk.bf16.vlgmr.msra.gmra.mxu1 %vm473_vm3, %v1884_v14 }
 0xa9f   : > { %3940 = vmatpush3.bf16.xpose.msra.mxu1 %v2070_v15 }
 0xaa0   : > { %4072 = vmatprep.subr.msk.bf16.mxu1 %vm377_vm1, %v2045_v13 }
 0xaa7   : > { %3942 = vmatpush3.bf16.xpose.msra.mxu1 %v2067_v48 }
 0xab7   : > { %v1868_v36 = vpop.xlane.xlu0 %1867 }
 0xab8   : > { %4256 = vrcp.f32 %v1868_v36 }
 0xabb   : > { %v1862_v35 = vpop.xlane.xlu0 %1861 }
 0xabc   : > { %4258 = vrcp.f32 %v1862_v35 }
 0xabf   : > { %v1865_v5 = vpop.xlane.xlu1 %1864  ;;  %v2043_v0 = vpop.permute.xlu0 %2042 }
 0xac0   : > { %4260 = vrcp.f32 %v1865_v5  ;;  %4073 = vmatprep.subr.msk.bf16.mxu1 %vm377_vm1, %v2043_v0  ;;  %v2064_v24 = vsel %vm377_vm1, %v2043_v0, 0 }
 0xac1   : > { %3944 = vmatpush3.bf16.xpose.msra.mxu1 %v2064_v24 }
 0xac3   : > { %v2041_v16 = vpop.permute.xlu1 %2040  ;;  %v2033_v50 = vpop.permute.xlu0 %2032 }
 0xac4   : > { %4074 = vmatprep.subr.msk.bf16.mxu1 %vm377_vm1, %v2041_v16  ;;  %v2061_v25 = vsel %vm377_vm1, %v2041_v16, 0 }
 0xac5   : > { %v4257_v22 = vpop.eup %4256 }
 0xac6   : > { %v1882_v37 = vmul.f32 %v4257_v22, %v4971_v28 }
 0xac7   : > { %v2035_v29 = vpop.permute.xlu1 %2034  ;;  %v2037_v46 = vpop.permute.xlu0 %2036 }
 0xac8   : > { %v1886_v40 = vpack.c.bf16 %v1882_v37, %v1882_v37 }
 0xac9   : > { %3946 = vmatpush3.bf16.xpose.msra.mxu1 %v2061_v25  ;;  %v4259_v30 = vpop.eup %4258 }
 0xaca   : > { %v1880_v12 = vmul.f32 %v4259_v30, %v4975_v26 }
 0xacb   : > { %v2039_v56 = vpop.permute.xlu1 %2038 }
 0xacd   : > { %v4261_v6 = vpop.eup %4260 }
 0xace   : > { %v1881_v3 = vmul.f32 %v4261_v6, %v4247_v10 }
 0xad0   : > { %v1885_v39 = vpack.c.bf16 %v1881_v3, %v1880_v12 }
 0xad2   : > { %3935 = vmatprep.mubr.msk.bf16.mxu1 %vm473_vm3, %v1885_v39 }
 0xad3   : > { %3936 = vmatmul.mubr.msk.bf16.gmra.mxu1 %vm473_vm3, %v1886_v40 }
 0xad4   : > { %3947 = vmatprep.mubr.msk.bf16.mxu1 %vm377_vm1, %v2033_v50 }
 0xadb   : > { %3948 = vmatmul.mubr.msk.bf16.vlgmr.msra.gmra.mxu1 %vm377_vm1, %v2035_v29 }
 0xadc   : > { %3951 = vmatprep.mubr.msk.bf16.mxu1 %vm377_vm1, %v2037_v46 }
 0xae3   : > { %3952 = vmatmul.mubr.msk.bf16.gmra.mxu1 %vm377_vm1, %v2039_v56 }
 0xb5e   : > { %v5011_v28 = vpop.f32.mrf.mxu1 }
 0xb60   : > { %v5013_v26 = vpop.f32.mrf.mxu1 }
 0xb62   : > { %v5015_v10 = vpop.f32.mrf.mxu1 }
 0xb64   : > { %v5017_v59 = vpop.f32.mrf.mxu1 }
 0xb93   : > { %v5019_v1 = vpop.f32.mrf.mxu1 }
 0xb95   : > { %v5021_v4 = vpop.f32.mrf.mxu1 }
 0xb97   : > { %v3938_v63 = vpop.f32.mrf.mxu1 }
 0xb99   : > { %v5023_v7 = vpop.f32.mrf.mxu1 }
 0xb9a   : > { %5528 = vst [vmem:[#allocation6_spill] sm:$0xff] %v5023_v7 }
 0xb9b   : > { %v3949_v2 = vpop.f32.mrf.mxu1 }
 0xb9c   : > { %v2138_v31 = vmul.f32 0.5, %v3949_v2 }
 0xb9d   : > { %v2106_v8 = vpop.f32.mrf.mxu1 }
 0xb9e   : > { %v2136_v14 = vmul.f32 0.5, %v2106_v8  ;;  %v2149_v15 = vsel %vm473_vm3, %v2138_v31, -inf }
 0xb9f   : > { %2150 = vmax.xlane.f32.xlu0 %v2149_v15  ;;  %v3950_v13 = vpop.f32.mrf.mxu1 }
 0xba0   : > { %v2139_v36 = vmul.f32 0.5, %v3950_v13  ;;  %v2143_v5 = vsel %vm473_vm3, %v2136_v14, -inf }
 0xba1   : > { %v2109_v48 = vpop.f32.mrf.mxu1 }
 0xba2   : > { %v2137_v35 = vmul.f32 0.5, %v2109_v48  ;;  %v2152_v22 = vsel %vm473_vm3, %v2139_v36, -inf }
 0xba3   : > { %2144 = vmax.xlane.f32.xlu0 %v2143_v5  ;;  %v3953_v0 = vpop.f32.mrf.mxu1 }
 0xba4   : > { %v5027_v24 = vmul.f32 0.5, %v3953_v0  ;;  %v2146_v16 = vsel %vm473_vm3, %v2137_v35, -inf }
 0xba5   : > { %2147 = vmax.xlane.f32.xlu1 %v2146_v16  ;;  %v2122_v25 = vpop.f32.mrf.mxu1 }
 0xba6   : > { %v2140_v6 = vmul.f32 0.5, %v2122_v25  ;;  %v2161_v37 = vsel %vm492_vm4, %v5027_v24, -inf }
 0xba7   : > { %2153 = vmax.xlane.f32.xlu0 %v2152_v22  ;;  %v3954_v30 = vpop.f32.mrf.mxu1 }
 0xba8   : > { %v2155_v39 = vsel %vm473_vm3, %v2140_v6, -inf }
 0xba9   : > { %2162 = vmax.xlane.f32.xlu1 %v2161_v37  ;;  %v2125_v12 = vpop.f32.mrf.mxu1 }
 0xbaa   : > { %v2141_v3 = vmul.f32 0.5, %v2125_v12 }
 0xbac   : > { %v2158_v40 = vsel %vm473_vm3, %v2141_v3, -inf }
 0xbad   : > { %2156 = vmax.xlane.f32.xlu1 %v2155_v39  ;;  %2159 = vmax.xlane.f32.xlu0 %v2158_v40 }
 0xbbe   : > { %2228 = vrot.lane.b32.xlu1 %v4512_v57, %s4402_s21 }
 0xbc2   : > { %2226 = vrot.lane.b32.xlu1 %v4519_v60, %s4402_s21 }
 0xbc3   : > { %2230 = vrot.lane.b32.xlu0 %v4504_v52, %s4402_s21 }
 0xbc6   : > { %2383 = vrot.lane.b32.xlu1 %v4499_v47, %s4403_s22 }
 0xc28   : > { %v2151_v50 = vpop.xlane.xlu0 %2150 }
 0xc29   : > { %v2166_v29 = vsub.f32 %v2138_v31, %v2151_v50 }
 0xc2b   : > { %v2175_v46 = vmul.f32 1.442695, %v2166_v29 }
 0xc2c   : > { %v2145_v56 = vpop.xlane.xlu0 %2144 }
 0xc2d   : > { %4262 = vpow2.f32 %v2175_v46  ;;  %v2164_v63 = vsub.f32 %v2136_v14, %v2145_v56 }
 0xc2e   : > { %v2148_v2 = vpop.xlane.xlu1 %2147 }
 0xc2f   : > { %v2171_v8 = vmul.f32 1.442695, %v2164_v63  ;;  %v2165_v15 = vsub.f32 %v2137_v35, %v2148_v2 }
 0xc30   : > { %v2154_v13 = vpop.xlane.xlu0 %2153 }
 0xc31   : > { %4264 = vpow2.f32 %v2171_v8  ;;  %v2167_v48 = vsub.f32 %v2139_v36, %v2154_v13  ;;  %v2173_v0 = vmul.f32 1.442695, %v2165_v15 }
 0xc32   : > { %v2163_v5 = vpop.xlane.xlu1 %2162 }
 0xc33   : > { %v2177_v16 = vmul.f32 1.442695, %v2167_v48  ;;  %v2170_v56 = vsub.f32 %v5027_v24, %v2163_v5 }
 0xc35   : > { %4266 = vpow2.f32 %v2177_v16  ;;  %v2183_v63 = vmul.f32 1.442695, %v2170_v56 }
 0xc36   : > { %v2157_v25 = vpop.xlane.xlu1 %2156  ;;  %v2160_v22 = vpop.xlane.xlu0 %2159  ;;  %4268 = vpow2.f32 %v2173_v0 }
 0xc37   : > { %v2168_v2 = vsub.f32 %v2140_v6, %v2157_v25  ;;  %4270 = vpow2.f32 %v2183_v63  ;;  %v2169_v15 = vsub.f32 %v2141_v3, %v2160_v22 }
 0xc39   : > { %v2179_v8 = vmul.f32 1.442695, %v2168_v2  ;;  %v2181_v13 = vmul.f32 1.442695, %v2169_v15 }
 0xc3a   : > { %v5043_v30 = vpop.eup %4262  ;;  %v2231_v31 = vpop.permute.xlu0 %2230 }
 0xc3b   : > { %v2248_v37 = vand.u32 %v2231_v31, %v4502_v49  ;;  %v2191_v14 = vsel %vm473_vm3, %v5043_v30, 0.0  ;;  %v2229_v12 = vpop.permute.xlu1 %2228  ;;  %4272 = vpow2.f32 %v2179_v8 }
 0xc3c   : > { %2192 = vadd.xlane.f32.xlu0 %v2191_v14  ;;  %4274 = vpow2.f32 %v2181_v13 }
 0xc3d   : > { %3955 = vmatprep.subr.bf16.mxu0 %v2248_v37 }
 0xc3e   : > { %v4265_v35 = vpop.eup %4264  ;;  %3956 = vmatpush3.bf16.msra.mxu0 %v2248_v37 }
 0xc3f   : > { %3957 = vmatprep.subr.bf16.mxu0 %v2229_v12  ;;  %v2185_v36 = vsel %vm473_vm3, %v4265_v35, 0.0  ;;  %v2227_v40 = vpop.permute.xlu1 %2226 }
 0xc40   : > { %2186 = vadd.xlane.f32.xlu0 %v2185_v36 }
 0xc42   : > { %v4267_v39 = vpop.eup %4266  ;;  %3958 = vmatpush3.bf16.msra.mxu0 %v2229_v12 }
 0xc43   : > { %3959 = vmatprep.subr.bf16.mxu0 %v2227_v40  ;;  %v2194_v50 = vsel %vm473_vm3, %v4267_v39, 0.0  ;;  %v4269_v29 = vpop.eup %4268  ;;  %v2384_v5 = vpop.permute.xlu1 %2383 }
 0xc44   : > { %2195 = vadd.xlane.f32.xlu1 %v2194_v50  ;;  %v2188_v46 = vsel %vm473_vm3, %v4269_v29, 0.0  ;;  %v5056_v48 = vpop.eup %4270  ;;  %v2407_v13 = vsel %vm377_vm1, %v2384_v5, 0 }
 0xc45   : > { %v2203_v0 = vsel %vm492_vm4, %v5056_v48, 0.0 }
 0xc46   : > { %3960 = vmatpush3.bf16.msra.mxu0 %v2227_v40 }
 0xc48   : > { %2189 = vadd.xlane.f32.xlu1 %v2188_v46  ;;  %v5060_v16 = vpop.eup %4272 }
 0xc49   : > { %v2197_v31 = vsel %vm473_vm3, %v5060_v16, 0.0  ;;  %v4275_v24 = vpop.eup %4274 }
 0xc4a   : > { %v2200_v6 = vsel %vm473_vm3, %v4275_v24, 0.0 }
 0xc56   : > { %2224 = vrot.lane.b32.xlu0 %v4527_v62, %s4402_s21 }
 0xc59   : > { %2381 = vrot.lane.b32.xlu1 %v4495_v42, %s4403_s22 }
 0xc75   : > { %2204 = vadd.xlane.f32.xlu0 %v2203_v0 }
 0xc79   : > { %2198 = vadd.xlane.f32.xlu0 %v2197_v31 }
 0xc7d   : > { %2201 = vadd.xlane.f32.xlu1 %v2200_v6 }
 0xc8e   : > { %2377 = vrot.lane.b32.xlu1 %v4485_v27, %s4403_s22 }
 0xc8f   : > { %2379 = vrot.lane.b32.xlu0 %v4489_v34, %s4403_s22 }
 0xc92   : > { %2371 = vrot.lane.b32.xlu1 %v4489_v34, %s4404_s23 }
 0xc93   : > { %2369 = vrot.lane.b32.xlu0 %v4485_v27, %s4404_s23 }
 0xc96   : > { %2375 = vrot.lane.b32.xlu1 %v4499_v47, %s4404_s23 }
 0xc97   : > { %2373 = vrot.lane.b32.xlu0 %v4495_v42, %s4404_s23 }
 0xcc5   : > { %v2193_v3 = vpop.xlane.xlu0 %2192 }
 0xcc9   : > { %v2187_v25 = vpop.xlane.xlu0 %2186 }
 0xccd   : > { %v2196_v22 = vpop.xlane.xlu1 %2195  ;;  %v2225_v37 = vpop.permute.xlu0 %2224 }
 0xcce   : > { %3961 = vmatprep.subr.bf16.mxu0 %v2225_v37  ;;  %4276 = vrcp.f32 %v2196_v22 }
 0xccf   : > { %3962 = vmatpush3.bf16.msra.mxu0 %v2225_v37  ;;  %4278 = vrcp.f32 %v2187_v25 }
 0xcd0   : > { %4075 = vmatprep.subr.msk.bf16.mxu0 %vm377_vm1, %v2384_v5  ;;  %4280 = vrcp.f32 %v2193_v3 }
 0xcd1   : > { %v2190_v14 = vpop.xlane.xlu1 %2189 }
 0xcd2   : > { %4282 = vrcp.f32 %v2190_v14 }
 0xcd5   : > { %v2382_v0 = vpop.permute.xlu1 %2381 }
 0xcd6   : > { %v2404_v31 = vsel %vm377_vm1, %v2382_v0, 0 }
 0xcdb   : > { %v4277_v12 = vpop.eup %4276 }
 0xcdc   : > { %v4279_v36 = vpop.eup %4278  ;;  %v2216_v46 = vmul.f32 %v4277_v12, %v4267_v39 }
 0xcdd   : > { %v4281_v40 = vpop.eup %4280  ;;  %v2213_v56 = vmul.f32 %v4279_v36, %v4265_v35 }
 0xcde   : > { %v2215_v2 = vmul.f32 %v4281_v40, %v5043_v30 }
 0xcdf   : > { %v4283_v50 = vpop.eup %4282 }
 0xce0   : > { %v2214_v63 = vmul.f32 %v4283_v50, %v4269_v29  ;;  %v2221_v15 = vpack.c.bf16 %v2216_v46, %v2215_v2 }
 0xce2   : > { %v2220_v8 = vpack.c.bf16 %v2214_v63, %v2213_v56 }
 0xce4   : > { %3963 = vmatprep.mubr.msk.bf16.mxu0 %vm473_vm3, %v2220_v8 }
 0xce5   : > { %3964 = vmatmul.mubr.msk.bf16.vlgmr.msra.gmra.mxu0 %vm473_vm3, %v2221_v15 }
 0xce6   : > { %3972 = vmatpush3.bf16.xpose.msra.mxu0 %v2407_v13 }
 0xce7   : > { %4076 = vmatprep.subr.msk.bf16.mxu0 %vm377_vm1, %v2382_v0 }
 0xcee   : > { %3974 = vmatpush3.bf16.xpose.msra.mxu0 %v2404_v31 }
 0xcfe   : > { %v2205_v39 = vpop.xlane.xlu0 %2204 }
 0xcff   : > { %4284 = vrcp.f32 %v2205_v39 }
 0xd02   : > { %v2199_v35 = vpop.xlane.xlu0 %2198 }
 0xd03   : > { %4286 = vrcp.f32 %v2199_v35 }
 0xd06   : > { %v2202_v30 = vpop.xlane.xlu1 %2201  ;;  %v2380_v29 = vpop.permute.xlu0 %2379 }
 0xd07   : > { %4288 = vrcp.f32 %v2202_v30  ;;  %4077 = vmatprep.subr.msk.bf16.mxu0 %vm377_vm1, %v2380_v29  ;;  %v2401_v6 = vsel %vm377_vm1, %v2380_v29, 0 }
 0xd08   : > { %3976 = vmatpush3.bf16.xpose.msra.mxu0 %v2401_v6 }
 0xd0a   : > { %v2378_v3 = vpop.permute.xlu1 %2377  ;;  %v2370_v46 = vpop.permute.xlu0 %2369 }
 0xd0b   : > { %4078 = vmatprep.subr.msk.bf16.mxu0 %vm377_vm1, %v2378_v3  ;;  %v2398_v5 = vsel %vm377_vm1, %v2378_v3, 0 }
 0xd0c   : > { %v4285_v25 = vpop.eup %4284 }
 0xd0d   : > { %v2219_v14 = vmul.f32 %v4285_v25, %v5056_v48 }
 0xd0e   : > { %v2372_v56 = vpop.permute.xlu1 %2371  ;;  %v2374_v63 = vpop.permute.xlu0 %2373 }
 0xd0f   : > { %v2223_v50 = vpack.c.bf16 %v2219_v14, %v2219_v14 }
 0xd10   : > { %3978 = vmatpush3.bf16.xpose.msra.mxu0 %v2398_v5  ;;  %v4287_v22 = vpop.eup %4286 }
 0xd11   : > { %v2217_v12 = vmul.f32 %v4287_v22, %v5060_v16 }
 0xd12   : > { %v2376_v2 = vpop.permute.xlu1 %2375 }
 0xd14   : > { %v4289_v37 = vpop.eup %4288 }
 0xd15   : > { %v2218_v36 = vmul.f32 %v4289_v37, %v4275_v24 }
 0xd17   : > { %v2222_v40 = vpack.c.bf16 %v2218_v36, %v2217_v12 }
 0xd19   : > { %3967 = vmatprep.mubr.msk.bf16.mxu0 %vm473_vm3, %v2222_v40 }
 0xd1a   : > { %3968 = vmatmul.mubr.msk.bf16.gmra.mxu0 %vm473_vm3, %v2223_v50 }
 0xd1b   : > { %3979 = vmatprep.mubr.msk.bf16.mxu0 %vm377_vm1, %v2370_v46 }
 0xd22   : > { %3980 = vmatmul.mubr.msk.bf16.vlgmr.msra.gmra.mxu0 %vm377_vm1, %v2372_v56 }
 0xd23   : > { %3983 = vmatprep.mubr.msk.bf16.mxu0 %vm377_vm1, %v2374_v63 }
 0xd2a   : > { %3984 = vmatmul.mubr.msk.bf16.gmra.mxu0 %vm377_vm1, %v2376_v2 }
 0xda5   : > { %v5096_v48 = vpop.f32.mrf.mxu0 }
 0xda7   : > { %v5098_v16 = vpop.f32.mrf.mxu0 }
 0xda9   : > { %v5100_v24 = vpop.f32.mrf.mxu0 }
 0xdab   : > { %v5102_v8 = vpop.f32.mrf.mxu0 }
 0xdda   : > { %v5104_v15 = vpop.f32.mrf.mxu0 }
 0xddc   : > { %v5106_v13 = vpop.f32.mrf.mxu0 }
 0xdde   : > { %v3970_v0 = vpop.f32.mrf.mxu0 }
 0xde0   : > { %v5108_v31 = vpop.f32.mrf.mxu0 }
 0xde1   : > { %5529 = vst [vmem:[#allocation7_spill] sm:$0xff] %v5108_v31 }
 0xde2   : > { %v3981_v39 = vpop.f32.mrf.mxu0 }
 0xde3   : > { %v2475_v35 = vmul.f32 0.5, %v3981_v39 }
 0xde4   : > { %v2443_v30 = vpop.f32.mrf.mxu0 }
 0xde5   : > { %v2473_v29 = vmul.f32 0.5, %v2443_v30  ;;  %v2486_v6 = vsel %vm473_vm3, %v2475_v35, -inf }
 0xde6   : > { %2487 = vmax.xlane.f32.xlu0 %v2486_v6  ;;  %v3982_v3 = vpop.f32.mrf.mxu0 }
 0xde7   : > { %v2476_v25 = vmul.f32 0.5, %v3982_v3  ;;  %v2480_v37 = vsel %vm473_vm3, %v2473_v29, -inf }
 0xde8   : > { %v2446_v5 = vpop.f32.mrf.mxu0 }
 0xde9   : > { %v2474_v22 = vmul.f32 0.5, %v2446_v5  ;;  %v2489_v50 = vsel %vm473_vm3, %v2476_v25, -inf }
 0xdea   : > { %2481 = vmax.xlane.f32.xlu0 %v2480_v37  ;;  %v3985_v14 = vpop.f32.mrf.mxu0 }
 0xdeb   : > { %v5112_v12 = vmul.f32 0.5, %v3985_v14  ;;  %v2483_v36 = vsel %vm473_vm3, %v2474_v22, -inf }
 0xdec   : > { %2484 = vmax.xlane.f32.xlu1 %v2483_v36  ;;  %v2459_v40 = vpop.f32.mrf.mxu0 }
 0xded   : > { %v2477_v56 = vmul.f32 0.5, %v2459_v40  ;;  %v2498_v63 = vsel %vm492_vm4, %v5112_v12, -inf }
 0xdee   : > { %2490 = vmax.xlane.f32.xlu0 %v2489_v50  ;;  %v3986_v46 = vpop.f32.mrf.mxu0 }
 0xdef   : > { %v2492_v39 = vsel %vm473_vm3, %v2477_v56, -inf }
 0xdf0   : > { %2499 = vmax.xlane.f32.xlu1 %v2498_v63  ;;  %v2462_v2 = vpop.f32.mrf.mxu0 }
 0xdf1   : > { %v2478_v0 = vmul.f32 0.5, %v2462_v2 }
 0xdf3   : > { %v2495_v30 = vsel %vm473_vm3, %v2478_v0, -inf }
 0xdf4   : > { %2493 = vmax.xlane.f32.xlu1 %v2492_v39  ;;  %2496 = vmax.xlane.f32.xlu0 %v2495_v30 }
 0xe05   : > { %2565 = vrot.lane.b32.xlu1 %v4512_v57, %s4404_s23 }
 0xe09   : > { %2563 = vrot.lane.b32.xlu1 %v4519_v60, %s4404_s23 }
 0xe0a   : > { %2567 = vrot.lane.b32.xlu0 %v4504_v52, %s4404_s23 }
 0xe0d   : > { %2720 = vrot.lane.b32.xlu1 %v4499_v47, %s4405_s24 }
 0xe6f   : > { %v2488_v6 = vpop.xlane.xlu0 %2487 }
 0xe70   : > { %v2503_v3 = vsub.f32 %v2475_v35, %v2488_v6 }
 0xe72   : > { %v2512_v5 = vmul.f32 1.442695, %v2503_v3 }
 0xe73   : > { %v2482_v37 = vpop.xlane.xlu0 %2481 }
 0xe74   : > { %4290 = vpow2.f32 %v2512_v5  ;;  %v2501_v14 = vsub.f32 %v2473_v29, %v2482_v37 }
 0xe75   : > { %v2485_v36 = vpop.xlane.xlu1 %2484 }
 0xe76   : > { %v2508_v40 = vmul.f32 1.442695, %v2501_v14  ;;  %v2502_v50 = vsub.f32 %v2474_v22, %v2485_v36 }
 0xe77   : > { %v2491_v46 = vpop.xlane.xlu0 %2490 }
 0xe78   : > { %4292 = vpow2.f32 %v2508_v40  ;;  %v2504_v63 = vsub.f32 %v2476_v25, %v2491_v46  ;;  %v2510_v39 = vmul.f32 1.442695, %v2502_v50 }
 0xe79   : > { %v2500_v2 = vpop.xlane.xlu1 %2499 }
 0xe7a   : > { %v2514_v30 = vmul.f32 1.442695, %v2504_v63  ;;  %v2507_v50 = vsub.f32 %v5112_v12, %v2500_v2 }
 0xe7c   : > { %4294 = vpow2.f32 %v2514_v30  ;;  %v2520_v46 = vmul.f32 1.442695, %v2507_v50 }
 0xe7d   : > { %v2494_v31 = vpop.xlane.xlu1 %2493  ;;  %v2497_v7 = vpop.xlane.xlu0 %2496  ;;  %4296 = vpow2.f32 %v2510_v39 }
 0xe7e   : > { %v2505_v63 = vsub.f32 %v2477_v56, %v2494_v31  ;;  %4298 = vpow2.f32 %v2520_v46  ;;  %v2506_v30 = vsub.f32 %v2478_v0, %v2497_v7 }
 0xe80   : > { %v2516_v39 = vmul.f32 1.442695, %v2505_v63 }
 0xe81   : > { %v5128_v58 = vpop.eup %4290  ;;  %v2568_v35 = vpop.permute.xlu0 %2567 }
 0xe82   : > { %v2585_v6 = vand.u32 %v2568_v35, %v4502_v49  ;;  %v2528_v29 = vsel %vm473_vm3, %v5128_v58, 0.0  ;;  %v2566_v3 = vpop.permute.xlu1 %2565  ;;  %4300 = vpow2.f32 %v2516_v39  ;;  %v2518_v35 = vmul.f32 1.442695, %v2506_v30 }
 0xe83   : > { %2529 = vadd.xlane.f32.xlu0 %v2528_v29 }
 0xe84   : > { %3987 = vmatprep.subr.bf16.mxu1 %v2585_v6  ;;  %4302 = vpow2.f32 %v2518_v35 }
 0xe85   : > { %v4293_v22 = vpop.eup %4292  ;;  %3988 = vmatpush3.bf16.msra.mxu1 %v2585_v6 }
 0xe86   : > { %3989 = vmatprep.subr.bf16.mxu1 %v2566_v3  ;;  %v2522_v25 = vsel %vm473_vm3, %v4293_v22, 0.0  ;;  %v2564_v37 = vpop.permute.xlu1 %2563 }
 0xe87   : > { %2523 = vadd.xlane.f32.xlu0 %v2522_v25 }
 0xe89   : > { %v4295_v5 = vpop.eup %4294  ;;  %3990 = vmatpush3.bf16.msra.mxu1 %v2566_v3 }
 0xe8a   : > { %3991 = vmatprep.subr.bf16.mxu1 %v2564_v37  ;;  %v2531_v14 = vsel %vm473_vm3, %v4295_v5, 0.0  ;;  %v4297_v36 = vpop.eup %4296  ;;  %v2721_v56 = vpop.permute.xlu1 %2720 }
 0xe8b   : > { %2532 = vadd.xlane.f32.xlu1 %v2531_v14  ;;  %v2525_v40 = vsel %vm473_vm3, %v4297_v36, 0.0  ;;  %v5141_v6 = vpop.eup %4298  ;;  %v2744_v35 = vsel %vm377_vm1, %v2721_v56, 0 }
 0xe8c   : > { %v2540_v29 = vsel %vm492_vm4, %v5141_v6, 0.0 }
 0xe8d   : > { %3992 = vmatpush3.bf16.msra.mxu1 %v2564_v37 }
 0xe8f   : > { %2526 = vadd.xlane.f32.xlu1 %v2525_v40  ;;  %v5145_v3 = vpop.eup %4300 }
 0xe90   : > { %v2534_v25 = vsel %vm473_vm3, %v5145_v3, 0.0 }
 0xe91   : > { %v4303_v12 = vpop.eup %4302 }
 0xe92   : > { %v2537_v31 = vsel %vm473_vm3, %v4303_v12, 0.0 }
 0xe9d   : > { %2561 = vrot.lane.b32.xlu0 %v4527_v62, %s4404_s23 }
 0xea0   : > { %2718 = vrot.lane.b32.xlu1 %v4495_v42, %s4405_s24 }
 0xebc   : > { %2541 = vadd.xlane.f32.xlu0 %v2540_v29 }
 0xec0   : > { %2535 = vadd.xlane.f32.xlu0 %v2534_v25 }
 0xec4   : > { %2538 = vadd.xlane.f32.xlu1 %v2537_v31 }
 0xed5   : > { %2714 = vrot.lane.b32.xlu1 %v4485_v27, %s4405_s24 }
 0xed6   : > { %2716 = vrot.lane.b32.xlu0 %v4489_v34, %s4405_s24 }
 0xed9   : > { %2708 = vrot.lane.b32.xlu1 %v4489_v34, %s4406_s25 }
 0xeda   : > { %2706 = vrot.lane.b32.xlu0 %v4485_v27, %s4406_s25 }
 0xedd   : > { %2712 = vrot.lane.b32.xlu1 %v4499_v47, %s4406_s25 }
 0xede   : > { %2710 = vrot.lane.b32.xlu0 %v4495_v42, %s4406_s25 }
 0xf0c   : > { %v2530_v7 = vpop.xlane.xlu0 %2529 }
 0xf10   : > { %v2524_v0 = vpop.xlane.xlu0 %2523 }
 0xf14   : > { %v2533_v2 = vpop.xlane.xlu1 %2532  ;;  %v2562_v37 = vpop.permute.xlu0 %2561 }
 0xf15   : > { %3993 = vmatprep.subr.bf16.mxu1 %v2562_v37  ;;  %4304 = vrcp.f32 %v2533_v2 }
 0xf16   : > { %3994 = vmatpush3.bf16.msra.mxu1 %v2562_v37  ;;  %4306 = vrcp.f32 %v2524_v0 }
 0xf17   : > { %4079 = vmatprep.subr.msk.bf16.mxu1 %vm377_vm1, %v2721_v56  ;;  %4308 = vrcp.f32 %v2530_v7 }
 0xf18   : > { %v2527_v34 = vpop.xlane.xlu1 %2526 }
 0xf19   : > { %4310 = vrcp.f32 %v2527_v34 }
 0xf1c   : > { %v2719_v29 = vpop.permute.xlu1 %2718 }
 0xf1d   : > { %v2741_v25 = vsel %vm377_vm1, %v2719_v29, 0 }
 0xf22   : > { %v4305_v27 = vpop.eup %4304 }
 0xf23   : > { %v4307_v14 = vpop.eup %4306  ;;  %v2553_v50 = vmul.f32 %v4305_v27, %v4295_v5 }
 0xf24   : > { %v4309_v47 = vpop.eup %4308  ;;  %v2550_v42 = vmul.f32 %v4307_v14, %v4293_v22 }
 0xf25   : > { %v2552_v63 = vmul.f32 %v4309_v47, %v5128_v58 }
 0xf26   : > { %v4311_v40 = vpop.eup %4310 }
 0xf27   : > { %v2551_v46 = vmul.f32 %v4311_v40, %v4297_v36  ;;  %v2558_v30 = vpack.c.bf16 %v2553_v50, %v2552_v63 }
 0xf29   : > { %v2557_v39 = vpack.c.bf16 %v2551_v46, %v2550_v42 }
 0xf2b   : > { %3995 = vmatprep.mubr.msk.bf16.mxu1 %vm473_vm3, %v2557_v39 }
 0xf2c   : > { %3996 = vmatmul.mubr.msk.bf16.vlgmr.msra.gmra.mxu1 %vm473_vm3, %v2558_v30 }
 0xf2d   : > { %4004 = vmatpush3.bf16.xpose.msra.mxu1 %v2744_v35 }
 0xf2e   : > { %4080 = vmatprep.subr.msk.bf16.mxu1 %vm377_vm1, %v2719_v29 }
 0xf35   : > { %4006 = vmatpush3.bf16.xpose.msra.mxu1 %v2741_v25 }
 0xf45   : > { %v2542_v5 = vpop.xlane.xlu0 %2541 }
 0xf46   : > { %4312 = vrcp.f32 %v2542_v5 }
 0xf49   : > { %v2536_v22 = vpop.xlane.xlu0 %2535 }
 0xf4a   : > { %4314 = vrcp.f32 %v2536_v22 }
 0xf4d   : > { %v2539_v58 = vpop.xlane.xlu1 %2538  ;;  %v2717_v36 = vpop.permute.xlu0 %2716 }
 0xf4e   : > { %4316 = vrcp.f32 %v2539_v58  ;;  %v2738_v31 = vsel %vm377_vm1, %v2717_v36, 0  ;;  %4081 = vmatprep.subr.msk.bf16.mxu1 %vm377_vm1, %v2717_v36 }
 0xf4f   : > { %4008 = vmatpush3.bf16.xpose.msra.mxu1 %v2738_v31 }
 0xf51   : > { %v2715_v7 = vpop.permute.xlu1 %2714  ;;  %v2707_v50 = vpop.permute.xlu0 %2706 }
 0xf52   : > { %4082 = vmatprep.subr.msk.bf16.mxu1 %vm377_vm1, %v2715_v7  ;;  %v2735_v56 = vsel %vm377_vm1, %v2715_v7, 0 }
 0xf53   : > { %v4313_v0 = vpop.eup %4312 }
 0xf54   : > { %v2556_v34 = vmul.f32 %v4313_v0, %v5141_v6 }
 0xf55   : > { %v2709_v42 = vpop.permute.xlu1 %2708  ;;  %v2711_v46 = vpop.permute.xlu0 %2710 }
 0xf56   : > { %v2560_v40 = vpack.c.bf16 %v2556_v34, %v2556_v34 }
 0xf57   : > { %4010 = vmatpush3.bf16.xpose.msra.mxu1 %v2735_v56  ;;  %v4315_v2 = vpop.eup %4314 }
 0xf58   : > { %v2554_v27 = vmul.f32 %v4315_v2, %v5145_v3 }
 0xf59   : > { %v2713_v63 = vpop.permute.xlu1 %2712 }
 0xf5b   : > { %v4317_v37 = vpop.eup %4316 }
 0xf5c   : > { %v2555_v14 = vmul.f32 %v4317_v37, %v4303_v12 }
 0xf5e   : > { %v2559_v47 = vpack.c.bf16 %v2555_v14, %v2554_v27 }
 0xf60   : > { %3999 = vmatprep.mubr.msk.bf16.mxu1 %vm473_vm3, %v2559_v47 }
 0xf61   : > { %4000 = vmatmul.mubr.msk.bf16.gmra.mxu1 %vm473_vm3, %v2560_v40 }
 0xf62   : > { %4011 = vmatprep.mubr.msk.bf16.mxu1 %vm377_vm1, %v2707_v50 }
 0xf69   : > { %4012 = vmatmul.mubr.msk.bf16.vlgmr.msra.gmra.mxu1 %vm377_vm1, %v2709_v42 }
 0xf6a   : > { %4015 = vmatprep.mubr.msk.bf16.mxu1 %vm377_vm1, %v2711_v46 }
 0xf71   : > { %4016 = vmatmul.mubr.msk.bf16.gmra.mxu1 %vm377_vm1, %v2713_v63  ;;  %vm1353_vm1 = vcmask 188544  }
 0xf72   : > { %vm1354_vm2 = vmand %vm1353_vm1, %vm675_vm7  ;;  %vm2701_vm1 = vcmask 450944  }
 0xfec   : > { %v5181_v6 = vpop.f32.mrf.mxu1 }
 0xfee   : > { %v5183_v3 = vpop.f32.mrf.mxu1 }
 0xff0   : > { %v5185_v12 = vpop.f32.mrf.mxu1 }
 0xff2   : > { %v5187_v39 = vpop.f32.mrf.mxu1 }
0x1021   : > { %v5189_v30 = vpop.f32.mrf.mxu1 }
0x1023   : > { %v5191_v35 = vpop.f32.mrf.mxu1 }
0x1025   : > { %v4002_v29 = vpop.f32.mrf.mxu1 }
0x1027   : > { %v5193_v25 = vpop.f32.mrf.mxu1 }
0x1028   : > { %5530 = vst [vmem:[#allocation8_spill] sm:$0xff] %v5193_v25 }
0x1029   : > { %v4013_v5 = vpop.f32.mrf.mxu1 }
0x102a   : > { %v2812_v22 = vmul.f32 0.5, %v4013_v5 }
0x102b   : > { %v2780_v58 = vpop.f32.mrf.mxu1 }
0x102c   : > { %v2810_v36 = vmul.f32 0.5, %v2780_v58  ;;  %v2823_v31 = vsel %vm473_vm3, %v2812_v22, -inf }
0x102d   : > { %2824 = vmax.xlane.f32.xlu0 %v2823_v31  ;;  %v4014_v7 = vpop.f32.mrf.mxu1 }
0x102e   : > { %v2813_v0 = vmul.f32 0.5, %v4014_v7  ;;  %v2817_v37 = vsel %vm473_vm3, %v2810_v36, -inf }
0x102f   : > { %v2783_v56 = vpop.f32.mrf.mxu1 }
0x1030   : > { %v2811_v2 = vmul.f32 0.5, %v2783_v56  ;;  %v2826_v40 = vsel %vm473_vm3, %v2813_v0, -inf }
0x1031   : > { %2818 = vmax.xlane.f32.xlu0 %v2817_v37  ;;  %v4017_v34 = vpop.f32.mrf.mxu1 }
0x1032   : > { %v2820_v27 = vsel %vm473_vm3, %v2811_v2, -inf  ;;  %v2816_v42 = vmul.f32 0.5, %v4017_v34 }
0x1033   : > { %2821 = vmax.xlane.f32.xlu1 %v2820_v27  ;;  %v2796_v14 = vpop.f32.mrf.mxu1 }
0x1034   : > { %v2814_v47 = vmul.f32 0.5, %v2796_v14  ;;  %v2835_v5 = vsel %vm492_vm4, %v2816_v42, -inf }
0x1035   : > { %2827 = vmax.xlane.f32.xlu0 %v2826_v40  ;;  %v4018_v50 = vpop.f32.mrf.mxu1 }
0x1036   : > { %v2829_v46 = vsel %vm473_vm3, %v2814_v47, -inf }
0x1037   : > { %2830 = vmax.xlane.f32.xlu1 %v2829_v46  ;;  %v2799_v63 = vpop.f32.mrf.mxu1 }
0x1038   : > { %v2815_v29 = vmul.f32 0.5, %v2799_v63 }
0x103a   : > { %v2832_v58 = vsel %vm473_vm3, %v2815_v29, -inf }
0x103b   : > { %2836 = vmax.xlane.f32.xlu1 %v2835_v5  ;;  %2833 = vmax.xlane.f32.xlu0 %v2832_v58 }
0x104c   : > { %2904 = vrot.lane.b32.xlu1 %v4504_v52, %s4406_s25 }
0x10b6   : > { %v2825_v31 = vpop.xlane.xlu0 %2824 }
0x10b7   : > { %v2840_v7 = vsub.f32 %v2812_v22, %v2825_v31 }
0x10b9   : > { %v2849_v56 = vmul.f32 1.442695, %v2840_v7 }
0x10ba   : > { %v2819_v37 = vpop.xlane.xlu0 %2818 }
0x10bb   : > { %4318 = vpow2.f32 %v2849_v56  ;;  %v2838_v34 = vsub.f32 %v2810_v36, %v2819_v37 }
0x10bc   : > { %v2822_v27 = vpop.xlane.xlu1 %2821 }
0x10bd   : > { %v2845_v14 = vmul.f32 1.442695, %v2838_v34  ;;  %v2839_v40 = vsub.f32 %v2811_v2, %v2822_v27 }
0x10be   : > { %v2828_v50 = vpop.xlane.xlu0 %2827 }
0x10bf   : > { %4320 = vpow2.f32 %v2845_v14  ;;  %v2841_v46 = vsub.f32 %v2813_v0, %v2828_v50  ;;  %v2847_v25 = vmul.f32 1.442695, %v2839_v40  ;;  %v3600_v40 = vpack.c.bf16 %v4764_v45, %v4764_v45 }
0x10c0   : > { %v2831_v63 = vpop.xlane.xlu1 %2830  ;;  %v3597_v45 = vpack.c.bf16 %v4760_v41, %v4760_v41  ;;  %v3609_v41 = vpack.c.bf16 %v4932_v23, %v4932_v23  ;;  %v3607_v23 = vpack.c.bf16 %v4849_v21, %v4849_v21  ;;  %v3630_v21 = vpack.c.bf16 %v5187_v39, %v5187_v39 }
0x10c1   : > { %v2851_v20 = vmul.f32 1.442695, %v2841_v46  ;;  %v2842_v5 = vsub.f32 %v2814_v47, %v2831_v63  ;;  %v3614_v46 = vpack.c.bf16 %v4934_v51, %v4934_v51  ;;  %v3602_v51 = vpack.c.bf16 %v4847_v18, %v4847_v18 }
0x10c2   : > { %v3611_v63 = vpack.c.bf16 %v4930_v33, %v4930_v33  ;;  %v3616_v18 = vpack.c.bf16 %v5017_v59, %v5017_v59  ;;  %v3623_v33 = vpack.c.bf16 %v5102_v8, %v5102_v8  ;;  %v3621_v59 = vpack.c.bf16 %v5019_v1, %v5019_v1 }
0x10c3   : > { %4322 = vpow2.f32 %v2851_v20  ;;  %v2853_v11 = vmul.f32 1.442695, %v2842_v5  ;;  %v3596_v1 = vpack.c.bf16 %v4756_v32, %v4756_v32  ;;  %v3598_v8 = vpack.c.bf16 %v4766_v38, %v4766_v38  ;;  %v5531_v5 = vld [vmem:[#allocation3_spill] sm:$0xff] }
0x10c4   : > { %v2837_v58 = vpop.xlane.xlu1 %2836  ;;  %4324 = vpow2.f32 %v2847_v25  ;;  %v2834_v27 = vpop.xlane.xlu0 %2833  ;;  %v3603_v32 = vpack.c.bf16 %v4841_v53, %v4841_v53  ;;  %v3612_v38 = vpack.c.bf16 %v4936_v54, %v4936_v54  ;;  %v3610_v53 = vpack.c.bf16 %v4926_v43, %v4926_v43 }
0x10c5   : > { %v2844_v52 = vsub.f32 %v2816_v42, %v2837_v58  ;;  %v2843_v14 = vsub.f32 %v2815_v29, %v2834_v27  ;;  %v3626_v54 = vpack.c.bf16 %v5106_v13, %v5106_v13  ;;  %v3617_v43 = vpack.c.bf16 %v5011_v28, %v5011_v28 }
0x10c6   : > { %v3624_v13 = vpack.c.bf16 %v5096_v48, %v5096_v48  ;;  %v3629_v28 = vpack.c.bf16 %v5183_v3, %v5183_v3  ;;  %v3635_v39 = vpack.c.bf16 %v5189_v30, %v5189_v30  ;;  %v3599_v48 = vpack.c.bf16 %v5531_v5, %v5531_v5  ;;  %v5532_v3 = vld [vmem:[#allocation4_spill] sm:$0xff] }
0x10c7   : > { %v2857_v22 = vmul.f32 1.442695, %v2844_v52  ;;  %v2855_v50 = vmul.f32 1.442695, %v2843_v14 }
0x10c8   : > { %v5204_v31 = vpop.eup %4318  ;;  %v2905_v7 = vpop.permute.xlu1 %2904 }
0x10c9   : > { %4326 = vpow2.f32 %v2857_v22  ;;  %v2922_v36 = vand.u32 %v2905_v7, %v4502_v49  ;;  %v2865_v2 = vsel %vm473_vm3, %v5204_v31, 0.0  ;;  %v3606_v22 = vpack.c.bf16 %v5532_v3, %v5532_v3 }
0x10ca   : > { %2866 = vadd.xlane.f32.xlu0 %v2865_v2  ;;  %4328 = vpow2.f32 %v2853_v11 }
0x10cb   : > { %4019 = vmatprep.subr.bf16.mxu0 %v2922_v36  ;;  %4330 = vpow2.f32 %v2855_v50  ;;  %v1018_v50 = vld [vmem:[#allocation2 + $0x18] sm:$0x1] }
0x10cc   : > { %v5209_v0 = vpop.eup %4320  ;;  %4020 = vmatpush3.bf16.msra.mxu0 %v2922_v36  ;;  %v5533_v36 = vld [vmem:[#allocation5_spill] sm:$0xff] }
0x10cd   : > { %v2859_v20 = vsel %vm473_vm3, %v5209_v0, 0.0 }
0x10ce   : > { %2860 = vadd.xlane.f32.xlu0 %v2859_v20  ;;  %v5534_v20 = vld [vmem:[#allocation6_spill] sm:$0xff] }
0x10d0   : > { %v5213_v25 = vpop.eup %4322 }
0x10d1   : > { %v2868_v47 = vsel %vm473_vm3, %v5213_v25, 0.0  ;;  %v5217_v42 = vpop.eup %4324 }
0x10d2   : > { %2869 = vadd.xlane.f32.xlu1 %v2868_v47  ;;  %v2862_v49 = vsel %vm473_vm3, %v5217_v42, 0.0  ;;  %v3620_v47 = vpack.c.bf16 %v5534_v20, %v5534_v20 }
0x10d6   : > { %v5221_v11 = vpop.eup %4326  ;;  %2863 = vadd.xlane.f32.xlu1 %v2862_v49 }
0x10d7   : > { %v2877_v56 = vsel %vm492_vm4, %v5221_v11, 0.0  ;;  %v5225_v37 = vpop.eup %4328  ;;  %vm2694_vm4 = vcmask 454016  }
0x10d8   : > { %2878 = vadd.xlane.f32.xlu0 %v2877_v56  ;;  %v2871_v34 = vsel %vm473_vm3, %v5225_v37, 0.0  ;;  %v5248_v29 = vpop.eup %4330  ;;  %v5535_v56 = vld [vmem:[#allocation7_spill] sm:$0xff] }
0x10dc   : > { %2872 = vadd.xlane.f32.xlu0 %v2871_v34  ;;  %v3627_v34 = vpack.c.bf16 %v5535_v56, %v5535_v56 }
0x10e7   : > { %2900 = vrot.lane.b32.xlu1 %v4519_v60, %s4406_s25  ;;  %v3628_v60 = vpack.c.bf16 %v5104_v15, %v5104_v15  ;;  %v2874_v15 = vsel %vm473_vm3, %v5248_v29, 0.0 }
0x10f2   : > { %2902 = vrot.lane.b32.xlu0 %v4512_v57, %s4406_s25  ;;  %v3595_v57 = vpack.c.bf16 %v4762_v44, %v4762_v44  ;;  %v3604_v44 = vpack.c.bf16 %v4845_v55, %v4845_v55  ;;  %v3618_v55 = vpack.c.bf16 %v5015_v10, %v5015_v10  ;;  %v3625_v10 = vpack.c.bf16 %v5100_v24, %v5100_v24 }
0x10f3   : > { %v3631_v24 = vpack.c.bf16 %v5181_v6, %v5181_v6  ;;  %v3605_v6 = vpack.c.bf16 %v4851_v61, %v4851_v61  ;;  %v3619_v61 = vpack.c.bf16 %v5021_v4, %v5021_v4  ;;  %v3633_v4 = vpack.c.bf16 %v5191_v35, %v5191_v35 }
0x10f4   : > { %v3632_v35 = vpack.c.bf16 %v5185_v12, %v5185_v12  ;;  %v3613_v12 = vpack.c.bf16 %v5533_v36, %v5533_v36 }
0x10f6   : > { %1000 = vrot.lane.b32.xlu0 %v3600_v40, %s4405_s24 }
0x10fa   : > { %1674 = vrot.lane.b32.xlu0 %v3614_v46, %s4401_s20 }
0x10fe   : > { %2348 = vrot.lane.b32.xlu0 %v3628_v60, %s4397_s14 }
0x1102   : > { %990 = vrot.lane.b32.xlu0 %v3595_v57, %s4405_s24 }
0x1106   : > { %994 = vrot.lane.b32.xlu0 %v3597_v45, %s4405_s24 }
0x110a   : > { %1327 = vrot.lane.b32.xlu0 %v3602_v51, %s4403_s22 }
0x110b   : > { %2875 = vadd.xlane.f32.xlu1 %v2874_v15 }
0x110e   : > { %1331 = vrot.lane.b32.xlu0 %v3604_v44, %s4403_s22 }
0x1112   : > { %1664 = vrot.lane.b32.xlu0 %v3609_v41, %s4401_s20 }
0x1116   : > { %1668 = vrot.lane.b32.xlu0 %v3611_v63, %s4401_s20 }
0x111a   : > { %2001 = vrot.lane.b32.xlu0 %v3616_v18, %s4399_s16 }
0x111c   : > { %2898 = vrot.lane.b32.xlu1 %v4527_v62, %s4406_s25  ;;  %v3594_v62 = vpack.c.bf16 %v4758_v9, %v4758_v9  ;;  %v3601_v9 = vpack.c.bf16 %v4843_v17, %v4843_v17  ;;  %v3608_v17 = vpack.c.bf16 %v4928_v19, %v4928_v19  ;;  %v3615_v19 = vpack.c.bf16 %v5013_v26, %v5013_v26 }
0x111d   : > { %v3622_v26 = vpack.c.bf16 %v5098_v16, %v5098_v16 }
0x111e   : > { %2005 = vrot.lane.b32.xlu0 %v3618_v55, %s4399_s16 }
0x1120   : > { %1337 = vrot.lane.b32.xlu1 %v3607_v23, %s4403_s22 }
0x1122   : > { %2338 = vrot.lane.b32.xlu0 %v3623_v33, %s4397_s14 }
0x1124   : > { %2011 = vrot.lane.b32.xlu1 %v3621_v59, %s4399_s16 }
0x1126   : > { %2342 = vrot.lane.b32.xlu0 %v3625_v10, %s4397_s14 }
0x1128   : > { %988 = vrot.lane.b32.xlu1 %v3594_v62, %s4405_s24 }
0x112a   : > { %2675 = vrot.lane.b32.xlu0 %v3630_v21, %s4395_s12 }
0x112c   : > { %992 = vrot.lane.b32.xlu1 %v3596_v1, %s4405_s24 }
0x112e   : > { %2677 = vrot.lane.b32.xlu0 %v3631_v24, %s4395_s12 }
0x1130   : > { %1325 = vrot.lane.b32.xlu1 %v3601_v9, %s4403_s22 }
0x1132   : > { %996 = vrot.lane.b32.xlu0 %v3598_v8, %s4405_s24 }
0x1134   : > { %1329 = vrot.lane.b32.xlu1 %v3603_v32, %s4403_s22 }
0x1136   : > { %1333 = vrot.lane.b32.xlu0 %v3605_v6, %s4403_s22 }
0x1138   : > { %1662 = vrot.lane.b32.xlu1 %v3608_v17, %s4401_s20 }
0x113a   : > { %1670 = vrot.lane.b32.xlu0 %v3612_v38, %s4401_s20 }
0x113c   : > { %1666 = vrot.lane.b32.xlu1 %v3610_v53, %s4401_s20 }
0x113e   : > { %2007 = vrot.lane.b32.xlu0 %v3619_v61, %s4399_s16 }
0x1140   : > { %1999 = vrot.lane.b32.xlu1 %v3615_v19, %s4399_s16 }
0x1142   : > { %2344 = vrot.lane.b32.xlu0 %v3626_v54, %s4397_s14 }
0x1144   : > { %2003 = vrot.lane.b32.xlu1 %v3617_v43, %s4399_s16 }
0x1146   : > { %2681 = vrot.lane.b32.xlu0 %v3633_v4, %s4395_s12 }
0x1148   : > { %2336 = vrot.lane.b32.xlu1 %v3622_v26, %s4397_s14 }
0x114c   : > { %2340 = vrot.lane.b32.xlu1 %v3624_v13, %s4397_s14 }
0x1150   : > { %2673 = vrot.lane.b32.xlu1 %v3629_v28, %s4395_s12 }
0x1153   : > { %v2867_v16 = vpop.xlane.xlu0 %2866 }
0x1154   : > { %2685 = vrot.lane.b32.xlu1 %v3635_v39, %s4395_s12 }
0x1157   : > { %v2861_v58 = vpop.xlane.xlu0 %2860 }
0x1158   : > { %2679 = vrot.lane.b32.xlu1 %v3632_v35, %s4395_s12  ;;  %4332 = vrcp.f32 %v2861_v58 }
0x115b   : > { %v2870_v52 = vpop.xlane.xlu1 %2869 }
0x115c   : > { %998 = vrot.lane.b32.xlu1 %v3599_v48, %s4405_s24 }
0x115f   : > { %v2864_v30 = vpop.xlane.xlu1 %2863 }
0x1160   : > { %4334 = vrcp.f32 %v2864_v30  ;;  %1335 = vrot.lane.b32.xlu1 %v3606_v22, %s4403_s22 }
0x1161   : > { %v2879_v7 = vpop.xlane.xlu0 %2878  ;;  %4336 = vrcp.f32 %v2870_v52 }
0x1162   : > { %4338 = vrcp.f32 %v2867_v16 }
0x1163   : > { %v2901_v14 = vpop.permute.xlu1 %2900  ;;  %4340 = vrcp.f32 %v2879_v7 }
0x1164   : > { %1672 = vrot.lane.b32.xlu1 %v3613_v12, %s4401_s20  ;;  %s224_s20 = scalar_lea.vmem %s5524_s5, %s4083_s28 }
0x1165   : > { %v2873_v2 = vpop.xlane.xlu0 %2872  ;;  %v4333_v27 = vpop.eup %4332 }
0x1166   : > { %v2887_v57 = vmul.f32 %v4333_v27, %v5209_v0  ;;  %4342 = vrcp.f32 %v2873_v2 }
0x1168   : > { %2009 = vrot.lane.b32.xlu1 %v3620_v47, %s4399_s16 }
0x1169   : > { %v2903_v49 = vpop.permute.xlu0 %2902 }
0x116a   : > { %4021 = vmatprep.subr.bf16.mxu0 %v2903_v49 }
0x116b   : > { %4022 = vmatpush3.bf16.msra.mxu0 %v2903_v49 }
0x116c   : > { %2346 = vrot.lane.b32.xlu1 %v3627_v34, %s4397_s14  ;;  %4023 = vmatprep.subr.bf16.mxu0 %v2901_v14 }
0x116d   : > { %v4335_v40 = vpop.eup %4334  ;;  %v1001_v46 = vpop.permute.xlu0 %1000 }
0x116e   : > { %v1019_v60 = vsel %vm1017_vm10, %v1001_v46, %v1018_v50  ;;  %v2888_v45 = vmul.f32 %v4335_v40, %v5217_v42  ;;  %v4337_v33 = vpop.eup %4336 }
0x116f   : > { %1020 = vst [vmem:[#allocation2 + $0x18] sm:$0x1] %v1019_v60  ;;  %4024 = vmatpush3.bf16.msra.mxu0 %v2901_v14  ;;  %v4339_v62 = vpop.eup %4338  ;;  %v2890_v21 = vmul.f32 %v4337_v33, %v5213_v25 }
0x1170   : > { %v2894_v51 = vpack.c.bf16 %v2888_v45, %v2887_v57  ;;  %v2889_v24 = vmul.f32 %v4339_v62, %v5204_v31  ;;  %v4341_v25 = vpop.eup %4340 }
0x1171   : > { %v5365_v15 = vpop.permute.xlu0 %1674  ;;  %v2893_v54 = vmul.f32 %v4341_v25, %v5221_v11 }
0x1172   : > { %4027 = vmatprep.mubr.msk.bf16.mxu0 %vm473_vm3, %v2894_v51  ;;  %v2895_v8 = vpack.c.bf16 %v2890_v21, %v2889_v24 }
0x1173   : > { %v4343_v31 = vpop.eup %4342  ;;  %v2897_v35 = vpack.c.bf16 %v2893_v54, %v2893_v54 }
0x1174   : > { %v2891_v43 = vmul.f32 %v4343_v31, %v5225_v37 }
0x1175   : > { %v5368_v44 = vpop.permute.xlu0 %2348 }
0x1176   : > { %v1355_v6 = vld [vmem:[#allocation2 + $0x18] sm:$0x1] }
0x1179   : > { %v991_v41 = vpop.permute.xlu0 %990 }
0x117a   : > { %1011 = vst.msk [vmem:[#allocation2 + $0x4] sm:$0xf] %vm1009_vm11, %v991_v41  ;;  %v4115_v41 = vld [vmem:[%s5522_s3 + $0x10] sm:$0xff]  }
0x117d   : > { %v995_v63 = vpop.permute.xlu0 %994 }
0x117e   : > { %1013 = vst.msk [vmem:[#allocation2 + $0xc] sm:$0xf] %vm1009_vm11, %v995_v63  ;;  %v4116_v63 = vld [vmem:[%s5522_s3 + $0x8] sm:$0xff]  }
0x1181   : > { %v1328_v0 = vpop.permute.xlu0 %1327 }
0x1182   : > { %1348 = vst.msk [vmem:[#allocation2 + $0x4] sm:$0xf] %vm1346_vm12, %v1328_v0 }
0x1185   : > { %v1332_v42 = vpop.permute.xlu0 %1331 }
0x1186   : > { %1350 = vst.msk [vmem:[#allocation2 + $0xc] sm:$0xf] %vm1346_vm12, %v1332_v42 }
0x1189   : > { %v1665_v18 = vpop.permute.xlu0 %1664 }
0x118a   : > { %1685 = vst.msk [vmem:[#allocation2 + $0x4] sm:$0xf] %vm1683_vm13, %v1665_v18 }
0x118d   : > { %v1669_v55 = vpop.permute.xlu0 %1668 }
0x118e   : > { %1687 = vst.msk [vmem:[#allocation2 + $0xc] sm:$0xf] %vm1683_vm13, %v1669_v55  ;;  %v4117_v55 = vld [vmem:[%s5522_s3] sm:$0xff]  }
0x1191   : > { %v2002_v23 = vpop.permute.xlu0 %2001 }
0x1192   : > { %2022 = vst.msk [vmem:[#allocation2 + $0x4] sm:$0xf] %vm2020_vm14, %v2002_v23 }
0x1194   : > { %v2876_v59 = vpop.xlane.xlu1 %2875 }
0x1195   : > { %4344 = vrcp.f32 %v2876_v59  ;;  %v2006_v10 = vpop.permute.xlu0 %2005 }
0x1196   : > { %2024 = vst.msk [vmem:[#allocation2 + $0xc] sm:$0xf] %vm2020_vm14, %v2006_v10 }
0x1198   : > { %v2899_v1 = vpop.permute.xlu1 %2898 }
0x1199   : > { %4025 = vmatprep.subr.bf16.mxu0 %v2899_v1  ;;  %v2339_v9 = vpop.permute.xlu0 %2338 }
0x119a   : > { %2359 = vst.msk [vmem:[#allocation2 + $0x4] sm:$0xf] %vm2357_vm15, %v2339_v9  ;;  %4026 = vmatpush3.bf16.msra.mxu0 %v2899_v1  ;;  %v5536_v1 = vld [vmem:[#allocation8_spill] sm:$0xff] }
0x119b   : > { %v3634_v24 = vpack.c.bf16 %v5536_v1, %v5536_v1 }
0x119c   : > { %v1338_v32 = vpop.permute.xlu1 %1337 }
0x119d   : > { %v1356_v17 = vsel %vm1354_vm2, %v1338_v32, %v1355_v6  ;;  %4028 = vmatmul.mubr.msk.bf16.vlgmr.msra.gmra.mxu0 %vm473_vm3, %v2895_v8  ;;  %v2343_v38 = vpop.permute.xlu0 %2342  ;;  %vm2702_vm2 = vmand %vm2701_vm1, %vm675_vm7 }
0x119e   : > { %1357 = vst [vmem:[#allocation2 + $0x18] sm:$0x1] %v1356_v17  ;;  %2361 = vst.msk [vmem:[#allocation2 + $0xc] sm:$0xf] %vm2357_vm15, %v2343_v38 }
0x11a0   : > { %v2012_v53 = vpop.permute.xlu1 %2011 }
0x11a1   : > { %v2676_v61 = vpop.permute.xlu0 %2675 }
0x11a2   : > { %v4345_v19 = vpop.eup %4344  ;;  %2696 = vst.msk [vmem:[#allocation2 + $0x4] sm:$0xf] %vm2694_vm4, %v2676_v61 }
0x11a3   : > { %v2892_v4 = vmul.f32 %v4345_v19, %v5248_v29 }
0x11a4   : > { %v989_v26 = vpop.permute.xlu1 %988 }
0x11a5   : > { %v1692_v13 = vld [vmem:[#allocation2 + $0x18] sm:$0x1]  ;;  %1010 = vst.msk [vmem:[#allocation2] sm:$0xf] %vm1009_vm11, %v989_v26  ;;  %v2678_v28 = vpop.permute.xlu0 %2677  ;;  %v2896_v39 = vpack.c.bf16 %v2892_v4, %v2891_v43 }
0x11a6   : > { %v1693_v16 = vsel %vm1691_vm6, %v5365_v15, %v1692_v13 }
0x11a7   : > { %1694 = vst [vmem:[#allocation2 + $0x18] sm:$0x1] %v1693_v16  ;;  %4031 = vmatprep.mubr.msk.bf16.mxu0 %vm473_vm3, %v2896_v39 }
0x11a8   : > { %v993_v5 = vpop.permute.xlu1 %992  ;;  %4032 = vmatmul.mubr.msk.bf16.gmra.mxu0 %vm473_vm3, %v2897_v35  ;;  %vm2364_vm3 = vcmask 385344  }
0x11a9   : > { %1012 = vst.msk [vmem:[#allocation2 + $0x8] sm:$0xf] %vm1009_vm11, %v993_v5  ;;  %v997_v11 = vpop.permute.xlu0 %996  ;;  %vm2365_vm10 = vmand %vm2364_vm3, %vm675_vm7  ;;  %v3570_v5 = vld [vmem:[%s5523_s4] ss:$0 sm:$0xff] }
0x11aa   : > { %1014 = vst.msk [vmem:[#allocation2 + $0x10] sm:$0xf] %vm1009_vm11, %v997_v11 }
0x11ac   : > { %v1326_v37 = vpop.permute.xlu1 %1325 }
0x11ad   : > { %1347 = vst.msk [vmem:[#allocation2] sm:$0xf] %vm1346_vm12, %v1326_v37  ;;  %v1334_v29 = vpop.permute.xlu0 %1333 }
0x11ae   : > { %v2029_v48 = vld [vmem:[#allocation2 + $0x18] sm:$0x1]  ;;  %1351 = vst.msk [vmem:[#allocation2 + $0x10] sm:$0xf] %vm1346_vm12, %v1334_v29 }
0x11af   : > { %v2030_v58 = vsel %vm2028_vm9, %v2012_v53, %v2029_v48  ;;  %v4376_v48 = vld [vmem:[%s4466_s6 + $0x10] sm:$0xff] }
0x11b0   : > { %2031 = vst [vmem:[#allocation2 + $0x18] sm:$0x1] %v2030_v58  ;;  %v1330_v52 = vpop.permute.xlu1 %1329 }
0x11b1   : > { %1349 = vst.msk [vmem:[#allocation2 + $0x8] sm:$0xf] %vm1346_vm12, %v1330_v52  ;;  %v1671_v3 = vpop.permute.xlu0 %1670 }
0x11b2   : > { %1688 = vst.msk [vmem:[#allocation2 + $0x10] sm:$0xf] %vm1683_vm13, %v1671_v3 }
0x11b4   : > { %v1663_v22 = vpop.permute.xlu1 %1662 }
0x11b5   : > { %1684 = vst.msk [vmem:[#allocation2] sm:$0xf] %vm1683_vm13, %v1663_v22  ;;  %v2008_v30 = vpop.permute.xlu0 %2007  ;;  %v4377_v22 = vld [vmem:[%s4466_s6] sm:$0xff] }
0x11b6   : > { %2025 = vst.msk [vmem:[#allocation2 + $0x10] sm:$0xf] %vm2020_vm14, %v2008_v30 }
0x11b7   : > { %v2366_v7 = vld [vmem:[#allocation2 + $0x18] sm:$0x1] }
0x11b8   : > { %v2367_v36 = vsel %vm2365_vm10, %v5368_v44, %v2366_v7  ;;  %v1667_v12 = vpop.permute.xlu1 %1666  ;;  %v4114_v44 = vld [vmem:[%s5522_s3 + $0x18] sm:$0xff]  }
0x11b9   : > { %2368 = vst [vmem:[#allocation2 + $0x18] sm:$0x1] %v2367_v36  ;;  %1686 = vst.msk [vmem:[#allocation2 + $0x8] sm:$0xf] %vm1683_vm13, %v1667_v12  ;;  %v2345_v2 = vpop.permute.xlu0 %2344  ;;  %4035 = vmatprep.subr.bf16.mxu0 %v4114_v44 }
0x11ba   : > { %2362 = vst.msk [vmem:[#allocation2 + $0x10] sm:$0xf] %vm2357_vm15, %v2345_v2  ;;  %4036 = vmatpush3.bf16.msra.mxu0 %v4114_v44 }
0x11bb   : > { %4037 = vmatprep.subr.bf16.mxu0 %v4115_v41 }
0x11bc   : > { %v2000_v20 = vpop.permute.xlu1 %1999 }
0x11bd   : > { %2021 = vst.msk [vmem:[#allocation2] sm:$0xf] %vm2020_vm14, %v2000_v20  ;;  %v2682_v47 = vpop.permute.xlu0 %2681  ;;  %v4378_v20 = vld [vmem:[%s4466_s6 + $0x8] sm:$0xff] }
0x11be   : > { %2699 = vst.msk [vmem:[#allocation2 + $0x10] sm:$0xf] %vm2694_vm4, %v2682_v47  ;;  %4038 = vmatpush3.bf16.msra.mxu0 %v4115_v41  ;;  %v4381_v41 = vld [vmem:[%s4466_s6 + $0x28] sm:$0xff] }
0x11bf   : > { %4039 = vmatprep.subr.bf16.mxu0 %v4116_v63 }
0x11c0   : > { %v2004_v49 = vpop.permute.xlu1 %2003  ;;  %v2703_v40 = vld [vmem:[#allocation2 + $0x18] sm:$0x1] }
0x11c1   : > { %2023 = vst.msk [vmem:[#allocation2 + $0x8] sm:$0xf] %vm2020_vm14, %v2004_v49 }
0x11c2   : > { %4040 = vmatpush3.bf16.msra.mxu0 %v4116_v63 }
0x11c3   : > { %4041 = vmatprep.subr.bf16.mxu0 %v4117_v55 }
0x11c4   : > { %v2337_v56 = vpop.permute.xlu1 %2336 }
0x11c5   : > { %2358 = vst.msk [vmem:[#allocation2] sm:$0xf] %vm2357_vm15, %v2337_v56 }
0x11c6   : > { %4042 = vmatpush3.bf16.msra.mxu0 %v4117_v55 }
0x11c8   : > { %v2341_v34 = vpop.permute.xlu1 %2340 }
0x11c9   : > { %2360 = vst.msk [vmem:[#allocation2 + $0x8] sm:$0xf] %vm2357_vm15, %v2341_v34 }
0x11ca   : > { %2697 = vst.msk [vmem:[#allocation2 + $0x8] sm:$0xf] %vm2694_vm4, %v2678_v28 }
0x11cc   : > { %v2674_v27 = vpop.permute.xlu1 %2673 }
0x11cd   : > { %2695 = vst.msk [vmem:[#allocation2] sm:$0xf] %vm2694_vm4, %v2674_v27 }
0x11d0   : > { %v2686_v14 = vpop.permute.xlu1 %2685 }
0x11d1   : > { %v2704_v50 = vsel %vm2702_vm2, %v2686_v14, %v2703_v40 }
0x11d2   : > { %2705 = vst [vmem:[#allocation2 + $0x18] sm:$0x1] %v2704_v50  ;;  %v4379_v50 = vld [vmem:[%s4466_s6 + $0x20] sm:$0xff] }
0x11d4   : > { %v2680_v46 = vpop.permute.xlu1 %2679 }
0x11d5   : > { %2698 = vst.msk [vmem:[#allocation2 + $0xc] sm:$0xf] %vm2694_vm4, %v2680_v46 }
0x11d8   : > { %v999_v60 = vpop.permute.xlu1 %998 }
0x11d9   : > { %1015 = vst.msk [vmem:[#allocation2 + $0x14] sm:$0xf] %vm1009_vm11, %v999_v60  ;;  %vm3031_vm11 = vcmask 519616   ;;  %v3040_v26 = vld [vmem:[#allocation2 + $0x18] sm:$0x1] }
0x11dc   : > { %v1336_v57 = vpop.permute.xlu1 %1335 }
0x11dd   : > { %1352 = vst.msk [vmem:[#allocation2 + $0x14] sm:$0xf] %vm1346_vm12, %v1336_v57  ;;  %vm3038_vm12 = vcmask 516544  }
0x11e0   : > { %v1673_v45 = vpop.permute.xlu1 %1672 }
0x11e1   : > { %1689 = vst.msk [vmem:[#allocation2 + $0x14] sm:$0xf] %vm1683_vm13, %v1673_v45  ;;  %vm3039_vm13 = vmand %vm3038_vm12, %vm675_vm7  ;;  %v4380_v45 = vld [vmem:[%s4466_s6 + $0x30] sm:$0x1]  ;;  %vm3209_vm7 = vcmask 253952  }
0x11e4   : > { %v2010_v51 = vpop.permute.xlu1 %2009 }
0x11e5   : > { %2026 = vst.msk [vmem:[#allocation2 + $0x14] sm:$0xf] %vm2020_vm14, %v2010_v51  ;;  %vm3107_vm14 = vcmask 523264  }
0x11e8   : > { %v2347_v15 = vpop.permute.xlu1 %2346 }
0x11e9   : > { %2363 = vst.msk [vmem:[#allocation2 + $0x14] sm:$0xf] %vm2357_vm15, %v2347_v15 }
0x125d   : > { %v4029_v0 = vpop.f32.mrf.mxu0 }
0x125e   : > { %v3638_v42 = vpack.c.bf16 %v4029_v0, %v4029_v0  ;;  %v4382_v0 = vld [vmem:[%s4466_s6 + $0x18] sm:$0xff] }
0x125f   : > { %v2958_v18 = vpop.f32.mrf.mxu0 }
0x1260   : > { %3014 = vrot.lane.b32.xlu0 %v3638_v42, %s4393_s10  ;;  %v3636_v33 = vpack.c.bf16 %v2958_v18, %v2958_v18 }
0x1261   : > { %v4030_v23 = vpop.f32.mrf.mxu0 }
0x1262   : > { %v3639_v59 = vpack.c.bf16 %v4030_v23, %v4030_v23 }
0x1263   : > { %v2961_v10 = vpop.f32.mrf.mxu0 }
0x1264   : > { %3010 = vrot.lane.b32.xlu0 %v3636_v33, %s4393_s10  ;;  %3016 = vrot.lane.b32.xlu1 %v3639_v59, %s4393_s10  ;;  %v3637_v62 = vpack.c.bf16 %v2961_v10, %v2961_v10 }
0x1268   : > { %3012 = vrot.lane.b32.xlu1 %v3637_v62, %s4393_s10  ;;  %v4033_v21 = vpop.f32.mrf.mxu0 }
0x1269   : > { %v3642_v17 = vpack.c.bf16 %v4033_v21, %v4033_v21 }
0x126a   : > { %v2974_v9 = vpop.f32.mrf.mxu0 }
0x126b   : > { %v3640_v8 = vpack.c.bf16 %v2974_v9, %v2974_v9 }
0x126c   : > { %2683 = vrot.lane.b32.xlu1 %v3634_v24, %s4395_s12  ;;  %v4034_v32 = vpop.f32.mrf.mxu0 }
0x126d   : > { %3018 = vrot.lane.b32.xlu0 %v3640_v8, %s4393_s10 }
0x126e   : > { %v2977_v6 = vpop.f32.mrf.mxu0 }
0x126f   : > { %v3641_v38 = vpack.c.bf16 %v2977_v6, %v2977_v6 }
0x1271   : > { %3022 = vrot.lane.b32.xlu0 %v3642_v17, %s4393_s10  ;;  %3020 = vrot.lane.b32.xlu1 %v3641_v38, %s4393_s10 }
0x12d2   : > { %v3015_v25 = vpop.permute.xlu0 %3014 }
0x12d3   : > { %3034 = vst.msk [vmem:[#allocation2 + $0x8] sm:$0xf] %vm3031_vm11, %v3015_v25 }
0x12d6   : > { %v3017_v31 = vpop.permute.xlu1 %3016  ;;  %v3011_v53 = vpop.permute.xlu0 %3010 }
0x12d7   : > { %3035 = vst.msk [vmem:[#allocation2 + $0xc] sm:$0xf] %vm3031_vm11, %v3017_v31  ;;  %3032 = vst.msk [vmem:[#allocation2] sm:$0xf] %vm3031_vm11, %v3011_v53 }
0x12da   : > { %v3013_v61 = vpop.permute.xlu1 %3012 }
0x12db   : > { %3033 = vst.msk [vmem:[#allocation2 + $0x4] sm:$0xf] %vm3031_vm11, %v3013_v61 }
0x12de   : > { %v2684_v19 = vpop.permute.xlu1 %2683  ;;  %v4119_v28 = vld [vmem:[#allocation2 + $0x8] sm:$0xff]  }
0x12df   : > { %2700 = vst.msk [vmem:[#allocation2 + $0x14] sm:$0xf] %vm2694_vm4, %v2684_v19  ;;  %v3019_v54 = vpop.permute.xlu0 %3018 }
0x12e0   : > { %3036 = vst.msk [vmem:[#allocation2 + $0x10] sm:$0xf] %vm3031_vm11, %v3019_v54 }
0x12e2   : > { %v4118_v43 = vld [vmem:[#allocation2] sm:$0xff]  }
0x12e3   : > { %v3021_v4 = vpop.permute.xlu1 %3020  ;;  %v3023_v13 = vpop.permute.xlu0 %3022  ;;  %4043 = vmatprep.mubr.msk.bf16.mxu0 %vm3107_vm14, %v4118_v43 }
0x12e4   : > { %3037 = vst.msk [vmem:[#allocation2 + $0x14] sm:$0xf] %vm3031_vm11, %v3021_v4  ;;  %v3041_v39 = vsel %vm3039_vm13, %v3023_v13, %v3040_v26  ;;  %4044 = vmatmul.mubr.msk.bf16.vlgmr.msra.gmra.mxu0 %vm3107_vm14, %v4119_v28 }
0x12e5   : > { %3042 = vst [vmem:[#allocation2 + $0x18] sm:$0x1] %v3041_v39 }
0x12eb   : > { %v4120_v16 = vld [vmem:[#allocation2 + $0x10] sm:$0xff]  }
0x12ec   : > { %v4121_v35 = vld [vmem:[#allocation2 + $0x18] ss:$0 sps:$4 sm:$0x11]   ;;  %4047 = vmatprep.mubr.msk.bf16.mxu0 %vm3107_vm14, %v4120_v16 }
0x12ed   : > { %4048 = vmatmul.mubr.msk.bf16.gmra.mxu0 %vm3107_vm14, %v4121_v35 }
0x13a4   : > { %v4045_v11 = vpop.f32.mrf.mxu0 }
0x13a5   : > { %v3163_v37 = vadd.f32 %v4045_v11, %v3570_v5 }
0x13a6   : > { %v3154_v29 = vpop.f32.mrf.mxu0 }
0x13a7   : > { %v3186_v58 = vadd.f32 %v4376_v48, %v3163_v37  ;;  %v3155_v52 = vadd.f32 %v3570_v5, %v3154_v29 }
0x13a8   : > { %v4046_v3 = vpop.f32.mrf.mxu0 }
0x13a9   : > { %v3184_v30 = vadd.f32 %v4377_v22, %v3155_v52  ;;  %v3197_v7 = vsel %vm273_vm0, %v3186_v58, 0.0  ;;  %v3166_v57 = vadd.f32 %v4046_v3, %v3570_v5 }
0x13aa   : > { %3198 = vadd.xlane.f32.xlu0 %v3197_v7  ;;  %v3157_v36 = vpop.f32.mrf.mxu0 }
0x13ab   : > { %v3158_v12 = vadd.f32 %v3570_v5, %v3157_v36  ;;  %v3191_v2 = vsel %vm273_vm0, %v3184_v30, 0.0  ;;  %v3187_v42 = vadd.f32 %v4382_v0, %v3166_v57 }
0x13ac   : > { %3192 = vadd.xlane.f32.xlu1 %v3191_v2 }
0x13ad   : > { %v3185_v47 = vadd.f32 %v4378_v20, %v3158_v12  ;;  %v4049_v49 = vpop.f32.mrf.mxu0  ;;  %v3200_v23 = vsel %vm273_vm0, %v3187_v42, 0.0 }
0x13ae   : > { %v3179_v27 = vadd.f32 %v4049_v49, %v3570_v5 }
0x13af   : > { %v3170_v56 = vpop.f32.mrf.mxu0  ;;  %v3194_v34 = vsel %vm273_vm0, %v3185_v47, 0.0 }
0x13b0   : > { %v3171_v14 = vadd.f32 %v3570_v5, %v3170_v56  ;;  %3195 = vadd.xlane.f32.xlu0 %v3194_v34  ;;  %v3190_v51 = vadd.f32 %v4380_v45, %v3179_v27 }
0x13b1   : > { %v4050_v40 = vpop.f32.mrf.mxu0 }
0x13b2   : > { %v3188_v46 = vadd.f32 %v4379_v50, %v3171_v14  ;;  %v3210_v55 = vsel %vm3209_vm7, %v3190_v51, 0.0 }
0x13b3   : > { %v3173_v60 = vpop.f32.mrf.mxu0 }
0x13b4   : > { %v3174_v15 = vadd.f32 %v3570_v5, %v3173_v60  ;;  %v3203_v44 = vsel %vm273_vm0, %v3188_v46, 0.0 }
0x13b5   : > { %3204 = vadd.xlane.f32.xlu1 %v3203_v44 }
0x13b6   : > { %v3189_v63 = vadd.f32 %v4381_v41, %v3174_v15 }
0x13b8   : > { %v3206_v18 = vsel %vm273_vm0, %v3189_v63, 0.0 }
0x13b9   : > { %3207 = vadd.xlane.f32.xlu0 %v3206_v18  ;;  %3211 = vadd.xlane.f32.xlu1 %v3210_v55 }
0x13bd   : > { %3201 = vadd.xlane.f32.xlu0 %v3200_v23 }
0x1433   : > { %v3199_v33 = vpop.xlane.xlu0 %3198 }
0x1434   : > { %v3216_v59 = vmul.f32 0.03125, %v3199_v33  ;;  %v3583_v33 = vld [vmem:[%s5523_s4 + $0x1] ss:$0 sm:$0xff] }
0x1435   : > { %v3193_v10 = vpop.xlane.xlu1 %3192 }
0x1436   : > { %v5467_v62 = vsub.f32 %v3186_v58, %v3216_v59  ;;  %v3214_v21 = vmul.f32 0.03125, %v3193_v10 }
0x1438   : > { %v5469_v1 = vsub.f32 %v3184_v30, %v3214_v21  ;;  %v3230_v24 = vmul.f32 %v5467_v62, %v5467_v62 }
0x1439   : > { %v3196_v9 = vpop.xlane.xlu0 %3195 }
0x143a   : > { %v3215_v8 = vmul.f32 0.03125, %v3196_v9  ;;  %v3241_v32 = vsel %vm273_vm0, %v3230_v24, 0.0  ;;  %v3228_v6 = vmul.f32 %v5469_v1, %v5469_v1 }
0x143b   : > { %3242 = vadd.xlane.f32.xlu1 %v3241_v32 }
0x143c   : > { %v3222_v17 = vsub.f32 %v3185_v47, %v3215_v8  ;;  %v3235_v25 = vsel %vm273_vm0, %v3228_v6, 0.0  ;;  %v3584_v6 = vld [vmem:[%s5523_s4 + $0x2] ss:$0 sm:$0xff] }
0x143e   : > { %v3205_v38 = vpop.xlane.xlu1 %3204  ;;  %v3229_v31 = vmul.f32 %v3222_v17, %v3222_v17 }
0x143f   : > { %v3218_v53 = vmul.f32 0.03125, %v3205_v38  ;;  %3236 = vadd.xlane.f32.xlu1 %v3235_v25 }
0x1440   : > { %v3238_v61 = vsel %vm273_vm0, %v3229_v31, 0.0 }
0x1441   : > { %v3225_v19 = vsub.f32 %v3188_v46, %v3218_v53  ;;  %3239 = vadd.xlane.f32.xlu0 %v3238_v61 }
0x1442   : > { %v3212_v54 = vpop.xlane.xlu1 %3211  ;;  %v3208_v43 = vpop.xlane.xlu0 %3207 }
0x1443   : > { %v3220_v4 = vmul.f32 0.03125, %v3212_v54  ;;  %v3219_v26 = vmul.f32 0.03125, %v3208_v43  ;;  %v3232_v13 = vmul.f32 %v3225_v19, %v3225_v19 }
0x1445   : > { %v3227_v28 = vsub.f32 %v3190_v51, %v3220_v4  ;;  %v3226_v39 = vsub.f32 %v3189_v63, %v3219_v26  ;;  %v3247_v16 = vsel %vm273_vm0, %v3232_v13, 0.0 }
0x1446   : > { %3248 = vadd.xlane.f32.xlu0 %v3247_v16  ;;  %v3202_v35 = vpop.xlane.xlu0 %3201 }
0x1447   : > { %v3217_v5 = vmul.f32 0.03125, %v3202_v35  ;;  %v3234_v11 = vmul.f32 %v3227_v28, %v3227_v28  ;;  %v3233_v37 = vmul.f32 %v3226_v39, %v3226_v39 }
0x1449   : > { %v3224_v29 = vsub.f32 %v3187_v42, %v3217_v5  ;;  %v3253_v48 = vsel %vm3209_vm7, %v3234_v11, 0.0  ;;  %v3250_v58 = vsel %vm273_vm0, %v3233_v37, 0.0 }
0x144a   : > { %3254 = vadd.xlane.f32.xlu0 %v3253_v48  ;;  %3251 = vadd.xlane.f32.xlu1 %v3250_v58 }
0x144b   : > { %v3231_v52 = vmul.f32 %v3224_v29, %v3224_v29 }
0x144d   : > { %v3244_v3 = vsel %vm273_vm0, %v3231_v52, 0.0 }
0x144e   : > { %3245 = vadd.xlane.f32.xlu1 %v3244_v3 }
0x14c4   : > { %v3243_v22 = vpop.xlane.xlu1 %3242 }
0x14c5   : > { %v3258_v7 = vmul.f32 0.03125, %v3243_v22 }
0x14c7   : > { %v3265_v20 = vadd.f32 1e-12, %v3258_v7 }
0x14c8   : > { %v3237_v30 = vpop.xlane.xlu1 %3236 }
0x14c9   : > { %v3256_v36 = vmul.f32 0.03125, %v3237_v30 }
0x14ca   : > { %v3240_v12 = vpop.xlane.xlu0 %3239 }
0x14cb   : > { %v3257_v2 = vmul.f32 0.03125, %v3240_v12  ;;  %v3263_v49 = vadd.f32 1e-12, %v3256_v36 }
0x14cd   : > { %v3264_v47 = vadd.f32 1e-12, %v3257_v2 }
0x14cf   : > { %v3249_v56 = vpop.xlane.xlu0 %3248  ;;  %4346 = vrsqrt.f32 %v3264_v47 }
0x14d0   : > { %v3260_v34 = vmul.f32 0.03125, %v3249_v56  ;;  %4348 = vrsqrt.f32 %v3265_v20 }
0x14d1   : > { %4350 = vrsqrt.f32 %v3263_v49 }
0x14d2   : > { %v3267_v27 = vadd.f32 1e-12, %v3260_v34 }
0x14d3   : > { %v3252_v14 = vpop.xlane.xlu1 %3251  ;;  %v3255_v40 = vpop.xlane.xlu0 %3254 }
0x14d4   : > { %4352 = vrsqrt.f32 %v3267_v27  ;;  %v3261_v50 = vmul.f32 0.03125, %v3252_v14  ;;  %v3262_v46 = vmul.f32 0.03125, %v3255_v40 }
0x14d6   : > { %v3268_v60 = vadd.f32 1e-12, %v3261_v50  ;;  %v3269_v57 = vadd.f32 1e-12, %v3262_v46 }
0x14d7   : > { %v3246_v45 = vpop.xlane.xlu1 %3245 }
0x14d8   : > { %4354 = vrsqrt.f32 %v3268_v60  ;;  %v3259_v51 = vmul.f32 0.03125, %v3246_v45 }
0x14d9   : > { %4356 = vrsqrt.f32 %v3269_v57 }
0x14da   : > { %v3266_v15 = vadd.f32 1e-12, %v3259_v51 }
0x14dc   : > { %4358 = vrsqrt.f32 %v3266_v15  ;;  %v4347_v44 = vpop.eup %4346 }
0x14dd   : > { %v4349_v41 = vpop.eup %4348  ;;  %v3278_v0 = vmul.f32 %v4347_v44, %v3222_v17 }
0x14de   : > { %v4351_v63 = vpop.eup %4350  ;;  %v3279_v18 = vmul.f32 %v4349_v41, %v5467_v62 }
0x14df   : > { %v3277_v55 = vmul.f32 %v4351_v63, %v5469_v1  ;;  %v3289_v59 = vmul.f32 %v3583_v33, %v3278_v0 }
0x14e0   : > { %v3290_v9 = vmul.f32 %v3583_v33, %v3279_v18 }
0x14e1   : > { %v4353_v42 = vpop.eup %4352  ;;  %v3288_v8 = vmul.f32 %v3583_v33, %v3277_v55  ;;  %v3300_v62 = vadd.f32 %v3584_v6, %v3289_v59 }
0x14e2   : > { %v3281_v23 = vmul.f32 %v4353_v42, %v3225_v19  ;;  %v3301_v53 = vadd.f32 %v3584_v6, %v3290_v9 }
0x14e3   : > { %v3299_v61 = vadd.f32 %v3584_v6, %v3288_v8  ;;  %v3307_v4 = vsel %vm273_vm0, %v3300_v62, -inf }
0x14e4   : > { %v3292_v10 = vmul.f32 %v3583_v33, %v3281_v23  ;;  %v3308_v35 = vsel %vm273_vm0, %v3301_v53, -inf }
0x14e5   : > { %v4355_v21 = vpop.eup %4354  ;;  %v3306_v5 = vsel %vm273_vm0, %v3299_v61, -inf }
0x14e6   : > { %v4357_v24 = vpop.eup %4356  ;;  %v3282_v32 = vmul.f32 %v4355_v21, %v3226_v39  ;;  %v3303_v38 = vadd.f32 %v3584_v6, %v3292_v10 }
0x14e7   : > { %v3283_v17 = vmul.f32 %v4357_v24, %v3227_v28 }
0x14e8   : > { %v3293_v1 = vmul.f32 %v3583_v33, %v3282_v32  ;;  %v3310_v26 = vsel %vm273_vm0, %v3303_v38, -inf }
0x14e9   : > { %v4359_v25 = vpop.eup %4358  ;;  %v3294_v31 = vmul.f32 %v3583_v33, %v3283_v17  ;;  %v3311_v37 = vmax.f32 %v3306_v5, %v3310_v26 }
0x14ea   : > { %v3304_v19 = vadd.f32 %v3584_v6, %v3293_v1  ;;  %v3280_v54 = vmul.f32 %v4359_v25, %v3224_v29 }
0x14eb   : > { %v3305_v43 = vadd.f32 %v3584_v6, %v3294_v31 }
0x14ec   : > { %v3312_v13 = vsel %vm273_vm0, %v3304_v19, -inf  ;;  %v3291_v39 = vmul.f32 %v3583_v33, %v3280_v54 }
0x14ed   : > { %v3313_v16 = vmax.f32 %v3307_v4, %v3312_v13  ;;  %v3314_v28 = vsel %vm3209_vm7, %v3305_v43, -inf }
0x14ee   : > { %v3302_v11 = vadd.f32 %v3584_v6, %v3291_v39  ;;  %v3315_v48 = vmax.f32 %v3308_v35, %v3314_v28 }
0x14ef   : > { %v3316_v58 = vmax.f32 %v3311_v37, %v3313_v16 }
0x14f0   : > { %v3309_v29 = vsel %vm273_vm0, %v3302_v11, -inf }
0x14f1   : > { %v3317_v52 = vmax.f32 %v3315_v48, %v3309_v29 }
0x14f3   : > { %v3318_v3 = vmax.f32 %v3316_v58, %v3317_v52 }
0x14f5   : > { %v3319_v22 = vrot.slane %v3318_v3, 4 }
0x14f7   : > { %v3320_v30 = vmax.f32 %v3318_v3, %v3319_v22 }
0x14f9   : > { %v3321_v7 = vrot.slane %v3320_v30, 2 }
0x14fb   : > { %v3322_v36 = vmax.f32 %v3320_v30, %v3321_v7 }
0x14fd   : > { %v3323_v12 = vrot.slane %v3322_v36, 1 }
0x14ff   : > { %v3324_v2 = vmax.f32 %v3322_v36, %v3323_v12 }
0x1501   : > { %v3325_v20 = vsub.f32 %v3299_v61, %v3324_v2  ;;  %v3326_v47 = vsub.f32 %v3300_v62, %v3324_v2  ;;  %v3327_v49 = vsub.f32 %v3301_v53, %v3324_v2  ;;  %v3328_v56 = vsub.f32 %v3302_v11, %v3324_v2 }
0x1502   : > { %v3329_v34 = vsub.f32 %v3303_v38, %v3324_v2  ;;  %v3330_v50 = vsub.f32 %v3304_v19, %v3324_v2  ;;  %v3331_v60 = vsub.f32 %v3305_v43, %v3324_v2 }
0x1503   : > { %v3332_v27 = vmul.f32 1.442695, %v3325_v20  ;;  %v3334_v14 = vmul.f32 1.442695, %v3326_v47  ;;  %v3336_v40 = vmul.f32 1.442695, %v3327_v49 }
0x1504   : > { %v3338_v46 = vmul.f32 1.442695, %v3328_v56  ;;  %v3340_v57 = vmul.f32 1.442695, %v3329_v34  ;;  %v3342_v45 = vmul.f32 1.442695, %v3330_v50 }
0x1505   : > { %4360 = vpow2.f32 %v3332_v27  ;;  %v3344_v51 = vmul.f32 1.442695, %v3331_v60 }
0x1506   : > { %4362 = vpow2.f32 %v3334_v14 }
0x1507   : > { %4364 = vpow2.f32 %v3336_v40 }
0x1508   : > { %4366 = vpow2.f32 %v3338_v46 }
0x1509   : > { %4368 = vpow2.f32 %v3340_v57 }
0x150a   : > { %4370 = vpow2.f32 %v3342_v45 }
0x150b   : > { %4372 = vpow2.f32 %v3344_v51 }
0x1512   : > { %v4361_v15 = vpop.eup %4360 }
0x1513   : > { %v4363_v44 = vpop.eup %4362  ;;  %v3346_v41 = vsel %vm273_vm0, %v4361_v15, 0.0 }
0x1514   : > { %v4365_v63 = vpop.eup %4364  ;;  %v3347_v0 = vsel %vm273_vm0, %v4363_v44, 0.0 }
0x1515   : > { %v4367_v42 = vpop.eup %4366  ;;  %v3348_v18 = vadd.f32 %v3347_v0, %v3346_v41  ;;  %v3349_v55 = vsel %vm273_vm0, %v4365_v63, 0.0 }
0x1516   : > { %v4369_v23 = vpop.eup %4368  ;;  %v3351_v59 = vsel %vm273_vm0, %v4367_v42, 0.0 }
0x1517   : > { %v3350_v33 = vadd.f32 %v3349_v55, %v3348_v18  ;;  %v4371_v10 = vpop.eup %4370  ;;  %v3353_v24 = vsel %vm273_vm0, %v4369_v23, 0.0 }
0x1518   : > { %v4373_v9 = vpop.eup %4372  ;;  %v3355_v32 = vsel %vm273_vm0, %v4371_v10, 0.0 }
0x1519   : > { %v3352_v21 = vadd.f32 %v3351_v59, %v3350_v33  ;;  %v3357_v17 = vsel %vm3209_vm7, %v4373_v9, 0.0 }
0x151b   : > { %v3354_v8 = vadd.f32 %v3353_v24, %v3352_v21 }
0x151d   : > { %v3356_v6 = vadd.f32 %v3355_v32, %v3354_v8 }
0x151f   : > { %v3358_v62 = vadd.f32 %v3357_v17, %v3356_v6 }
0x1521   : > { %v3359_v38 = vrot.slane %v3358_v62, 4 }
0x1523   : > { %v3360_v1 = vadd.f32 %v3359_v38, %v3358_v62 }
0x1525   : > { %v3361_v25 = vrot.slane %v3360_v1, 2 }
0x1527   : > { %v3362_v31 = vadd.f32 %v3361_v25, %v3360_v1 }
0x1529   : > { %v3363_v53 = vrot.slane %v3362_v31, 1 }
0x152b   : > { %v3364_v61 = vadd.f32 %v3363_v53, %v3362_v31 }
0x152d   : > { %4374 = vrcp.f32 %v3364_v61 }
0x153a   : > { %v4375_v19 = vpop.eup %4374 }
0x153b   : > { %v3366_v54 = vmul.f32 %v4375_v19, %v4361_v15  ;;  %v3367_v43 = vmul.f32 %v4375_v19, %v4363_v44  ;;  %v3368_v4 = vmul.f32 %v4375_v19, %v4365_v63  ;;  %v3369_v26 = vmul.f32 %v4375_v19, %v4367_v42 }
0x153c   : > { %v3370_v13 = vmul.f32 %v4375_v19, %v4369_v23  ;;  %v3371_v39 = vmul.f32 %v4375_v19, %v4371_v10  ;;  %v3372_v16 = vmul.f32 %v4375_v19, %v4373_v9 }
0x153d   : > { %3373 = vst.msk [vmem:[%s224_s20] sm:$0xff] %vm273_vm0, %v3366_v54  ;;  %3374 = vst.msk [vmem:[%s224_s20 + $0x8] sm:$0xff] %vm273_vm0, %v3367_v43 }
0x153e   : > { %3375 = vst.msk [vmem:[%s224_s20 + $0x10] sm:$0xff] %vm273_vm0, %v3368_v4  ;;  %3376 = vst.msk [vmem:[%s224_s20 + $0x18] sm:$0xff] %vm273_vm0, %v3369_v26 }
0x153f   : > { %3377 = vst.msk [vmem:[%s224_s20 + $0x20] sm:$0xff] %vm273_vm0, %v3370_v13  ;;  %3378 = vst.msk [vmem:[%s224_s20 + $0x28] sm:$0xff] %vm273_vm0, %v3371_v39 }
0x1540   : > { %3379 = vst.msk [vmem:[%s224_s20 + $0x30] sm:$0x1] %vm3209_vm7, %v3372_v16 }
0x1541 PF: > { %s15_s18 = sadd.s32 1, %s4389_s18  }
0x1542   : > { %p12_p4 = scmp.ge.s32.totalorder %s15_s18, 4  }
0x1544   :  { %14 = sbr.rel (!%p12_p4) target bundleno = 1 (0x1), region = 70 }

</bundles_post_ra>
